<compile_context>
chip_gen: v7x
topology: tpu7x:2x2x1
jax: 0.10.0
libtpu: 0.0.40
codegen_flags: <defaults>
</compile_context>

<pallas_src>
import functools

import jax
import jax.numpy as jnp
import numpy as np
from jax import lax
from jax.experimental import pallas as pl
from jax.experimental.pallas import tpu as pltpu


def _round_up(n, m):
    return ((n + m - 1) // m) * m


# ----------------------------------------------------------------------------
# Host-side tables.
# ----------------------------------------------------------------------------
def _make_tap_tables(D, H, W):
    """Per-tap flat lane shift + full validity mask (only used for the conv3/FC fold)."""
    N = D * H * W
    d = np.arange(D)[:, None, None]
    h = np.arange(H)[None, :, None]
    w = np.arange(W)[None, None, :]
    shifts = []
    masks = np.zeros((27, N), np.float32)
    for kd in range(3):
        for kh in range(3):
            for kw in range(3):
                tap = (kd * 3 + kh) * 3 + kw
                shifts.append((kd - 1) * H * W + (kh - 1) * W + (kw - 1))
                valid = ((d + kd - 1 >= 0) & (d + kd - 1 < D) &
                         (h + kh - 1 >= 0) & (h + kh - 1 < H) &
                         (w + kw - 1 >= 0) & (w + kw - 1 < W))
                masks[tap] = valid.reshape(N).astype(np.float32)
    return tuple(shifts), masks


def _make_axis_masks(D, H, W):
    """6 per-axis border rows (d>=1, d<=D-2, h>=1, h<=H-2, w>=1, w<=W-2) over one sample."""
    N = D * H * W
    n = np.arange(N)
    d = n // (H * W)
    h = (n // W) % H
    w = n % W
    am = np.stack([d >= 1, d <= D - 2, h >= 1, h <= H - 2, w >= 1, w <= W - 2], axis=0)
    return am.astype(np.float32)                       # (6, N)


def _pack_conv_weight(w_oidhw):
    # (C_out, C_in, 3, 3, 3) -> (C_out, 27*C_in); K index = tap*C_in + c, tap=(kd*3+kh)*3+kw
    c_out, c_in = w_oidhw.shape[:2]
    return jnp.transpose(w_oidhw, (0, 2, 3, 4, 1)).reshape(c_out, 27 * c_in)


def _fold_conv3_fc(w3, b3, wf, bf, shifts, masks27):
    """Fold conv3 (no activation) + flatten + Linear into (W_eff, const):
       logit = sum_{c,n} W_eff[c,n] * h2[c,n] + const (exact)."""
    C2 = w3.shape[1]
    N = wf.shape[1]
    w3flat = w3.reshape(C2, 27).astype(jnp.float32)    # tap = (kd*3+kh)*3+kw
    wfv = wf.reshape(N).astype(jnp.float32)
    weff = jnp.zeros((C2, N), jnp.float32)
    for tap in range(27):
        v = masks27[tap] * wfv                         # contribution weight at source n
        # scatter to m = n + shift; masks guarantee wrapped lanes are zero.
        weff = weff + w3flat[:, tap:tap + 1] * jnp.roll(v, shifts[tap])[None, :]
    const = (b3.reshape(()) * jnp.sum(wfv) + bf.reshape(())).reshape(1, 1)
    return weff, const


# ----------------------------------------------------------------------------
# Fused kernel: 2x (conv3d k=3 pad=1 + bias + LeakyReLU) + folded (conv3+FC) + sigmoid.
# One block of Bt batch samples per grid step; everything stays in VMEM.
# ----------------------------------------------------------------------------
def _disc_fused_kernel(x_ref, w1_ref, b1_ref, w2_ref, b2_ref, am_ref,
                       weff_ref, seg_ref, const_ref, o_ref, *,
                       shifts, channels, L, negative_slope, taps_per_group):
    cin, c1, _ = channels

    # 27 per-tap validity masks, built once from the 6 per-axis border rows and shared by
    # both conv layers.  Zero marks the conv zero-padding halo AND any lane where a roll
    # would cross into the neighbouring packed batch sample.
    am = am_ref[...]                                    # (6, L)
    tap_masks = []
    for kd in range(3):
        for kh in range(3):
            for kw in range(3):
                m = None
                for k, row in ((kd, 0), (kh, 2), (kw, 4)):
                    if k == 1:
                        continue
                    f = am[row:row + 1, :] if k == 0 else am[row + 1:row + 2, :]
                    m = f if m is None else m * f
                tap_masks.append(m)                     # (1, L) f32, or None (centre tap)

    def conv3x3x3(h, w_ref, b_ref, c_in, gsize, apply_act):
        # h: (c_in, L) lane-dense activations (lane = sample*N + voxel).
        # Taps are stacked into the contraction dim in groups of `gsize`, so each MXU dot
        # has K = gsize*c_in instead of 27 tiny K=c_in dots.
        c_out = w_ref.shape[0]
        acc = jnp.zeros((c_out, L), jnp.float32)
        for t0 in range(0, 27, gsize):
            taps = list(range(t0, min(27, t0 + gsize)))
            pieces = []
            for tap in taps:
                sh = (-shifts[tap]) % L                     # static, non-negative
                p = pltpu.roll(h, sh, axis=1) if sh else h  # XLU lane rotation (no halo)
                if tap_masks[tap] is not None:
                    p = p * tap_masks[tap]
                pieces.append(p)
            patch = pieces[0] if len(pieces) == 1 else jnp.concatenate(pieces, axis=0)
            wt = w_ref[:, t0 * c_in:(t0 + len(taps)) * c_in]   # (c_out, G*c_in)
            acc = acc + jnp.dot(wt, patch, preferred_element_type=jnp.float32)
        acc = acc + b_ref[...]                              # (c_out, 1) broadcast over lanes
        if apply_act:
            acc = jnp.where(acc >= 0, acc, negative_slope * acc)
        return acc

    h1 = conv3x3x3(x_ref[...], w1_ref, b1_ref, cin, taps_per_group[0], True)
    h2 = conv3x3x3(h1, w2_ref, b2_ref, c1, taps_per_group[1], True)

    # conv3 + flatten + Linear folded into the precomputed linear map (W_eff, const).
    prod = h2 * weff_ref[...]                               # (c2, L)  VPU
    per_lane = jnp.sum(prod, axis=0, keepdims=True)         # (1, L)   sublane reduce
    logits = jnp.dot(per_lane, seg_ref[...],
                     preferred_element_type=jnp.float32) + const_ref[...]   # (1, Bt)
    o_ref[...] = (1.0 / (1.0 + jnp.exp(-logits))).reshape(1, 1, -1)


# ----------------------------------------------------------------------------
# Wrapper
# ----------------------------------------------------------------------------
def discriminator_forward(params, x_ncdhw, *, batch_tile=8, target_k=256):
    w1, b1, w2, b2 = params["w1"], params["b1"], params["w2"], params["b2"]
    w3, b3, wf, bf = params["w3"], params["b3"], params["wf"], params["bf"]

    x = x_ncdhw.astype(jnp.float32)
    B, C_in, D, H, W = x.shape
    N = D * H * W
    C1, C2 = w1.shape[0], w2.shape[0]

    # ---- pack several batch samples into the lane dimension per grid step ----------
    Bt = min(batch_tile, B)
    if (Bt * N) % 128 != 0:       # keep the x block lane-aligned; else one full block
        Bt = B
    Bp = _round_up(B, Bt)
    nblk = Bp // Bt
    L = Bt * N

    # ---- pad channels to sublane multiples (no-op at realistic channel counts) -----
    Cin_p, C1_p, C2_p = (_round_up(c, 8) for c in (C_in, C1, C2))

    def pad_conv(w, b, co_p, ci_p):
        co, ci = w.shape[:2]
        w = jnp.pad(w, ((0, co_p - co), (0, ci_p - ci), (0, 0), (0, 0), (0, 0)))
        return w, jnp.pad(b, ((0, co_p - co),))

    w1p5, b1p = pad_conv(w1, b1, C1_p, Cin_p)
    w2p5, b2p = pad_conv(w2, b2, C2_p, C1_p)
    w1k = _pack_conv_weight(w1p5)                       # (C1_p, 27*Cin_p)
    w2k = _pack_conv_weight(w2p5)                       # (C2_p, 27*C1_p)

    # ---- fold conv3 + flatten + Linear into (W_eff, const) -------------------------
    shifts, masks27 = _make_tap_tables(D, H, W)
    weff, const = _fold_conv3_fc(w3, b3, wf, bf, shifts, masks27)   # (C2, N), (1, 1)
    weff = jnp.pad(weff, ((0, C2_p - C2), (0, 0)))
    weff_tiled = jnp.tile(weff, (1, Bt))                # (C2_p, L)

    # ---- small host-side tables: 6 per-axis border rows + per-sample lane selector --
    am_tiled = jnp.asarray(np.tile(_make_axis_masks(D, H, W), (1, Bt)))   # (6, L)
    seg = jnp.asarray((np.arange(L)[:, None] // N ==
                       np.arange(Bt)[None, :]).astype(np.float32))        # (L, Bt)

    # ---- pack input: (B, C, D, H, W) -> (Cin_p, Bp*N), lane index = b*N + voxel -----
    if Bp != B:
        x = jnp.concatenate(
            [x, jnp.zeros((Bp - B, C_in, D, H, W), jnp.float32)], axis=0)
    x = jnp.pad(x, ((0, 0), (0, Cin_p - C_in), (0, 0), (0, 0), (0, 0)))
    x_packed = jnp.transpose(x.reshape(Bp, Cin_p, N), (1, 0, 2)).reshape(Cin_p, Bp * N)

    # Tap-group sizes so each conv dot has K = gsize*c_in ~ target_k (128 on v5e).
    g1 = max(1, min(27, target_k // Cin_p))
    g2 = max(1, min(27, target_k // C1_p))

    kernel = functools.partial(
        _disc_fused_kernel, shifts=shifts, channels=(Cin_p, C1_p, C2_p), L=L,
        negative_slope=0.2, taps_per_group=(g1, g2))

    out = pl.pallas_call(
        kernel,
        out_shape=jax.ShapeDtypeStruct((nblk, 1, Bt), jnp.float32),
        grid_spec=pltpu.PrefetchScalarGridSpec(
            num_scalar_prefetch=0,
            grid=(nblk,),
            in_specs=[
                pl.BlockSpec((Cin_p, L), lambda b: (0, b)),
                pl.BlockSpec((C1_p, 27 * Cin_p), lambda b: (0, 0)),
                pl.BlockSpec((C1_p, 1), lambda b: (0, 0)),
                pl.BlockSpec((C2_p, 27 * C1_p), lambda b: (0, 0)),
                pl.BlockSpec((C2_p, 1), lambda b: (0, 0)),
                pl.BlockSpec((6, L), lambda b: (0, 0)),
                pl.BlockSpec((C2_p, L), lambda b: (0, 0)),
                pl.BlockSpec((L, Bt), lambda b: (0, 0)),
                pl.BlockSpec((1, 1), lambda b: (0, 0)),
            ],
            out_specs=pl.BlockSpec((1, 1, Bt), lambda b: (b, 0, 0)),
        ),
        compiler_params=pltpu.CompilerParams(dimension_semantics=("parallel",)),
    )(x_packed, w1k, b1p.reshape(-1, 1), w2k, b2p.reshape(-1, 1),
      am_tiled, weff_tiled, seg, const)

    return out.reshape(Bp, 1)[:B]


# ----------------------------------------------------------------------------
# Parameter init (PyTorch weight layouts, deterministic)
# ----------------------------------------------------------------------------
def init_params(key, input_channels, time_steps, lat_dim, lon_dim, hidden_dim):
    ks = jax.random.split(key, 8)
    scale = 0.05

    def nrm(k, shape):
        return scale * jax.random.normal(k, shape, dtype=jnp.float32)

    F = time_steps * lat_dim * lon_dim
    return dict(
        w1=nrm(ks[0], (hidden_dim, input_channels, 3, 3, 3)),
        b1=nrm(ks[1], (hidden_dim,)),
        w2=nrm(ks[2], (hidden_dim * 2, hidden_dim, 3, 3, 3)),
        b2=nrm(ks[3], (hidden_dim * 2,)),
        w3=nrm(ks[4], (1, hidden_dim * 2, 3, 3, 3)),
        b3=nrm(ks[5], (1,)),
        wf=nrm(ks[6], (1, F)),            # PyTorch Linear weight layout (out, in)
        bf=nrm(ks[7], (1,)),
    )


# ----------------------------------------------------------------------------
# Pure-JAX reference (mirrors the PyTorch module)
# ----------------------------------------------------------------------------
def discriminator_reference(params, x_ncdhw):
    x = x_ncdhw.astype(jnp.float32)
    dn = ("NCDHW", "OIDHW", "NCDHW")

    def conv(h, w, b):
        y = lax.conv_general_dilated(h, w, (1, 1, 1), [(1, 1)] * 3,
                                     dimension_numbers=dn)
        return y + b.reshape(1, -1, 1, 1, 1)

    def lrelu(y):
        return jnp.where(y >= 0, y, 0.2 * y)

    h = lrelu(conv(x, params["w1"], params["b1"]))
    h = lrelu(conv(h, params["w2"], params["b2"]))
    h = conv(h, params["w3"], params["b3"])
    flat = h.reshape(h.shape[0], -1)
    logits = flat @ params["wf"].T + params["bf"]
    return 1.0 / (1.0 + jnp.exp(-logits))


if __name__ == "__main__":
    batch = 2
    input_channels = 2
    time_steps = 4
    lat_dim = 8
    lon_dim = 8
    hidden_dim = 4

    key = jax.random.PRNGKey(0)
    k_params, k_x = jax.random.split(key)
    params = init_params(k_params, input_channels, time_steps, lat_dim,
                         lon_dim, hidden_dim)
    x = jax.random.normal(
        k_x, (batch, input_channels, time_steps, lat_dim, lon_dim),
        dtype=jnp.float32)

    out = jax.block_until_ready(discriminator_forward(params, x))
    assert out.shape == (batch, 1)

    ref = jax.block_until_ready(discriminator_reference(params, x))
    np.testing.assert_allclose(np.asarray(out), np.asarray(ref),
                               rtol=1e-4, atol=1e-5)

    print("KERNEL_OK")
</pallas_src>

<mosaic_0001>
module attributes {stable_mosaic.version = 11 : i64} {
  func.func @_disc_fused_kernel(%arg0: i32, %arg1: memref<8x512xf32, #tpu.memory_space<vmem>>, %arg2: memref<8x216xf32, #tpu.memory_space<vmem>>, %arg3: memref<8x1xf32, #tpu.memory_space<vmem>>, %arg4: memref<8x216xf32, #tpu.memory_space<vmem>>, %arg5: memref<8x1xf32, #tpu.memory_space<vmem>>, %arg6: memref<6x512xf32, #tpu.memory_space<vmem>>, %arg7: memref<8x512xf32, #tpu.memory_space<vmem>>, %arg8: memref<512x2xf32, #tpu.memory_space<vmem>>, %arg9: memref<1x1xf32, #tpu.memory_space<vmem>>, %arg10: memref<1x1x2xf32, #tpu.memory_space<vmem>>) attributes {dimension_semantics = [#tpu.dimension_semantics<parallel>], iteration_bounds = array<i64: 1>, scalar_prefetch = 0 : i64, scratch_operands = 0 : i64, tpu.core_type = #tpu.core_type<tc>, window_params = [{transform_indices = @transform_0, window_bounds = array<i64: 8, 512>}, {pipeline_mode = #tpu.pipeline_mode<synchronous>, transform_indices = @transform_1, window_bounds = array<i64: 8, 216>}, {pipeline_mode = #tpu.pipeline_mode<synchronous>, transform_indices = @transform_2, window_bounds = array<i64: 8, 1>}, {pipeline_mode = #tpu.pipeline_mode<synchronous>, transform_indices = @transform_3, window_bounds = array<i64: 8, 216>}, {pipeline_mode = #tpu.pipeline_mode<synchronous>, transform_indices = @transform_4, window_bounds = array<i64: 8, 1>}, {pipeline_mode = #tpu.pipeline_mode<synchronous>, transform_indices = @transform_5, window_bounds = array<i64: 6, 512>}, {pipeline_mode = #tpu.pipeline_mode<synchronous>, transform_indices = @transform_6, window_bounds = array<i64: 8, 512>}, {pipeline_mode = #tpu.pipeline_mode<synchronous>, transform_indices = @transform_7, window_bounds = array<i64: 512, 2>}, {pipeline_mode = #tpu.pipeline_mode<synchronous>, transform_indices = @transform_8, window_bounds = array<i64: 1, 1>}, {transform_indices = @transform_9, window_bounds = array<i64: 1, 1, 2>}]} {
    %c0 = arith.constant 0 : index
    %c0_0 = arith.constant 0 : index
    %0 = vector.load %arg6[%c0, %c0_0] : memref<6x512xf32, #tpu.memory_space<vmem>>, vector<6x512xf32>
    %1 = vector.extract_strided_slice %0 {offsets = [0, 0], sizes = [1, 512], strides = [1, 1]} : vector<6x512xf32> to vector<1x512xf32>
    %2 = vector.extract_strided_slice %0 {offsets = [2, 0], sizes = [1, 512], strides = [1, 1]} : vector<6x512xf32> to vector<1x512xf32>
    %3 = arith.mulf %1, %2 : vector<1x512xf32>
    %4 = vector.extract_strided_slice %0 {offsets = [4, 0], sizes = [1, 512], strides = [1, 1]} : vector<6x512xf32> to vector<1x512xf32>
    %5 = arith.mulf %3, %4 : vector<1x512xf32>
    %6 = vector.extract_strided_slice %0 {offsets = [0, 0], sizes = [1, 512], strides = [1, 1]} : vector<6x512xf32> to vector<1x512xf32>
    %7 = vector.extract_strided_slice %0 {offsets = [2, 0], sizes = [1, 512], strides = [1, 1]} : vector<6x512xf32> to vector<1x512xf32>
    %8 = arith.mulf %6, %7 : vector<1x512xf32>
    %9 = vector.extract_strided_slice %0 {offsets = [0, 0], sizes = [1, 512], strides = [1, 1]} : vector<6x512xf32> to vector<1x512xf32>
    %10 = vector.extract_strided_slice %0 {offsets = [2, 0], sizes = [1, 512], strides = [1, 1]} : vector<6x512xf32> to vector<1x512xf32>
    %11 = arith.mulf %9, %10 : vector<1x512xf32>
    %12 = vector.extract_strided_slice %0 {offsets = [5, 0], sizes = [1, 512], strides = [1, 1]} : vector<6x512xf32> to vector<1x512xf32>
    %13 = arith.mulf %11, %12 : vector<1x512xf32>
    %14 = vector.extract_strided_slice %0 {offsets = [0, 0], sizes = [1, 512], strides = [1, 1]} : vector<6x512xf32> to vector<1x512xf32>
    %15 = vector.extract_strided_slice %0 {offsets = [4, 0], sizes = [1, 512], strides = [1, 1]} : vector<6x512xf32> to vector<1x512xf32>
    %16 = arith.mulf %14, %15 : vector<1x512xf32>
    %17 = vector.extract_strided_slice %0 {offsets = [0, 0], sizes = [1, 512], strides = [1, 1]} : vector<6x512xf32> to vector<1x512xf32>
    %18 = vector.extract_strided_slice %0 {offsets = [0, 0], sizes = [1, 512], strides = [1, 1]} : vector<6x512xf32> to vector<1x512xf32>
    %19 = vector.extract_strided_slice %0 {offsets = [5, 0], sizes = [1, 512], strides = [1, 1]} : vector<6x512xf32> to vector<1x512xf32>
    %20 = arith.mulf %18, %19 : vector<1x512xf32>
    %21 = vector.extract_strided_slice %0 {offsets = [0, 0], sizes = [1, 512], strides = [1, 1]} : vector<6x512xf32> to vector<1x512xf32>
    %22 = vector.extract_strided_slice %0 {offsets = [3, 0], sizes = [1, 512], strides = [1, 1]} : vector<6x512xf32> to vector<1x512xf32>
    %23 = arith.mulf %21, %22 : vector<1x512xf32>
    %24 = vector.extract_strided_slice %0 {offsets = [4, 0], sizes = [1, 512], strides = [1, 1]} : vector<6x512xf32> to vector<1x512xf32>
    %25 = arith.mulf %23, %24 : vector<1x512xf32>
    %26 = vector.extract_strided_slice %0 {offsets = [0, 0], sizes = [1, 512], strides = [1, 1]} : vector<6x512xf32> to vector<1x512xf32>
    %27 = vector.extract_strided_slice %0 {offsets = [3, 0], sizes = [1, 512], strides = [1, 1]} : vector<6x512xf32> to vector<1x512xf32>
    %28 = arith.mulf %26, %27 : vector<1x512xf32>
    %29 = vector.extract_strided_slice %0 {offsets = [0, 0], sizes = [1, 512], strides = [1, 1]} : vector<6x512xf32> to vector<1x512xf32>
    %30 = vector.extract_strided_slice %0 {offsets = [3, 0], sizes = [1, 512], strides = [1, 1]} : vector<6x512xf32> to vector<1x512xf32>
    %31 = arith.mulf %29, %30 : vector<1x512xf32>
    %32 = vector.extract_strided_slice %0 {offsets = [5, 0], sizes = [1, 512], strides = [1, 1]} : vector<6x512xf32> to vector<1x512xf32>
    %33 = arith.mulf %31, %32 : vector<1x512xf32>
    %34 = vector.extract_strided_slice %0 {offsets = [2, 0], sizes = [1, 512], strides = [1, 1]} : vector<6x512xf32> to vector<1x512xf32>
    %35 = vector.extract_strided_slice %0 {offsets = [4, 0], sizes = [1, 512], strides = [1, 1]} : vector<6x512xf32> to vector<1x512xf32>
    %36 = arith.mulf %34, %35 : vector<1x512xf32>
    %37 = vector.extract_strided_slice %0 {offsets = [2, 0], sizes = [1, 512], strides = [1, 1]} : vector<6x512xf32> to vector<1x512xf32>
    %38 = vector.extract_strided_slice %0 {offsets = [2, 0], sizes = [1, 512], strides = [1, 1]} : vector<6x512xf32> to vector<1x512xf32>
    %39 = vector.extract_strided_slice %0 {offsets = [5, 0], sizes = [1, 512], strides = [1, 1]} : vector<6x512xf32> to vector<1x512xf32>
    %40 = arith.mulf %38, %39 : vector<1x512xf32>
    %41 = vector.extract_strided_slice %0 {offsets = [4, 0], sizes = [1, 512], strides = [1, 1]} : vector<6x512xf32> to vector<1x512xf32>
    %42 = vector.extract_strided_slice %0 {offsets = [5, 0], sizes = [1, 512], strides = [1, 1]} : vector<6x512xf32> to vector<1x512xf32>
    %43 = vector.extract_strided_slice %0 {offsets = [3, 0], sizes = [1, 512], strides = [1, 1]} : vector<6x512xf32> to vector<1x512xf32>
    %44 = vector.extract_strided_slice %0 {offsets = [4, 0], sizes = [1, 512], strides = [1, 1]} : vector<6x512xf32> to vector<1x512xf32>
    %45 = arith.mulf %43, %44 : vector<1x512xf32>
    %46 = vector.extract_strided_slice %0 {offsets = [3, 0], sizes = [1, 512], strides = [1, 1]} : vector<6x512xf32> to vector<1x512xf32>
    %47 = vector.extract_strided_slice %0 {offsets = [3, 0], sizes = [1, 512], strides = [1, 1]} : vector<6x512xf32> to vector<1x512xf32>
    %48 = vector.extract_strided_slice %0 {offsets = [5, 0], sizes = [1, 512], strides = [1, 1]} : vector<6x512xf32> to vector<1x512xf32>
    %49 = arith.mulf %47, %48 : vector<1x512xf32>
    %50 = vector.extract_strided_slice %0 {offsets = [1, 0], sizes = [1, 512], strides = [1, 1]} : vector<6x512xf32> to vector<1x512xf32>
    %51 = vector.extract_strided_slice %0 {offsets = [2, 0], sizes = [1, 512], strides = [1, 1]} : vector<6x512xf32> to vector<1x512xf32>
    %52 = arith.mulf %50, %51 : vector<1x512xf32>
    %53 = vector.extract_strided_slice %0 {offsets = [4, 0], sizes = [1, 512], strides = [1, 1]} : vector<6x512xf32> to vector<1x512xf32>
    %54 = arith.mulf %52, %53 : vector<1x512xf32>
    %55 = vector.extract_strided_slice %0 {offsets = [1, 0], sizes = [1, 512], strides = [1, 1]} : vector<6x512xf32> to vector<1x512xf32>
    %56 = vector.extract_strided_slice %0 {offsets = [2, 0], sizes = [1, 512], strides = [1, 1]} : vector<6x512xf32> to vector<1x512xf32>
    %57 = arith.mulf %55, %56 : vector<1x512xf32>
    %58 = vector.extract_strided_slice %0 {offsets = [1, 0], sizes = [1, 512], strides = [1, 1]} : vector<6x512xf32> to vector<1x512xf32>
    %59 = vector.extract_strided_slice %0 {offsets = [2, 0], sizes = [1, 512], strides = [1, 1]} : vector<6x512xf32> to vector<1x512xf32>
    %60 = arith.mulf %58, %59 : vector<1x512xf32>
    %61 = vector.extract_strided_slice %0 {offsets = [5, 0], sizes = [1, 512], strides = [1, 1]} : vector<6x512xf32> to vector<1x512xf32>
    %62 = arith.mulf %60, %61 : vector<1x512xf32>
    %63 = vector.extract_strided_slice %0 {offsets = [1, 0], sizes = [1, 512], strides = [1, 1]} : vector<6x512xf32> to vector<1x512xf32>
    %64 = vector.extract_strided_slice %0 {offsets = [4, 0], sizes = [1, 512], strides = [1, 1]} : vector<6x512xf32> to vector<1x512xf32>
    %65 = arith.mulf %63, %64 : vector<1x512xf32>
    %66 = vector.extract_strided_slice %0 {offsets = [1, 0], sizes = [1, 512], strides = [1, 1]} : vector<6x512xf32> to vector<1x512xf32>
    %67 = vector.extract_strided_slice %0 {offsets = [1, 0], sizes = [1, 512], strides = [1, 1]} : vector<6x512xf32> to vector<1x512xf32>
    %68 = vector.extract_strided_slice %0 {offsets = [5, 0], sizes = [1, 512], strides = [1, 1]} : vector<6x512xf32> to vector<1x512xf32>
    %69 = arith.mulf %67, %68 : vector<1x512xf32>
    %70 = vector.extract_strided_slice %0 {offsets = [1, 0], sizes = [1, 512], strides = [1, 1]} : vector<6x512xf32> to vector<1x512xf32>
    %71 = vector.extract_strided_slice %0 {offsets = [3, 0], sizes = [1, 512], strides = [1, 1]} : vector<6x512xf32> to vector<1x512xf32>
    %72 = arith.mulf %70, %71 : vector<1x512xf32>
    %73 = vector.extract_strided_slice %0 {offsets = [4, 0], sizes = [1, 512], strides = [1, 1]} : vector<6x512xf32> to vector<1x512xf32>
    %74 = arith.mulf %72, %73 : vector<1x512xf32>
    %75 = vector.extract_strided_slice %0 {offsets = [1, 0], sizes = [1, 512], strides = [1, 1]} : vector<6x512xf32> to vector<1x512xf32>
    %76 = vector.extract_strided_slice %0 {offsets = [3, 0], sizes = [1, 512], strides = [1, 1]} : vector<6x512xf32> to vector<1x512xf32>
    %77 = arith.mulf %75, %76 : vector<1x512xf32>
    %78 = vector.extract_strided_slice %0 {offsets = [1, 0], sizes = [1, 512], strides = [1, 1]} : vector<6x512xf32> to vector<1x512xf32>
    %79 = vector.extract_strided_slice %0 {offsets = [3, 0], sizes = [1, 512], strides = [1, 1]} : vector<6x512xf32> to vector<1x512xf32>
    %80 = arith.mulf %78, %79 : vector<1x512xf32>
    %81 = vector.extract_strided_slice %0 {offsets = [5, 0], sizes = [1, 512], strides = [1, 1]} : vector<6x512xf32> to vector<1x512xf32>
    %82 = arith.mulf %80, %81 : vector<1x512xf32>
    %c0_1 = arith.constant 0 : index
    %c0_2 = arith.constant 0 : index
    %83 = vector.load %arg1[%c0_1, %c0_2] : memref<8x512xf32, #tpu.memory_space<vmem>>, vector<8x512xf32>
    %cst = arith.constant 0.000000e+00 : f32
    %84 = vector.broadcast %cst : f32 to vector<8x512xf32>
    %c73_i32 = arith.constant 73 : i32
    %85 = tpu.dynamic_rotate %83 by %c73_i32 dim 1 : vector<8x512xf32>, i32 -> vector<8x512xf32>
    %86 = vector.broadcast %5 : vector<1x512xf32> to vector<8x512xf32>
    %87 = arith.mulf %85, %86 : vector<8x512xf32>
    %c72_i32 = arith.constant 72 : i32
    %88 = tpu.dynamic_rotate %83 by %c72_i32 dim 1 : vector<8x512xf32>, i32 -> vector<8x512xf32>
    %89 = vector.broadcast %8 : vector<1x512xf32> to vector<8x512xf32>
    %90 = arith.mulf %88, %89 : vector<8x512xf32>
    %c71_i32 = arith.constant 71 : i32
    %91 = tpu.dynamic_rotate %83 by %c71_i32 dim 1 : vector<8x512xf32>, i32 -> vector<8x512xf32>
    %92 = vector.broadcast %13 : vector<1x512xf32> to vector<8x512xf32>
    %93 = arith.mulf %91, %92 : vector<8x512xf32>
    %c65_i32 = arith.constant 65 : i32
    %94 = tpu.dynamic_rotate %83 by %c65_i32 dim 1 : vector<8x512xf32>, i32 -> vector<8x512xf32>
    %95 = vector.broadcast %16 : vector<1x512xf32> to vector<8x512xf32>
    %96 = arith.mulf %94, %95 : vector<8x512xf32>
    %c64_i32 = arith.constant 64 : i32
    %97 = tpu.dynamic_rotate %83 by %c64_i32 dim 1 : vector<8x512xf32>, i32 -> vector<8x512xf32>
    %98 = vector.broadcast %17 : vector<1x512xf32> to vector<8x512xf32>
    %99 = arith.mulf %97, %98 : vector<8x512xf32>
    %c63_i32 = arith.constant 63 : i32
    %100 = tpu.dynamic_rotate %83 by %c63_i32 dim 1 : vector<8x512xf32>, i32 -> vector<8x512xf32>
    %101 = vector.broadcast %20 : vector<1x512xf32> to vector<8x512xf32>
    %102 = arith.mulf %100, %101 : vector<8x512xf32>
    %c57_i32 = arith.constant 57 : i32
    %103 = tpu.dynamic_rotate %83 by %c57_i32 dim 1 : vector<8x512xf32>, i32 -> vector<8x512xf32>
    %104 = vector.broadcast %25 : vector<1x512xf32> to vector<8x512xf32>
    %105 = arith.mulf %103, %104 : vector<8x512xf32>
    %c56_i32 = arith.constant 56 : i32
    %106 = tpu.dynamic_rotate %83 by %c56_i32 dim 1 : vector<8x512xf32>, i32 -> vector<8x512xf32>
    %107 = vector.broadcast %28 : vector<1x512xf32> to vector<8x512xf32>
    %108 = arith.mulf %106, %107 : vector<8x512xf32>
    %c55_i32 = arith.constant 55 : i32
    %109 = tpu.dynamic_rotate %83 by %c55_i32 dim 1 : vector<8x512xf32>, i32 -> vector<8x512xf32>
    %110 = vector.broadcast %33 : vector<1x512xf32> to vector<8x512xf32>
    %111 = arith.mulf %109, %110 : vector<8x512xf32>
    %c9_i32 = arith.constant 9 : i32
    %112 = tpu.dynamic_rotate %83 by %c9_i32 dim 1 : vector<8x512xf32>, i32 -> vector<8x512xf32>
    %113 = vector.broadcast %36 : vector<1x512xf32> to vector<8x512xf32>
    %114 = arith.mulf %112, %113 : vector<8x512xf32>
    %c8_i32 = arith.constant 8 : i32
    %115 = tpu.dynamic_rotate %83 by %c8_i32 dim 1 : vector<8x512xf32>, i32 -> vector<8x512xf32>
    %116 = vector.broadcast %37 : vector<1x512xf32> to vector<8x512xf32>
    %117 = arith.mulf %115, %116 : vector<8x512xf32>
    %c7_i32 = arith.constant 7 : i32
    %118 = tpu.dynamic_rotate %83 by %c7_i32 dim 1 : vector<8x512xf32>, i32 -> vector<8x512xf32>
    %119 = vector.broadcast %40 : vector<1x512xf32> to vector<8x512xf32>
    %120 = arith.mulf %118, %119 : vector<8x512xf32>
    %c1_i32 = arith.constant 1 : i32
    %121 = tpu.dynamic_rotate %83 by %c1_i32 dim 1 : vector<8x512xf32>, i32 -> vector<8x512xf32>
    %122 = vector.broadcast %41 : vector<1x512xf32> to vector<8x512xf32>
    %123 = arith.mulf %121, %122 : vector<8x512xf32>
    %c511_i32 = arith.constant 511 : i32
    %124 = tpu.dynamic_rotate %83 by %c511_i32 dim 1 : vector<8x512xf32>, i32 -> vector<8x512xf32>
    %125 = vector.broadcast %42 : vector<1x512xf32> to vector<8x512xf32>
    %126 = arith.mulf %124, %125 : vector<8x512xf32>
    %c505_i32 = arith.constant 505 : i32
    %127 = tpu.dynamic_rotate %83 by %c505_i32 dim 1 : vector<8x512xf32>, i32 -> vector<8x512xf32>
    %128 = vector.broadcast %45 : vector<1x512xf32> to vector<8x512xf32>
    %129 = arith.mulf %127, %128 : vector<8x512xf32>
    %c504_i32 = arith.constant 504 : i32
    %130 = tpu.dynamic_rotate %83 by %c504_i32 dim 1 : vector<8x512xf32>, i32 -> vector<8x512xf32>
    %131 = vector.broadcast %46 : vector<1x512xf32> to vector<8x512xf32>
    %132 = arith.mulf %130, %131 : vector<8x512xf32>
    %c503_i32 = arith.constant 503 : i32
    %133 = tpu.dynamic_rotate %83 by %c503_i32 dim 1 : vector<8x512xf32>, i32 -> vector<8x512xf32>
    %134 = vector.broadcast %49 : vector<1x512xf32> to vector<8x512xf32>
    %135 = arith.mulf %133, %134 : vector<8x512xf32>
    %c457_i32 = arith.constant 457 : i32
    %136 = tpu.dynamic_rotate %83 by %c457_i32 dim 1 : vector<8x512xf32>, i32 -> vector<8x512xf32>
    %137 = vector.broadcast %54 : vector<1x512xf32> to vector<8x512xf32>
    %138 = arith.mulf %136, %137 : vector<8x512xf32>
    %c456_i32 = arith.constant 456 : i32
    %139 = tpu.dynamic_rotate %83 by %c456_i32 dim 1 : vector<8x512xf32>, i32 -> vector<8x512xf32>
    %140 = vector.broadcast %57 : vector<1x512xf32> to vector<8x512xf32>
    %141 = arith.mulf %139, %140 : vector<8x512xf32>
    %c455_i32 = arith.constant 455 : i32
    %142 = tpu.dynamic_rotate %83 by %c455_i32 dim 1 : vector<8x512xf32>, i32 -> vector<8x512xf32>
    %143 = vector.broadcast %62 : vector<1x512xf32> to vector<8x512xf32>
    %144 = arith.mulf %142, %143 : vector<8x512xf32>
    %c449_i32 = arith.constant 449 : i32
    %145 = tpu.dynamic_rotate %83 by %c449_i32 dim 1 : vector<8x512xf32>, i32 -> vector<8x512xf32>
    %146 = vector.broadcast %65 : vector<1x512xf32> to vector<8x512xf32>
    %147 = arith.mulf %145, %146 : vector<8x512xf32>
    %c448_i32 = arith.constant 448 : i32
    %148 = tpu.dynamic_rotate %83 by %c448_i32 dim 1 : vector<8x512xf32>, i32 -> vector<8x512xf32>
    %149 = vector.broadcast %66 : vector<1x512xf32> to vector<8x512xf32>
    %150 = arith.mulf %148, %149 : vector<8x512xf32>
    %c447_i32 = arith.constant 447 : i32
    %151 = tpu.dynamic_rotate %83 by %c447_i32 dim 1 : vector<8x512xf32>, i32 -> vector<8x512xf32>
    %152 = vector.broadcast %69 : vector<1x512xf32> to vector<8x512xf32>
    %153 = arith.mulf %151, %152 : vector<8x512xf32>
    %c441_i32 = arith.constant 441 : i32
    %154 = tpu.dynamic_rotate %83 by %c441_i32 dim 1 : vector<8x512xf32>, i32 -> vector<8x512xf32>
    %155 = vector.broadcast %74 : vector<1x512xf32> to vector<8x512xf32>
    %156 = arith.mulf %154, %155 : vector<8x512xf32>
    %c440_i32 = arith.constant 440 : i32
    %157 = tpu.dynamic_rotate %83 by %c440_i32 dim 1 : vector<8x512xf32>, i32 -> vector<8x512xf32>
    %158 = vector.broadcast %77 : vector<1x512xf32> to vector<8x512xf32>
    %159 = arith.mulf %157, %158 : vector<8x512xf32>
    %c439_i32 = arith.constant 439 : i32
    %160 = tpu.dynamic_rotate %83 by %c439_i32 dim 1 : vector<8x512xf32>, i32 -> vector<8x512xf32>
    %161 = vector.broadcast %82 : vector<1x512xf32> to vector<8x512xf32>
    %162 = arith.mulf %160, %161 : vector<8x512xf32>
    %163 = tpu.concatenate %87, %90, %93, %96, %99, %102, %105, %108, %111, %114, %117, %120, %123, %83, %126, %129 in 0 : vector<8x512xf32>, vector<8x512xf32>, vector<8x512xf32>, vector<8x512xf32>, vector<8x512xf32>, vector<8x512xf32>, vector<8x512xf32>, vector<8x512xf32>, vector<8x512xf32>, vector<8x512xf32>, vector<8x512xf32>, vector<8x512xf32>, vector<8x512xf32>, vector<8x512xf32>, vector<8x512xf32>, vector<8x512xf32> -> vector<128x512xf32>
    %164 = tpu.concatenate %132, %135, %138, %141, %144, %147, %150, %153, %156, %159, %162 in 0 : vector<8x512xf32>, vector<8x512xf32>, vector<8x512xf32>, vector<8x512xf32>, vector<8x512xf32>, vector<8x512xf32>, vector<8x512xf32>, vector<8x512xf32>, vector<8x512xf32>, vector<8x512xf32>, vector<8x512xf32> -> vector<88x512xf32>
    %165 = tpu.concatenate %163, %164 in 0 : vector<128x512xf32>, vector<88x512xf32> -> vector<216x512xf32>
    %c0_3 = arith.constant 0 : index
    %c0_4 = arith.constant 0 : index
    %166 = vector.load %arg2[%c0_3, %c0_4] : memref<8x216xf32, #tpu.memory_space<vmem>>, vector<8x216xf32>
    %cst_5 = arith.constant dense<0.000000e+00> : vector<8x512xf32>
    %167 = tpu.matmul %166, %165, %cst_5 {dimension_numbers = #tpu.dot_dimension_numbers<[1], [0], [0], [1], [0, 0, 1, 1], [], []>} : vector<8x216xf32>, vector<216x512xf32>, vector<8x512xf32> -> vector<8x512xf32>
    %168 = arith.addf %84, %167 : vector<8x512xf32>
    %c0_6 = arith.constant 0 : index
    %c0_7 = arith.constant 0 : index
    %169 = vector.load %arg3[%c0_6, %c0_7] : memref<8x1xf32, #tpu.memory_space<vmem>>, vector<8x1xf32>
    %170 = vector.broadcast %169 : vector<8x1xf32> to vector<8x512xf32>
    %171 = arith.addf %168, %170 : vector<8x512xf32>
    %cst_8 = arith.constant 0.000000e+00 : f32
    %172 = vector.broadcast %cst_8 : f32 to vector<8x512xf32>
    %173 = arith.cmpf oge, %171, %172 : vector<8x512xf32>
    %cst_9 = arith.constant 2.000000e-01 : f32
    %174 = vector.broadcast %cst_9 : f32 to vector<8x512xf32>
    %175 = arith.mulf %174, %171 : vector<8x512xf32>
    %176 = arith.select %173, %171, %175 : vector<8x512xi1>, vector<8x512xf32>
    %cst_10 = arith.constant 0.000000e+00 : f32
    %177 = vector.broadcast %cst_10 : f32 to vector<8x512xf32>
    %c73_i32_11 = arith.constant 73 : i32
    %178 = tpu.dynamic_rotate %176 by %c73_i32_11 dim 1 : vector<8x512xf32>, i32 -> vector<8x512xf32>
    %179 = vector.broadcast %5 : vector<1x512xf32> to vector<8x512xf32>
    %180 = arith.mulf %178, %179 : vector<8x512xf32>
    %c72_i32_12 = arith.constant 72 : i32
    %181 = tpu.dynamic_rotate %176 by %c72_i32_12 dim 1 : vector<8x512xf32>, i32 -> vector<8x512xf32>
    %182 = vector.broadcast %8 : vector<1x512xf32> to vector<8x512xf32>
    %183 = arith.mulf %181, %182 : vector<8x512xf32>
    %c71_i32_13 = arith.constant 71 : i32
    %184 = tpu.dynamic_rotate %176 by %c71_i32_13 dim 1 : vector<8x512xf32>, i32 -> vector<8x512xf32>
    %185 = vector.broadcast %13 : vector<1x512xf32> to vector<8x512xf32>
    %186 = arith.mulf %184, %185 : vector<8x512xf32>
    %c65_i32_14 = arith.constant 65 : i32
    %187 = tpu.dynamic_rotate %176 by %c65_i32_14 dim 1 : vector<8x512xf32>, i32 -> vector<8x512xf32>
    %188 = vector.broadcast %16 : vector<1x512xf32> to vector<8x512xf32>
    %189 = arith.mulf %187, %188 : vector<8x512xf32>
    %c64_i32_15 = arith.constant 64 : i32
    %190 = tpu.dynamic_rotate %176 by %c64_i32_15 dim 1 : vector<8x512xf32>, i32 -> vector<8x512xf32>
    %191 = vector.broadcast %17 : vector<1x512xf32> to vector<8x512xf32>
    %192 = arith.mulf %190, %191 : vector<8x512xf32>
    %c63_i32_16 = arith.constant 63 : i32
    %193 = tpu.dynamic_rotate %176 by %c63_i32_16 dim 1 : vector<8x512xf32>, i32 -> vector<8x512xf32>
    %194 = vector.broadcast %20 : vector<1x512xf32> to vector<8x512xf32>
    %195 = arith.mulf %193, %194 : vector<8x512xf32>
    %c57_i32_17 = arith.constant 57 : i32
    %196 = tpu.dynamic_rotate %176 by %c57_i32_17 dim 1 : vector<8x512xf32>, i32 -> vector<8x512xf32>
    %197 = vector.broadcast %25 : vector<1x512xf32> to vector<8x512xf32>
    %198 = arith.mulf %196, %197 : vector<8x512xf32>
    %c56_i32_18 = arith.constant 56 : i32
    %199 = tpu.dynamic_rotate %176 by %c56_i32_18 dim 1 : vector<8x512xf32>, i32 -> vector<8x512xf32>
    %200 = vector.broadcast %28 : vector<1x512xf32> to vector<8x512xf32>
    %201 = arith.mulf %199, %200 : vector<8x512xf32>
    %c55_i32_19 = arith.constant 55 : i32
    %202 = tpu.dynamic_rotate %176 by %c55_i32_19 dim 1 : vector<8x512xf32>, i32 -> vector<8x512xf32>
    %203 = vector.broadcast %33 : vector<1x512xf32> to vector<8x512xf32>
    %204 = arith.mulf %202, %203 : vector<8x512xf32>
    %c9_i32_20 = arith.constant 9 : i32
    %205 = tpu.dynamic_rotate %176 by %c9_i32_20 dim 1 : vector<8x512xf32>, i32 -> vector<8x512xf32>
    %206 = vector.broadcast %36 : vector<1x512xf32> to vector<8x512xf32>
    %207 = arith.mulf %205, %206 : vector<8x512xf32>
    %c8_i32_21 = arith.constant 8 : i32
    %208 = tpu.dynamic_rotate %176 by %c8_i32_21 dim 1 : vector<8x512xf32>, i32 -> vector<8x512xf32>
    %209 = vector.broadcast %37 : vector<1x512xf32> to vector<8x512xf32>
    %210 = arith.mulf %208, %209 : vector<8x512xf32>
    %c7_i32_22 = arith.constant 7 : i32
    %211 = tpu.dynamic_rotate %176 by %c7_i32_22 dim 1 : vector<8x512xf32>, i32 -> vector<8x512xf32>
    %212 = vector.broadcast %40 : vector<1x512xf32> to vector<8x512xf32>
    %213 = arith.mulf %211, %212 : vector<8x512xf32>
    %c1_i32_23 = arith.constant 1 : i32
    %214 = tpu.dynamic_rotate %176 by %c1_i32_23 dim 1 : vector<8x512xf32>, i32 -> vector<8x512xf32>
    %215 = vector.broadcast %41 : vector<1x512xf32> to vector<8x512xf32>
    %216 = arith.mulf %214, %215 : vector<8x512xf32>
    %c511_i32_24 = arith.constant 511 : i32
    %217 = tpu.dynamic_rotate %176 by %c511_i32_24 dim 1 : vector<8x512xf32>, i32 -> vector<8x512xf32>
    %218 = vector.broadcast %42 : vector<1x512xf32> to vector<8x512xf32>
    %219 = arith.mulf %217, %218 : vector<8x512xf32>
    %c505_i32_25 = arith.constant 505 : i32
    %220 = tpu.dynamic_rotate %176 by %c505_i32_25 dim 1 : vector<8x512xf32>, i32 -> vector<8x512xf32>
    %221 = vector.broadcast %45 : vector<1x512xf32> to vector<8x512xf32>
    %222 = arith.mulf %220, %221 : vector<8x512xf32>
    %c504_i32_26 = arith.constant 504 : i32
    %223 = tpu.dynamic_rotate %176 by %c504_i32_26 dim 1 : vector<8x512xf32>, i32 -> vector<8x512xf32>
    %224 = vector.broadcast %46 : vector<1x512xf32> to vector<8x512xf32>
    %225 = arith.mulf %223, %224 : vector<8x512xf32>
    %c503_i32_27 = arith.constant 503 : i32
    %226 = tpu.dynamic_rotate %176 by %c503_i32_27 dim 1 : vector<8x512xf32>, i32 -> vector<8x512xf32>
    %227 = vector.broadcast %49 : vector<1x512xf32> to vector<8x512xf32>
    %228 = arith.mulf %226, %227 : vector<8x512xf32>
    %c457_i32_28 = arith.constant 457 : i32
    %229 = tpu.dynamic_rotate %176 by %c457_i32_28 dim 1 : vector<8x512xf32>, i32 -> vector<8x512xf32>
    %230 = vector.broadcast %54 : vector<1x512xf32> to vector<8x512xf32>
    %231 = arith.mulf %229, %230 : vector<8x512xf32>
    %c456_i32_29 = arith.constant 456 : i32
    %232 = tpu.dynamic_rotate %176 by %c456_i32_29 dim 1 : vector<8x512xf32>, i32 -> vector<8x512xf32>
    %233 = vector.broadcast %57 : vector<1x512xf32> to vector<8x512xf32>
    %234 = arith.mulf %232, %233 : vector<8x512xf32>
    %c455_i32_30 = arith.constant 455 : i32
    %235 = tpu.dynamic_rotate %176 by %c455_i32_30 dim 1 : vector<8x512xf32>, i32 -> vector<8x512xf32>
    %236 = vector.broadcast %62 : vector<1x512xf32> to vector<8x512xf32>
    %237 = arith.mulf %235, %236 : vector<8x512xf32>
    %c449_i32_31 = arith.constant 449 : i32
    %238 = tpu.dynamic_rotate %176 by %c449_i32_31 dim 1 : vector<8x512xf32>, i32 -> vector<8x512xf32>
    %239 = vector.broadcast %65 : vector<1x512xf32> to vector<8x512xf32>
    %240 = arith.mulf %238, %239 : vector<8x512xf32>
    %c448_i32_32 = arith.constant 448 : i32
    %241 = tpu.dynamic_rotate %176 by %c448_i32_32 dim 1 : vector<8x512xf32>, i32 -> vector<8x512xf32>
    %242 = vector.broadcast %66 : vector<1x512xf32> to vector<8x512xf32>
    %243 = arith.mulf %241, %242 : vector<8x512xf32>
    %c447_i32_33 = arith.constant 447 : i32
    %244 = tpu.dynamic_rotate %176 by %c447_i32_33 dim 1 : vector<8x512xf32>, i32 -> vector<8x512xf32>
    %245 = vector.broadcast %69 : vector<1x512xf32> to vector<8x512xf32>
    %246 = arith.mulf %244, %245 : vector<8x512xf32>
    %c441_i32_34 = arith.constant 441 : i32
    %247 = tpu.dynamic_rotate %176 by %c441_i32_34 dim 1 : vector<8x512xf32>, i32 -> vector<8x512xf32>
    %248 = vector.broadcast %74 : vector<1x512xf32> to vector<8x512xf32>
    %249 = arith.mulf %247, %248 : vector<8x512xf32>
    %c440_i32_35 = arith.constant 440 : i32
    %250 = tpu.dynamic_rotate %176 by %c440_i32_35 dim 1 : vector<8x512xf32>, i32 -> vector<8x512xf32>
    %251 = vector.broadcast %77 : vector<1x512xf32> to vector<8x512xf32>
    %252 = arith.mulf %250, %251 : vector<8x512xf32>
    %c439_i32_36 = arith.constant 439 : i32
    %253 = tpu.dynamic_rotate %176 by %c439_i32_36 dim 1 : vector<8x512xf32>, i32 -> vector<8x512xf32>
    %254 = vector.broadcast %82 : vector<1x512xf32> to vector<8x512xf32>
    %255 = arith.mulf %253, %254 : vector<8x512xf32>
    %256 = tpu.concatenate %180, %183, %186, %189, %192, %195, %198, %201, %204, %207, %210, %213, %216, %176, %219, %222 in 0 : vector<8x512xf32>, vector<8x512xf32>, vector<8x512xf32>, vector<8x512xf32>, vector<8x512xf32>, vector<8x512xf32>, vector<8x512xf32>, vector<8x512xf32>, vector<8x512xf32>, vector<8x512xf32>, vector<8x512xf32>, vector<8x512xf32>, vector<8x512xf32>, vector<8x512xf32>, vector<8x512xf32>, vector<8x512xf32> -> vector<128x512xf32>
    %257 = tpu.concatenate %225, %228, %231, %234, %237, %240, %243, %246, %249, %252, %255 in 0 : vector<8x512xf32>, vector<8x512xf32>, vector<8x512xf32>, vector<8x512xf32>, vector<8x512xf32>, vector<8x512xf32>, vector<8x512xf32>, vector<8x512xf32>, vector<8x512xf32>, vector<8x512xf32>, vector<8x512xf32> -> vector<88x512xf32>
    %258 = tpu.concatenate %256, %257 in 0 : vector<128x512xf32>, vector<88x512xf32> -> vector<216x512xf32>
    %c0_37 = arith.constant 0 : index
    %c0_38 = arith.constant 0 : index
    %259 = vector.load %arg4[%c0_37, %c0_38] : memref<8x216xf32, #tpu.memory_space<vmem>>, vector<8x216xf32>
    %cst_39 = arith.constant dense<0.000000e+00> : vector<8x512xf32>
    %260 = tpu.matmul %259, %258, %cst_39 {dimension_numbers = #tpu.dot_dimension_numbers<[1], [0], [0], [1], [0, 0, 1, 1], [], []>} : vector<8x216xf32>, vector<216x512xf32>, vector<8x512xf32> -> vector<8x512xf32>
    %261 = arith.addf %177, %260 : vector<8x512xf32>
    %c0_40 = arith.constant 0 : index
    %c0_41 = arith.constant 0 : index
    %262 = vector.load %arg5[%c0_40, %c0_41] : memref<8x1xf32, #tpu.memory_space<vmem>>, vector<8x1xf32>
    %263 = vector.broadcast %262 : vector<8x1xf32> to vector<8x512xf32>
    %264 = arith.addf %261, %263 : vector<8x512xf32>
    %cst_42 = arith.constant 0.000000e+00 : f32
    %265 = vector.broadcast %cst_42 : f32 to vector<8x512xf32>
    %266 = arith.cmpf oge, %264, %265 : vector<8x512xf32>
    %cst_43 = arith.constant 2.000000e-01 : f32
    %267 = vector.broadcast %cst_43 : f32 to vector<8x512xf32>
    %268 = arith.mulf %267, %264 : vector<8x512xf32>
    %269 = arith.select %266, %264, %268 : vector<8x512xi1>, vector<8x512xf32>
    %c0_44 = arith.constant 0 : index
    %c0_45 = arith.constant 0 : index
    %270 = vector.load %arg7[%c0_44, %c0_45] : memref<8x512xf32, #tpu.memory_space<vmem>>, vector<8x512xf32>
    %271 = arith.mulf %269, %270 : vector<8x512xf32>
    %cst_46 = arith.constant dense<0.000000e+00> : vector<512xf32>
    %272 = vector.multi_reduction <add>, %271, %cst_46 [0] : vector<8x512xf32> to vector<512xf32>
    %273 = vector.shape_cast %272 : vector<512xf32> to vector<1x512xf32>
    %c0_47 = arith.constant 0 : index
    %c0_48 = arith.constant 0 : index
    %274 = vector.load %arg8[%c0_47, %c0_48] : memref<512x2xf32, #tpu.memory_space<vmem>>, vector<512x2xf32>
    %cst_49 = arith.constant dense<0.000000e+00> : vector<1x2xf32>
    %275 = tpu.matmul %273, %274, %cst_49 {dimension_numbers = #tpu.dot_dimension_numbers<[1], [0], [0], [1], [0, 0, 1, 1], [], []>} : vector<1x512xf32>, vector<512x2xf32>, vector<1x2xf32> -> vector<1x2xf32>
    %c0_50 = arith.constant 0 : index
    %c0_51 = arith.constant 0 : index
    %276 = vector.load %arg9[%c0_50, %c0_51] : memref<1x1xf32, #tpu.memory_space<vmem>>, vector<1x1xf32>
    %277 = vector.broadcast %276 : vector<1x1xf32> to vector<1x2xf32>
    %278 = arith.addf %275, %277 : vector<1x2xf32>
    %cst_52 = arith.constant 0.000000e+00 : f32
    %279 = vector.broadcast %cst_52 : f32 to vector<1x2xf32>
    %280 = arith.subf %279, %278 : vector<1x2xf32>
    %281 = math.exp %280 : vector<1x2xf32>
    %cst_53 = arith.constant 1.000000e+00 : f32
    %282 = vector.broadcast %cst_53 : f32 to vector<1x2xf32>
    %283 = arith.addf %282, %281 : vector<1x2xf32>
    %cst_54 = arith.constant 1.000000e+00 : f32
    %284 = vector.broadcast %cst_54 : f32 to vector<1x2xf32>
    %285 = arith.divf %284, %283 : vector<1x2xf32>
    %286 = vector.shape_cast %285 : vector<1x2xf32> to vector<1x1x2xf32>
    %c0_55 = arith.constant 0 : index
    %c0_56 = arith.constant 0 : index
    %c0_57 = arith.constant 0 : index
    %287 = vector.load %arg10[%c0_55, %c0_56, %c0_57] : memref<1x1x2xf32, #tpu.memory_space<vmem>>, vector<1x1x2xf32>
    tpu.vector_store %arg10[%c0_55, %c0_56, %c0_57], %286 {strides = array<i32>} : memref<1x1x2xf32, #tpu.memory_space<vmem>>, vector<1x1x2xf32>,
    return
  }
  func.func @transform_0(%arg0: i32) -> (i32, i32) {
    %c0_i32 = arith.constant 0 : i32
    %c0_i32_0 = arith.constant 0 : i32
    return %c0_i32, %arg0 : i32, i32
  }
  func.func @transform_1(%arg0: i32) -> (i32, i32) {
    %c0_i32 = arith.constant 0 : i32
    %c0_i32_0 = arith.constant 0 : i32
    %c0_i32_1 = arith.constant 0 : i32
    return %c0_i32, %c0_i32_0 : i32, i32
  }
  func.func @transform_2(%arg0: i32) -> (i32, i32) {
    %c0_i32 = arith.constant 0 : i32
    %c0_i32_0 = arith.constant 0 : i32
    %c0_i32_1 = arith.constant 0 : i32
    return %c0_i32, %c0_i32_0 : i32, i32
  }
  func.func @transform_3(%arg0: i32) -> (i32, i32) {
    %c0_i32 = arith.constant 0 : i32
    %c0_i32_0 = arith.constant 0 : i32
    %c0_i32_1 = arith.constant 0 : i32
    return %c0_i32, %c0_i32_0 : i32, i32
  }
  func.func @transform_4(%arg0: i32) -> (i32, i32) {
    %c0_i32 = arith.constant 0 : i32
    %c0_i32_0 = arith.constant 0 : i32
    %c0_i32_1 = arith.constant 0 : i32
    return %c0_i32, %c0_i32_0 : i32, i32
  }
  func.func @transform_5(%arg0: i32) -> (i32, i32) {
    %c0_i32 = arith.constant 0 : i32
    %c0_i32_0 = arith.constant 0 : i32
    %c0_i32_1 = arith.constant 0 : i32
    return %c0_i32, %c0_i32_0 : i32, i32
  }
  func.func @transform_6(%arg0: i32) -> (i32, i32) {
    %c0_i32 = arith.constant 0 : i32
    %c0_i32_0 = arith.constant 0 : i32
    %c0_i32_1 = arith.constant 0 : i32
    return %c0_i32, %c0_i32_0 : i32, i32
  }
  func.func @transform_7(%arg0: i32) -> (i32, i32) {
    %c0_i32 = arith.constant 0 : i32
    %c0_i32_0 = arith.constant 0 : i32
    %c0_i32_1 = arith.constant 0 : i32
    return %c0_i32, %c0_i32_0 : i32, i32
  }
  func.func @transform_8(%arg0: i32) -> (i32, i32) {
    %c0_i32 = arith.constant 0 : i32
    %c0_i32_0 = arith.constant 0 : i32
    %c0_i32_1 = arith.constant 0 : i32
    return %c0_i32, %c0_i32_0 : i32, i32
  }
  func.func @transform_9(%arg0: i32) -> (i32, i32, i32) {
    %c0_i32 = arith.constant 0 : i32
    %c0_i32_0 = arith.constant 0 : i32
    %c0_i32_1 = arith.constant 0 : i32
    return %arg0, %c0_i32, %c0_i32_0 : i32, i32, i32
  }
}

</mosaic_0001>

<bundles_post_ra>
// kernel: tpu_custom_call.1
= control target key start
LH: loop header
LB: loop body
LE: loop exit
PB: predicated region body
PF: predicated region fallthrough
CT: control target
= control target key end

     0   :  { %s4341_s0 = inlined_call_operand.vmem [shape: f32[8,512], index: 0, kind: input, shape index: {}]   ;;  %s4342_s1 = inlined_call_operand.vmem [shape: f32[8,216], index: 1, kind: input, shape index: {}]   ;;  %s4343_s2 = inlined_call_operand.vmem [shape: f32[8,1], index: 2, kind: input, shape index: {}]   ;;  %s4344_s3 = inlined_call_operand.vmem [shape: f32[8,216], index: 3, kind: input, shape index: {}]   ;;  %s4345_s4 = inlined_call_operand.vmem [shape: f32[8,1], index: 4, kind: input, shape index: {}]   ;;  %s4346_s5 = inlined_call_operand.vmem [shape: f32[6,512], index: 5, kind: input, shape index: {}]   ;;  %s4347_s6 = inlined_call_operand.vmem [shape: f32[8,512], index: 6, kind: input, shape index: {}]   ;;  %s4348_s7 = inlined_call_operand.vmem [shape: f32[512,2], index: 7, kind: input, shape index: {}]   ;;  %s4349_s8 = inlined_call_operand.<no memory space> [shape: f32[1,1], index: 8, kind: input, shape index: {}]   ;;  %s4350_s9 = inlined_call_operand.hbm [shape: f32[1,1,2], index: 9, kind: output, shape index: {}]  }
   0x1   :  { %v14_v0 = vstv %s4349_s8 }
   0x2   :  { %15 = vst [vmem:[#allocation2] sm:$0x1] %v14_v0 }
   0x3   :  { %v2261_v1 = vld [vmem:[%s4341_s0] sm:$0xff]  ;;  %s2186_s13 = smov 72   ;;  %s2187_s14 = smov 73   ;;  %v2270_v2 = vld [vmem:[%s4341_s0 + $0x8] sm:$0xff]  ;;  %v2279_v3 = vld [vmem:[%s4341_s0 + $0x18] sm:$0xff] }
   0x4   :  { %170 = vrot.lane.b32.xlu1 %v2261_v1, %s2186_s13  ;;  %135 = vrot.lane.b32.xlu0 %v2261_v1, %s2187_s14  ;;  %v2284_v4 = vld [vmem:[%s4341_s0 + $0x10] sm:$0xff] }
   0x8   :  { %172 = vrot.lane.b32.xlu1 %v2270_v2, %s2186_s13  ;;  %137 = vrot.lane.b32.xlu0 %v2270_v2, %s2187_s14 }
   0x9   :  { %16 = vsyncpa [#allocation4], 0  ;;  %s2188_s20 = smov 71   ;;  %s2189_s21 = smov 65   ;;  %v2385_v5 = vld [vmem:[%s4346_s5 + $0x18] sm:$0x3f]  ;;  %v143_v8 = vlaneseq }
   0xa   :  { %s2190_s22 = smov 64   ;;  %s2191_s23 = smov 63   ;;  %v2390_v6 = vld [vmem:[%s4346_s5 + $0x8] sm:$0x3f]  ;;  %v2395_v7 = vld [vmem:[%s4346_s5] sm:$0x3f] }
   0xb   :  { %s2192_s24 = smov 57   ;;  %s2193_s25 = smov 56   ;;  %v110_v9 = vrot.slane %v2385_v5, 1  ;;  %v44_v10 = vrot.slane %v2390_v6, 2  ;;  %v107_v11 = vrot.slane %v2395_v7, 1  ;;  %v2404_v12 = vshrl.u32 %v143_v8, 7 }
   0xc   :  { %141 = vrot.lane.b32.xlu1 %v2279_v3, %s2187_s14  ;;  %139 = vrot.lane.b32.xlu0 %v2284_v4, %s2187_s14  ;;  %s2194_s26 = smov 55   ;;  %s2195_s27 = smov 9   ;;  %v2407_v13 = vrot.slane %v2385_v5, 3  ;;  %v108_v15 = vrot.slane %v2390_v6, 1  ;;  %v2416_v16 = vld [vmem:[%s4346_s5 + $0x10] sm:$0x3f] }
   0xd   :  { %s2196_s28 = smov 8   ;;  %s2197_s29 = smov 7   ;;  %v2410_v14 = vmul.f32 %v110_v9, %v2385_v5  ;;  %v2423_v17 = vmul.f32 %v44_v10, %v2390_v6  ;;  %v2426_v18 = vrot.slane %v2390_v6, 4  ;;  %v2429_v19 = vrot.slane %v2395_v7, 3 }
   0xe   :  { %s2198_s30 = smov 1   ;;  %s2199_s17 = smov 127   ;;  %v2432_v20 = vmul.f32 %v107_v11, %v2395_v7  ;;  %v2434_v21 = vand.u32 127, %v143_v8  ;;  %v43_v22 = vrot.slane %v2395_v7, 2  ;;  %v46_v23 = vrot.slane %v2385_v5, 2 }
   0xf   :  { %s2200_s10 = smov 121   ;;  %v109_v24 = vrot.slane %v2416_v16, 1  ;;  %v122_v25 = vmul.f32 %v2410_v14, %v2407_v13  ;;  %v2442_v26 = vrot.slane %v2390_v6, 3  ;;  %v2445_v27 = vmul.f32 %v108_v15, %v2390_v6  ;;  %s2201_s11 = smov 120  }
  0x10   :  { %176 = vrot.lane.b32.xlu1 %v2279_v3, %s2186_s13  ;;  %174 = vrot.lane.b32.xlu0 %v2284_v4, %s2186_s13  ;;  %v2452_v28 = vsub.s32 1, %v2404_v12  ;;  %v2456_v29 = vmul.f32 %v2426_v18, %v2423_v17  ;;  %v119_v30 = vmul.f32 %v2432_v20, %v2429_v19  ;;  %v2461_v31 = vsub.s32 0, %v2404_v12  ;;  %s2202_s12 = smov 119  }
  0x11   :  { %vm145_vm0 = vcmp.lt.s32.totalorder %v2434_v21, 73  ;;  %v2465_v32 = vrot.slane %v2395_v7, 4  ;;  %v2468_v33 = vrot.slane %v2385_v5, 4  ;;  %v45_v34 = vrot.slane %v2416_v16, 2 }
  0x12   :  { %4491 = vst [vmem:[#allocation6_spill] sm:$0xff] %v2456_v29  ;;  %4492 = vst [vmem:[#allocation7_spill] sm:$0xff] %v2461_v31  ;;  %v2474_v37 = vmul.f32 %v43_v22, %v2395_v7  ;;  %v2477_v38 = vmul.f32 %v46_v23, %v2385_v5  ;;  %v2480_v39 = vrot.slane %v2416_v16, 3  ;;  %v2483_v40 = vmul.f32 %v109_v24, %v2416_v16 }
  0x13   :  { %v2487_v41 = vmul.f32 %v2407_v13, %v2385_v5  ;;  %v2490_v42 = vrot.slane %v122_v25, %v2452_v28  ;;  %v120_v43 = vmul.f32 %v2445_v27, %v2442_v26  ;;  %v2496_v44 = vmul.f32 %v2429_v19, %v2395_v7 }
  0x14   :  { %205 = vrot.lane.b32.xlu1 %v2270_v2, %s2188_s20  ;;  %203 = vrot.lane.b32.xlu0 %v2261_v1, %s2188_s20  ;;  %v2504_v45 = vrot.slane %v2456_v29, %v2461_v31  ;;  %vm178_vm1 = vcmp.lt.s32.totalorder %v2434_v21, 72  ;;  %v2509_v46 = vrot.slane %v2423_v17, %v2461_v31  ;;  %v2512_v47 = vrot.slane %v119_v30, %v2452_v28 }
  0x15   :  { %4493 = vst [vmem:[#allocation8_spill] sm:$0xff] %v2490_v42  ;;  %v2516_v48 = vrot.slane %v2432_v20, %v2452_v28  ;;  %v2519_v49 = vrot.slane %v2390_v6, 5  ;;  %v2522_v50 = vmul.f32 %v45_v34, %v2416_v16  ;;  %v2525_v51 = vrot.slane %v2416_v16, 4 }
  0x16   :  { %4494 = vst [vmem:[#allocation9_spill] sm:$0xff] %v2504_v45  ;;  %4495 = vst [vmem:[#allocation10_spill] sm:$0xff] %v2509_v46  ;;  %v2529_v54 = vrot.slane %v2410_v14, %v2452_v28  ;;  %v2533_v55 = vmul.f32 %v2465_v32, %v2474_v37  ;;  %v2537_v56 = vmul.f32 %v2468_v33, %v2477_v38  ;;  %vm211_vm2 = vcmp.lt.s32.totalorder %v2434_v21, 71 }
  0x17   :  { %4496 = vst [vmem:[#allocation11_spill] sm:$0xff] %v2512_v47  ;;  %4497 = vst [vmem:[#allocation12_spill] sm:$0xff] %v2516_v48  ;;  %v121_v57 = vmul.f32 %v2483_v40, %v2480_v39  ;;  %v2542_v58 = vrot.slane %v120_v43, %v2452_v28  ;;  %v2551_v61 = vrot.slane %v2445_v27, %v2452_v28  ;;  %vm244_vm3 = vcmp.lt.s32.totalorder %v2434_v21, 65 }
  0x18   :  { %238 = vrot.lane.b32.xlu1 %v2270_v2, %s2189_s21  ;;  %236 = vrot.lane.b32.xlu0 %v2261_v1, %s2189_s21  ;;  %4498 = vst [vmem:[#allocation13_spill] sm:$0xff] %v2529_v54  ;;  %4499 = vst [vmem:[#allocation14_spill] sm:$0xff] %v2533_v55  ;;  %v76_v9 = vmul.f32 %v2519_v49, %v2423_v17  ;;  %v123_v10 = vmul.f32 %v2432_v20, %v2465_v32  ;;  %vm277_vm4 = vcmp.lt.s32.totalorder %v2434_v21, 64  ;;  %vm886_vm5 = vcmask 719872  }
  0x19   :  { %4500 = vst [vmem:[#allocation15_spill] sm:$0xff] %v2537_v56  ;;  %4501 = vst [vmem:[#allocation16_spill] sm:$0xff] %v2542_v58  ;;  %v2571_v11 = vmul.f32 %v2525_v51, %v2522_v50  ;;  %v2575_v24 = vrot.slane %v2533_v55, %v2461_v31  ;;  %v2579_v25 = vrot.slane %v2537_v56, %v2461_v31  ;;  %vm310_vm6 = vcmp.lt.s32.totalorder %v2434_v21, 63 }
  0x1a   :  { %4502 = vst [vmem:[#allocation17_spill] sm:$0xff] %v2551_v61  ;;  %v2582_v30 = vrot.slane %v121_v57, %v2452_v28  ;;  %v2607_v57 = vmul.f32 %v2426_v18, %v2390_v6  ;;  %v2730_v56 = vmul.f32 %v2480_v39, %v2416_v16  ;;  %vm343_vm7 = vcmp.lt.s32.totalorder %v2434_v21, 57 }
  0x1b   :  { %4505 = vst [vmem:[#allocation20_spill] sm:$0xff] %v2571_v11  ;;  %4506 = vst [vmem:[#allocation21_spill] sm:$0xff] %v2575_v24  ;;  %vm376_vm8 = vcmp.lt.s32.totalorder %v2434_v21, 56  ;;  %vm409_vm9 = vcmp.lt.s32.totalorder %v2434_v21, 55  ;;  %vm442_vm10 = vcmp.lt.s32.totalorder %v2434_v21, 9  ;;  %vm475_vm11 = vcmp.lt.s32.totalorder %v2434_v21, 8 }
  0x1c   :  { %209 = vrot.lane.b32.xlu1 %v2279_v3, %s2188_s20  ;;  %207 = vrot.lane.b32.xlu0 %v2284_v4, %s2188_s20  ;;  %4507 = vst [vmem:[#allocation22_spill] sm:$0xff] %v2579_v25  ;;  %4508 = vst [vmem:[#allocation23_spill] sm:$0xff] %v2582_v30  ;;  %vm508_vm12 = vcmp.lt.s32.totalorder %v2434_v21, 7  ;;  %vm541_vm13 = vcmp.lt.s32.totalorder %v2434_v21, 1  ;;  %vm4445_vm14 = vcmp.lt.s32.totalorder %v2434_v21, 127  ;;  %vm4448_vm15 = vcmp.lt.s32.totalorder %v2434_v21, 121 }
  0x20   :  { %242 = vrot.lane.b32.xlu1 %v2279_v3, %s2189_s21  ;;  %240 = vrot.lane.b32.xlu0 %v2284_v4, %s2189_s21 }
  0x24   :  { %271 = vrot.lane.b32.xlu1 %v2270_v2, %s2190_s22  ;;  %269 = vrot.lane.b32.xlu0 %v2261_v1, %s2190_s22 }
  0x28   :  { %304 = vrot.lane.b32.xlu1 %v2270_v2, %s2191_s23  ;;  %302 = vrot.lane.b32.xlu0 %v2261_v1, %s2191_s23 }
  0x2c   :  { %275 = vrot.lane.b32.xlu1 %v2279_v3, %s2190_s22  ;;  %273 = vrot.lane.b32.xlu0 %v2284_v4, %s2190_s22 }
  0x30   :  { %308 = vrot.lane.b32.xlu1 %v2279_v3, %s2191_s23  ;;  %306 = vrot.lane.b32.xlu0 %v2284_v4, %s2191_s23 }
  0x34   :  { %337 = vrot.lane.b32.xlu1 %v2270_v2, %s2192_s24  ;;  %335 = vrot.lane.b32.xlu0 %v2261_v1, %s2192_s24 }
  0x38   :  { %370 = vrot.lane.b32.xlu1 %v2270_v2, %s2193_s25  ;;  %368 = vrot.lane.b32.xlu0 %v2261_v1, %s2193_s25 }
  0x3c   :  { %341 = vrot.lane.b32.xlu1 %v2279_v3, %s2192_s24  ;;  %339 = vrot.lane.b32.xlu0 %v2284_v4, %s2192_s24 }
  0x40   :  { %374 = vrot.lane.b32.xlu1 %v2279_v3, %s2193_s25  ;;  %372 = vrot.lane.b32.xlu0 %v2284_v4, %s2193_s25 }
  0x44   :  { %403 = vrot.lane.b32.xlu1 %v2270_v2, %s2194_s26  ;;  %401 = vrot.lane.b32.xlu0 %v2261_v1, %s2194_s26 }
  0x48   :  { %436 = vrot.lane.b32.xlu1 %v2270_v2, %s2195_s27  ;;  %434 = vrot.lane.b32.xlu0 %v2261_v1, %s2195_s27 }
  0x4c   :  { %407 = vrot.lane.b32.xlu1 %v2279_v3, %s2194_s26  ;;  %405 = vrot.lane.b32.xlu0 %v2284_v4, %s2194_s26 }
  0x50   :  { %440 = vrot.lane.b32.xlu1 %v2279_v3, %s2195_s27  ;;  %438 = vrot.lane.b32.xlu0 %v2284_v4, %s2195_s27 }
  0x54   :  { %469 = vrot.lane.b32.xlu1 %v2270_v2, %s2196_s28  ;;  %467 = vrot.lane.b32.xlu0 %v2261_v1, %s2196_s28 }
  0x58   :  { %502 = vrot.lane.b32.xlu1 %v2270_v2, %s2197_s29  ;;  %500 = vrot.lane.b32.xlu0 %v2261_v1, %s2197_s29 }
  0x5c   :  { %473 = vrot.lane.b32.xlu1 %v2279_v3, %s2196_s28  ;;  %471 = vrot.lane.b32.xlu0 %v2284_v4, %s2196_s28 }
  0x60   :  { %506 = vrot.lane.b32.xlu1 %v2279_v3, %s2197_s29  ;;  %504 = vrot.lane.b32.xlu0 %v2284_v4, %s2197_s29 }
  0x64   :  { %535 = vrot.lane.b32.xlu1 %v2270_v2, %s2198_s30  ;;  %533 = vrot.lane.b32.xlu0 %v2261_v1, %s2198_s30 }
  0x68   :  { %539 = vrot.lane.b32.xlu1 %v2279_v3, %s2198_s30  ;;  %537 = vrot.lane.b32.xlu0 %v2284_v4, %s2198_s30 }
  0x6c   :  { %570 = vrot.lane.b32.xlu1 %v2284_v4, %s2199_s17  ;;  %568 = vrot.lane.b32.xlu0 %v2270_v2, %s2199_s17 }
  0x70   :  { %603 = vrot.lane.b32.xlu1 %v2284_v4, %s2200_s10  ;;  %601 = vrot.lane.b32.xlu0 %v2270_v2, %s2200_s10 }
  0x74   :  { %572 = vrot.lane.b32.xlu1 %v2279_v3, %s2199_s17  ;;  %566 = vrot.lane.b32.xlu0 %v2261_v1, %s2199_s17 }
  0x76   :  { %v2471_v35 = vpop.permute.xlu1 %170  ;;  %v136_v36 = vpop.permute.xlu0 %135 }
  0x78   :  { %605 = vrot.lane.b32.xlu1 %v2279_v3, %s2200_s10  ;;  %599 = vrot.lane.b32.xlu0 %v2261_v1, %s2200_s10 }
  0x7a   :  { %v173_v52 = vpop.permute.xlu1 %172  ;;  %v138_v53 = vpop.permute.xlu0 %137 }
  0x7b   :  { %v148_v59 = vsel %vm145_vm0, %v136_v36, %v138_v53  ;;  %v181_v60 = vsel %vm178_vm1, %v2471_v35, %v173_v52 }
  0x7c   :  { %636 = vrot.lane.b32.xlu1 %v2284_v4, %s2201_s11  ;;  %634 = vrot.lane.b32.xlu0 %v2270_v2, %s2201_s11  ;;  %v167_v62 = vmul.f32 %v2504_v45, %v148_v59  ;;  %v200_v63 = vmul.f32 %v2509_v46, %v181_v60  ;;  %v2560_v0 = vmul.f32 %v2512_v47, %v148_v59 }
  0x7d   :  { %v2563_v8 = vmul.f32 %v2516_v48, %v181_v60 }
  0x7e   :  { %4503 = vst [vmem:[#allocation18_spill] sm:$0xff] %v2560_v0  ;;  %v142_v15 = vpop.permute.xlu1 %141  ;;  %v140_v22 = vpop.permute.xlu0 %139  ;;  %v1859_v23 = vpack.c.bf16 %v200_v63, %v167_v62  ;;  %v2619_v62 = vrot.slane %v2522_v50, %v2461_v31  ;;  %v2622_v63 = vrot.slane %v2395_v7, 5 }
  0x7f   :  { %4504 = vst [vmem:[#allocation19_spill] sm:$0xff] %v2563_v8  ;;  %v149_v34 = vsel %vm145_vm0, %v142_v15, %v136_v36  ;;  %v147_v43 = vsel %vm145_vm0, %v138_v53, %v140_v22  ;;  %v146_v59 = vsel %vm145_vm0, %v140_v22, %v142_v15  ;;  %v2599_v36 = vrot.slane %v2474_v37, %v2461_v31 }
  0x80   :  { %669 = vrot.lane.b32.xlu1 %v2284_v4, %s2202_s12  ;;  %667 = vrot.lane.b32.xlu0 %v2270_v2, %s2202_s12  ;;  %v2603_v53 = vrot.slane %v2477_v38, %v2461_v31  ;;  %v2611_v4 = vrot.slane %v2483_v40, %v2452_v28  ;;  %v2615_v2 = vrot.slane %v2571_v11, %v2461_v31 }
  0x81   :  { %4509 = vst [vmem:[#allocation24_spill] sm:$0xff] %v2599_v36  ;;  %1860 = vmatprep.subr.bf16.mxu0 %v1859_v23  ;;  %4513 = vst [vmem:[#allocation28_spill] sm:$0xff] %v2619_v62  ;;  %v2625_v15 = vmul.f32 %v2490_v42, %v149_v34  ;;  %v2628_v22 = vmul.f32 %v2542_v58, %v147_v43  ;;  %v166_v48 = vmul.f32 %v2575_v24, %v149_v34 }
  0x82   :  { %4510 = vst [vmem:[#allocation25_spill] sm:$0xff] %v2603_v53  ;;  %4511 = vst [vmem:[#allocation26_spill] sm:$0xff] %v2611_v4  ;;  %v177_v23 = vpop.permute.xlu1 %176  ;;  %v175_v60 = vpop.permute.xlu0 %174  ;;  %v169_v46 = vmul.f32 %v2579_v25, %v146_v59  ;;  %v2640_v11 = vmul.f32 %v2582_v30, %v146_v59  ;;  %v2663_v24 = vrot.slane %v2385_v5, 5 }
  0x83   :  { %4512 = vst [vmem:[#allocation27_spill] sm:$0xff] %v2615_v2  ;;  %4514 = vst [vmem:[#allocation29_spill] sm:$0xff] %v2625_v15  ;;  %v182_v47 = vsel %vm178_vm1, %v177_v23, %v2471_v35  ;;  %v180_v45 = vsel %vm178_vm1, %v173_v52, %v175_v60  ;;  %v179_v42 = vsel %vm178_vm1, %v175_v60, %v177_v23  ;;  %v2654_v52 = vrot.slane %v2416_v16, 5 }
  0x84   :  { %4515 = vst [vmem:[#allocation30_spill] sm:$0xff] %v2628_v22  ;;  %4516 = vst [vmem:[#allocation31_spill] sm:$0xff] %v2640_v11  ;;  %v2643_v58 = vmul.f32 %v2529_v54, %v182_v47  ;;  %v2646_v34 = vmul.f32 %v2551_v61, %v180_v45  ;;  %638 = vrot.lane.b32.xlu1 %v2279_v3, %s2201_s11  ;;  %632 = vrot.lane.b32.xlu0 %v2261_v1, %s2201_s11 }
  0x85   :  { %v199_v35 = vmul.f32 %v2599_v36, %v182_v47  ;;  %v202_v59 = vmul.f32 %v2603_v53, %v179_v42  ;;  %v2658_v60 = vmul.f32 %v2611_v4, %v179_v42  ;;  %v168_v23 = vmul.f32 %v2615_v2, %v147_v43 }
  0x86   :  { %4517 = vst [vmem:[#allocation32_spill] sm:$0xff] %v2643_v58  ;;  %v201_v30 = vmul.f32 %v2619_v62, %v180_v45  ;;  %v206_v54 = vpop.permute.xlu1 %205  ;;  %v204_v61 = vpop.permute.xlu0 %203  ;;  %v2670_v53 = vrot.slane %v123_v10, %v2452_v28  ;;  %v2675_v43 = vrot.slane %v76_v9, %v2461_v31  ;;  %v2698_v10 = vmul.f32 %v2442_v26, %v2390_v6 }
  0x87   :  { %4518 = vst [vmem:[#allocation33_spill] sm:$0xff] %v2658_v60  ;;  %v1861_v25 = vpack.c.bf16 %v199_v35, %v166_v48  ;;  %v1911_v42 = vpack.c.bf16 %v202_v59, %v169_v46  ;;  %v2684_v48 = vrot.slane %v2607_v57, %v2461_v31  ;;  %v2688_v46 = vrot.slane %v2496_v44, %v2452_v28 }
  0x88   :  { %4519 = vst [vmem:[#allocation34_spill] sm:$0xff] %v2670_v53  ;;  %v1913_v4 = vpack.c.bf16 %v201_v30, %v168_v23  ;;  %4520 = vst [vmem:[#allocation35_spill] sm:$0xff] %v2675_v43  ;;  %671 = vrot.lane.b32.xlu1 %v2279_v3, %s2202_s12  ;;  %665 = vrot.lane.b32.xlu0 %v2261_v1, %s2202_s12  ;;  %v214_v9 = vsel %vm211_vm2, %v204_v61, %v206_v54 }
  0x89   :  { %4521 = vst [vmem:[#allocation36_spill] sm:$0xff] %v2684_v48  ;;  %4522 = vst [vmem:[#allocation37_spill] sm:$0xff] %v2688_v46  ;;  %1862 = vmatpush1.bf16.msra.mxu0 %v1861_v25  ;;  %1912 = vmatprep.subr.bf16.mxu1 %v1911_v42  ;;  %v75_v3 = vmul.f32 %v2622_v63, %v2474_v37  ;;  %v126_v1 = vmul.f32 %v2410_v14, %v2468_v33 }
  0x8a   :  { %1914 = vmatpush1.bf16.msra.mxu1 %v1913_v4  ;;  %v239_v30 = vpop.permute.xlu1 %238  ;;  %v237_v35 = vpop.permute.xlu0 %236  ;;  %v77_v59 = vmul.f32 %v2654_v52, %v2522_v50  ;;  %v78_v25 = vmul.f32 %v2663_v24, %v2477_v38  ;;  %v124_v23 = vmul.f32 %v2445_v27, %v2426_v18  ;;  %v2710_v45 = vmul.f32 %v2465_v32, %v2395_v7 }
  0x8b   :  { %v247_v42 = vsel %vm244_vm3, %v237_v35, %v239_v30  ;;  %v2714_v4 = vmul.f32 %v2525_v51, %v2416_v16  ;;  %v2718_v36 = vmul.f32 %v2468_v33, %v2385_v5  ;;  %v233_v47 = vmul.f32 %v2675_v43, %v214_v9 }
  0x8c   :  { %v2722_v2 = vmul.f32 %v2670_v53, %v214_v9  ;;  %v266_v62 = vmul.f32 %v2684_v48, %v247_v42  ;;  %v2726_v55 = vmul.f32 %v2688_v46, %v247_v42  ;;  %v2733_v29 = vrot.slane %v75_v3, %v2461_v31 }
  0x8d   :  { %v2736_v11 = vrot.slane %v126_v1, %v2452_v28  ;;  %v125_v43 = vmul.f32 %v2483_v40, %v2525_v51  ;;  %v2741_v48 = vrot.slane %v77_v59, %v2461_v31  ;;  %v2744_v42 = vrot.slane %v78_v25, %v2461_v31 }
  0x8e   :  { %4523 = vst [vmem:[#allocation38_spill] sm:$0xff] %v2722_v2  ;;  %4524 = vst [vmem:[#allocation39_spill] sm:$0xff] %v2726_v55  ;;  %v210_v9 = vpop.permute.xlu1 %209  ;;  %v208_v53 = vpop.permute.xlu0 %207  ;;  %v1863_v46 = vpack.c.bf16 %v266_v62, %v233_v47  ;;  %v2756_v59 = vrot.slane %v124_v23, %v2452_v28  ;;  %v2760_v62 = vrot.slane %v2710_v45, %v2461_v31 }
  0x8f   :  { %4525 = vst [vmem:[#allocation40_spill] sm:$0xff] %v2733_v29  ;;  %4526 = vst [vmem:[#allocation41_spill] sm:$0xff] %v2736_v11  ;;  %v215_v1 = vsel %vm211_vm2, %v210_v9, %v204_v61  ;;  %v212_v60 = vsel %vm211_vm2, %v208_v53, %v210_v9  ;;  %v213_v0 = vsel %vm211_vm2, %v206_v54, %v208_v53 }
  0x90   :  { %4527 = vst [vmem:[#allocation42_spill] sm:$0xff] %v2741_v48  ;;  %4528 = vst [vmem:[#allocation43_spill] sm:$0xff] %v2744_v42  ;;  %1864 = vmatprep.subr.bf16.mxu0 %v1863_v46  ;;  %v2764_v47 = vrot.slane %v2487_v41, %v2452_v28  ;;  %v2768_v61 = vrot.slane %v2714_v4, %v2461_v31  ;;  %v2772_v25 = vrot.slane %v2718_v36, %v2461_v31 }
  0x91   :  { %4529 = vst [vmem:[#allocation44_spill] sm:$0xff] %v2756_v59  ;;  %4530 = vst [vmem:[#allocation45_spill] sm:$0xff] %v2760_v62  ;;  %v2775_v54 = vrot.slane %v125_v43, %v2452_v28  ;;  %v2779_v53 = vrot.slane %v2698_v10, %v2452_v28  ;;  %v2783_v46 = vrot.slane %v2730_v56, %v2452_v28 }
  0x92   :  { %4531 = vst [vmem:[#allocation46_spill] sm:$0xff] %v2764_v47  ;;  %4532 = vst [vmem:[#allocation47_spill] sm:$0xff] %v2768_v61  ;;  %v84_v23 = vmul.f32 %v2519_v49, %v2390_v6  ;;  %v232_v9 = vmul.f32 %v2733_v29, %v215_v1  ;;  %v2789_v3 = vmul.f32 %v2736_v11, %v215_v1  ;;  %v243_v55 = vpop.permute.xlu1 %242  ;;  %v241_v8 = vpop.permute.xlu0 %240 }
  0x93   :  { %4533 = vst [vmem:[#allocation48_spill] sm:$0xff] %v2772_v25  ;;  %4534 = vst [vmem:[#allocation49_spill] sm:$0xff] %v2775_v54  ;;  %v234_v2 = vmul.f32 %v2741_v48, %v213_v0  ;;  %v235_v43 = vmul.f32 %v2744_v42, %v212_v60  ;;  %v2794_v15 = vmul.f32 %v2756_v59, %v213_v0  ;;  %v879_v0 = vld [vmem:[%s4342_s1 + $0x8] sm:$0xff] }
  0x94   :  { %4535 = vst [vmem:[#allocation50_spill] sm:$0xff] %v2779_v53  ;;  %4536 = vst [vmem:[#allocation51_spill] sm:$0xff] %v2783_v46  ;;  %v248_v58 = vsel %vm244_vm3, %v243_v55, %v237_v35  ;;  %v245_v22 = vsel %vm244_vm3, %v241_v8, %v243_v55  ;;  %v246_v29 = vsel %vm244_vm3, %v239_v30, %v241_v8  ;;  %1785 = vmatprep.mubr.msk.f32.mxu0 %vm886_vm5, %v879_v0 }
  0x95   :  { %4537 = vst [vmem:[#allocation52_spill] sm:$0xff] %v2789_v3  ;;  %v265_v1 = vmul.f32 %v2760_v62, %v248_v58  ;;  %v2804_v11 = vmul.f32 %v2764_v47, %v248_v58  ;;  %v267_v48 = vmul.f32 %v2768_v61, %v246_v29  ;;  %v268_v42 = vmul.f32 %v2772_v25, %v245_v22 }
  0x96   :  { %v2812_v35 = vmul.f32 %v2775_v54, %v212_v60  ;;  %v2815_v55 = vmul.f32 %v2779_v53, %v246_v29  ;;  %v2818_v8 = vmul.f32 %v2783_v46, %v245_v22  ;;  %v272_v58 = vpop.permute.xlu1 %271  ;;  %v270_v30 = vpop.permute.xlu0 %269  ;;  %v2825_v60 = vrot.slane %v2390_v6, %v2461_v31  ;;  %1786 = vmatprep.mubr.msk.f32.mxu1 %vm886_vm5, %v879_v0 }
  0x97   :  { %v1865_v47 = vpack.c.bf16 %v265_v1, %v232_v9  ;;  %v1915_v59 = vpack.c.bf16 %v268_v42, %v235_v43  ;;  %v1917_v61 = vpack.c.bf16 %v267_v48, %v234_v2  ;;  %v880_v2 = vld [vmem:[%s4343_s2] sm:$0xff]  ;;  %v2837_v48 = vrot.slane %v2395_v7, %v2452_v28 }
  0x98   :  { %4538 = vst [vmem:[#allocation53_spill] sm:$0xff] %v2812_v35  ;;  %4539 = vst [vmem:[#allocation54_spill] sm:$0xff] %v2818_v8  ;;  %v2841_v42 = vrot.slane %v84_v23, %v2461_v31  ;;  %v2845_v9 = vrot.slane %v2710_v45, %v2452_v28  ;;  %v280_v43 = vsel %vm277_vm4, %v270_v30, %v272_v58  ;;  %v2203_v1 = vmov 0  }
  0x99   :  { %4540 = vst [vmem:[#allocation55_spill] sm:$0xff] %v2825_v60  ;;  %4541 = vst [vmem:[#allocation56_spill] sm:$0xff] %v2837_v48  ;;  %1866 = vmatpush1.bf16.msra.mxu0 %v1865_v47  ;;  %1916 = vmatprep.subr.bf16.mxu1 %v1915_v59  ;;  %v83_v47 = vmul.f32 %v2622_v63, %v2395_v7  ;;  %v85_v45 = vmul.f32 %v2654_v52, %v2416_v16 }
  0x9a   :  { %4542 = vst [vmem:[#allocation57_spill] sm:$0xff] %v2841_v42  ;;  %4543 = vst [vmem:[#allocation58_spill] sm:$0xff] %v2845_v9  ;;  %1918 = vmatpush1.bf16.msra.mxu1 %v1917_v61  ;;  %2150 = vset.pattern.permute.xlu0 %v2203_v1  ;;  %v305_v0 = vpop.permute.xlu1 %304  ;;  %v303_v22 = vpop.permute.xlu0 %302  ;;  %v86_v23 = vmul.f32 %v2663_v24, %v2385_v5  ;;  %v299_v61 = vmul.f32 %v2825_v60, %v280_v43 }
  0x9b   :  { %883 = vperm.xlu0 %2150, %v880_v2   ;;  %2151 = vset.pattern.permute.xlu1 %v2203_v1  ;;  %v313_v59 = vsel %vm310_vm6, %v303_v22, %v305_v0  ;;  %v2859_v25 = vmul.f32 %v2837_v48, %v280_v43  ;;  %v2867_v29 = vrot.slane %v2395_v7, %v2461_v31 }
  0x9c   :  { %v332_v2 = vmul.f32 %v2841_v42, %v313_v59  ;;  %v2863_v1 = vmul.f32 %v2845_v9, %v313_v59  ;;  %v2871_v46 = vrot.slane %v2385_v5, %v2452_v28  ;;  %v2875_v54 = vrot.slane %v2416_v16, %v2461_v31 }
  0x9d   :  { %4544 = vst [vmem:[#allocation59_spill] sm:$0xff] %v2859_v25  ;;  %4545 = vst [vmem:[#allocation60_spill] sm:$0xff] %v2867_v29  ;;  %v2879_v48 = vrot.slane %v2385_v5, %v2461_v31  ;;  %v2883_v59 = vrot.slane %v2390_v6, %v2452_v28  ;;  %v2893_v35 = vrot.slane %v2416_v16, %v2452_v28 }
  0x9e   :  { %4546 = vst [vmem:[#allocation61_spill] sm:$0xff] %v2871_v46  ;;  %4547 = vst [vmem:[#allocation62_spill] sm:$0xff] %v2875_v54  ;;  %v276_v53 = vpop.permute.xlu1 %275  ;;  %v274_v43 = vpop.permute.xlu0 %273  ;;  %v1867_v9 = vpack.c.bf16 %v332_v2, %v299_v61  ;;  %v2896_v8 = vrot.slane %v83_v47, %v2461_v31  ;;  %v2902_v61 = vrot.slane %v2718_v36, %v2452_v28 }
  0x9f   :  { %4548 = vst [vmem:[#allocation63_spill] sm:$0xff] %v2879_v48  ;;  %4549 = vst [vmem:[#allocation64_spill] sm:$0xff] %v2883_v59  ;;  %v281_v62 = vsel %vm277_vm4, %v276_v53, %v270_v30  ;;  %v279_v42 = vsel %vm277_vm4, %v272_v58, %v274_v43  ;;  %v278_v3 = vsel %vm277_vm4, %v274_v43, %v276_v53 }
  0xa0   :  { %4550 = vst [vmem:[#allocation65_spill] sm:$0xff] %v2893_v35  ;;  %4551 = vst [vmem:[#allocation66_spill] sm:$0xff] %v2896_v8  ;;  %1868 = vmatprep.subr.bf16.mxu0 %v1867_v9  ;;  %v2905_v30 = vrot.slane %v85_v45, %v2461_v31  ;;  %v2908_v58 = vrot.slane %v86_v23, %v2461_v31  ;;  %v2912_v2 = vrot.slane %v2607_v57, %v2452_v28 }
  0xa1   :  { %4552 = vst [vmem:[#allocation67_spill] sm:$0xff] %v2902_v61  ;;  %v2916_v47 = vrot.slane %v2714_v4, %v2452_v28  ;;  %v100_v53 = vmul.f32 %v2698_v10, %v2426_v18  ;;  %v127_v36 = vmul.f32 %v2429_v19, %v2474_v37  ;;  %v298_v9 = vmul.f32 %v2867_v29, %v281_v62 }
  0xa2   :  { %4553 = vst [vmem:[#allocation68_spill] sm:$0xff] %v2905_v30  ;;  %4554 = vst [vmem:[#allocation69_spill] sm:$0xff] %v2908_v58  ;;  %v2924_v45 = vmul.f32 %v2871_v46, %v281_v62  ;;  %v300_v23 = vmul.f32 %v2875_v54, %v279_v42  ;;  %v309_v43 = vpop.permute.xlu1 %308  ;;  %v307_v57 = vpop.permute.xlu0 %306  ;;  %v301_v4 = vmul.f32 %v2879_v48, %v278_v3 }
  0xa3   :  { %4555 = vst [vmem:[#allocation70_spill] sm:$0xff] %v2912_v2  ;;  %4556 = vst [vmem:[#allocation71_spill] sm:$0xff] %v2916_v47  ;;  %v314_v60 = vsel %vm310_vm6, %v309_v43, %v303_v22  ;;  %v311_v18 = vsel %vm310_vm6, %v307_v57, %v309_v43  ;;  %v312_v19 = vsel %vm310_vm6, %v305_v0, %v307_v57 }
  0xa4   :  { %v331_v62 = vmul.f32 %v2896_v8, %v314_v60  ;;  %v2937_v46 = vmul.f32 %v2902_v61, %v314_v60  ;;  %v333_v54 = vmul.f32 %v2905_v30, %v312_v19  ;;  %v334_v29 = vmul.f32 %v2908_v58, %v311_v18 }
  0xa5   :  { %v2942_v48 = vmul.f32 %v2883_v59, %v279_v42  ;;  %v2945_v22 = vmul.f32 %v2893_v35, %v278_v3  ;;  %v2948_v43 = vmul.f32 %v2912_v2, %v312_v19  ;;  %v2951_v0 = vmul.f32 %v2916_v47, %v311_v18 }
  0xa6   :  { %v338_v57 = vpop.permute.xlu1 %337  ;;  %v336_v8 = vpop.permute.xlu0 %335  ;;  %v1869_v60 = vpack.c.bf16 %v331_v62, %v298_v9  ;;  %v1919_v61 = vpack.c.bf16 %v334_v29, %v301_v4  ;;  %v1921_v25 = vpack.c.bf16 %v333_v54, %v300_v23  ;;  %v2956_v42 = vrot.slane %v100_v53, %v2461_v31 }
  0xa7   :  { %v2963_v18 = vrot.slane %v127_v36, %v2452_v28  ;;  %v2968_v54 = vrot.slane %v2698_v10, %v2461_v31  ;;  %v2972_v29 = vrot.slane %v2474_v37, %v2452_v28  ;;  %v346_v53 = vsel %vm343_vm7, %v336_v8, %v338_v57 }
  0xa8   :  { %4557 = vst [vmem:[#allocation72_spill] sm:$0xff] %v2956_v42  ;;  %1870 = vmatpush1.bf16.msra.mxu0 %v1869_v60  ;;  %1920 = vmatprep.subr.bf16.mxu1 %v1919_v61  ;;  %v99_v36 = vmul.f32 %v2496_v44, %v2465_v32  ;;  %v130_v61 = vmul.f32 %v2407_v13, %v2477_v38  ;;  %v3057_v2 = vsub.s32 2, %v2404_v12 }
  0xa9   :  { %4558 = vst [vmem:[#allocation73_spill] sm:$0xff] %v2963_v18  ;;  %4559 = vst [vmem:[#allocation74_spill] sm:$0xff] %v2968_v54  ;;  %1922 = vmatpush1.bf16.msra.mxu1 %v1921_v25  ;;  %v101_v9 = vmul.f32 %v2730_v56, %v2525_v51  ;;  %v102_v62 = vmul.f32 %v2487_v41, %v2468_v33  ;;  %v128_v60 = vmul.f32 %v2442_v26, %v2423_v17 }
  0xaa   :  { %4560 = vst [vmem:[#allocation75_spill] sm:$0xff] %v2972_v29  ;;  %v371_v23 = vpop.permute.xlu1 %370  ;;  %v369_v4 = vpop.permute.xlu0 %368  ;;  %v129_v32 = vmul.f32 %v2480_v39, %v2522_v50  ;;  %v365_v19 = vmul.f32 %v2956_v42, %v346_v53  ;;  %v2992_v13 = vmul.f32 %v2963_v18, %v346_v53  ;;  %v2999_v33 = vrot.slane %v99_v36, %v2461_v31 }
  0xab   :  { %v379_v25 = vsel %vm376_vm8, %v369_v4, %v371_v23  ;;  %v3002_v26 = vrot.slane %v130_v61, %v2452_v28  ;;  %v3005_v3 = vrot.slane %v101_v9, %v2461_v31  ;;  %v3008_v35 = vrot.slane %v102_v62, %v2461_v31 }
  0xac   :  { %4561 = vst [vmem:[#allocation76_spill] sm:$0xff] %v2992_v13  ;;  %v398_v51 = vmul.f32 %v2968_v54, %v379_v25  ;;  %v2996_v58 = vmul.f32 %v2972_v29, %v379_v25  ;;  %4562 = vst [vmem:[#allocation77_spill] sm:$0xff] %v2999_v33  ;;  %v3011_v53 = vrot.slane %v128_v60, %v2452_v28 }
  0xad   :  { %4563 = vst [vmem:[#allocation78_spill] sm:$0xff] %v3002_v26  ;;  %4564 = vst [vmem:[#allocation79_spill] sm:$0xff] %v3005_v3  ;;  %v3020_v9 = vrot.slane %v129_v32, %v2452_v28  ;;  %v3024_v62 = vrot.slane %v2496_v44, %v2461_v31  ;;  %v3042_v32 = vrot.slane %v2423_v17, %v2452_v28 }
  0xae   :  { %v342_v39 = vpop.permute.xlu1 %341  ;;  %v340_v47 = vpop.permute.xlu0 %339  ;;  %4565 = vst [vmem:[#allocation80_spill] sm:$0xff] %v3008_v35  ;;  %4566 = vst [vmem:[#allocation81_spill] sm:$0xff] %v3011_v53  ;;  %v1871_v18 = vpack.c.bf16 %v398_v51, %v365_v19  ;;  %v3030_v19 = vrot.slane %v2477_v38, %v2452_v28 }
  0xaf   :  { %v347_v36 = vsel %vm343_vm7, %v342_v39, %v336_v8  ;;  %v345_v61 = vsel %vm343_vm7, %v338_v57, %v340_v47  ;;  %4567 = vst [vmem:[#allocation82_spill] sm:$0xff] %v3020_v9  ;;  %4568 = vst [vmem:[#allocation83_spill] sm:$0xff] %v3024_v62  ;;  %v344_v60 = vsel %vm343_vm7, %v340_v47, %v342_v39 }
  0xb0   :  { %1872 = vmatprep.subr.bf16.mxu0 %v1871_v18  ;;  %4569 = vst [vmem:[#allocation84_spill] sm:$0xff] %v3030_v19  ;;  %v3034_v8 = vrot.slane %v2730_v56, %v2461_v31  ;;  %v3038_v57 = vrot.slane %v2487_v41, %v2461_v31  ;;  %4571 = vst [vmem:[#allocation86_spill] sm:$0xff] %v3042_v32  ;;  %v3046_v47 = vrot.slane %v2522_v50, %v2452_v28 }
  0xb1   :  { %v104_v18 = vmul.f32 %v2698_v10, %v2519_v49  ;;  %v364_v51 = vmul.f32 %v2999_v33, %v347_v36  ;;  %v3053_v39 = vmul.f32 %v3002_v26, %v347_v36  ;;  %v366_v25 = vmul.f32 %v3005_v3, %v345_v61 }
  0xb2   :  { %4570 = vst [vmem:[#allocation85_spill] sm:$0xff] %v3034_v8  ;;  %4572 = vst [vmem:[#allocation87_spill] sm:$0xff] %v3046_v47  ;;  %v375_v29 = vpop.permute.xlu1 %374  ;;  %v373_v59 = vpop.permute.xlu0 %372  ;;  %v367_v42 = vmul.f32 %v3008_v35, %v344_v60  ;;  %v3073_v35 = vmul.f32 %v3011_v53, %v345_v61 }
  0xb3   :  { %v380_v54 = vsel %vm376_vm8, %v375_v29, %v369_v4  ;;  %v377_v49 = vsel %vm376_vm8, %v373_v59, %v375_v29  ;;  %v378_v33 = vsel %vm376_vm8, %v371_v23, %v373_v59  ;;  %v3076_v4 = vmul.f32 %v3020_v9, %v344_v60 }
  0xb4   :  { %v397_v36 = vmul.f32 %v3024_v62, %v380_v54  ;;  %v3068_v26 = vmul.f32 %v3030_v19, %v380_v54  ;;  %v399_v3 = vmul.f32 %v3034_v8, %v378_v33  ;;  %v400_v30 = vmul.f32 %v3038_v57, %v377_v49 }
  0xb5   :  { %v3079_v29 = vmul.f32 %v3042_v32, %v378_v33  ;;  %v3082_v59 = vmul.f32 %v3046_v47, %v377_v49  ;;  %v3091_v33 = vrot.slane %v104_v18, %v2461_v31  ;;  %v106_v49 = vmul.f32 %v2487_v41, %v2663_v24 }
  0xb6   :  { %v404_v23 = vpop.permute.xlu1 %403  ;;  %v402_v62 = vpop.permute.xlu0 %401  ;;  %v1873_v54 = vpack.c.bf16 %v397_v36, %v364_v51  ;;  %v1923_v19 = vpack.c.bf16 %v400_v30, %v367_v42  ;;  %v1925_v13 = vpack.c.bf16 %v399_v3, %v366_v25  ;;  %v3096_v30 = vrot.slane %v2423_v17, %v3057_v2 }
  0xb7   :  { %4573 = vst [vmem:[#allocation88_spill] sm:$0xff] %v3091_v33  ;;  %v3100_v42 = vsel %vm409_vm9, %v402_v62, %v404_v23  ;;  %v103_v51 = vmul.f32 %v2496_v44, %v2622_v63  ;;  %v3124_v24 = vrot.slane %v106_v49, %v2461_v31 }
  0xb8   :  { %1874 = vmatpush1.bf16.msra.mxu0 %v1873_v54  ;;  %1924 = vmatprep.subr.bf16.mxu1 %v1923_v19  ;;  %4574 = vst [vmem:[#allocation89_spill] sm:$0xff] %v3096_v30  ;;  %v105_v19 = vmul.f32 %v2730_v56, %v2654_v52  ;;  %v431_v36 = vmul.f32 %v3091_v33, %v3100_v42 }
  0xb9   :  { %1926 = vmatpush1.bf16.msra.mxu1 %v1925_v13  ;;  %v3114_v60 = vrot.slane %v103_v51, %v2461_v31  ;;  %v3132_v51 = vrot.slane %v2474_v37, %v3057_v2 }
  0xba   :  { %v437_v3 = vpop.permute.xlu1 %436  ;;  %v435_v25 = vpop.permute.xlu0 %434  ;;  %v3121_v52 = vrot.slane %v105_v19, %v2461_v31 }
  0xbb   :  { %v445_v18 = vsel %vm442_vm10, %v435_v25, %v437_v3  ;;  %4575 = vst [vmem:[#allocation90_spill] sm:$0xff] %v3114_v60  ;;  %4577 = vst [vmem:[#allocation92_spill] sm:$0xff] %v3132_v51 }
  0xbc   :  { %v464_v54 = vmul.f32 %v3096_v30, %v445_v18  ;;  %4576 = vst [vmem:[#allocation91_spill] sm:$0xff] %v3121_v52  ;;  %v3136_v18 = vrot.slane %v2522_v50, %v3057_v2 }
  0xbe   :  { %v408_v13 = vpop.permute.xlu1 %407  ;;  %v406_v8 = vpop.permute.xlu0 %405  ;;  %v1875_v63 = vpack.c.bf16 %v464_v54, %v431_v36  ;;  %4578 = vst [vmem:[#allocation93_spill] sm:$0xff] %v3136_v18 }
  0xbf   :  { %v3118_v61 = vsel %vm409_vm9, %v408_v13, %v402_v62  ;;  %v3128_v9 = vsel %vm409_vm9, %v404_v23, %v406_v8  ;;  %v3140_v62 = vrot.slane %v2477_v38, %v3057_v2  ;;  %v3144_v19 = vsel %vm409_vm9, %v406_v8, %v408_v13 }
  0xc0   :  { %1876 = vmatprep.subr.bf16.mxu0 %v1875_v63  ;;  %v430_v23 = vmul.f32 %v3114_v60, %v3118_v61  ;;  %v432_v54 = vmul.f32 %v3121_v52, %v3128_v9  ;;  %v433_v8 = vmul.f32 %v3124_v24, %v3144_v19 }
  0xc1   :  { %4579 = vst [vmem:[#allocation94_spill] sm:$0xff] %v3140_v62 }
  0xc2   :  { %v441_v49 = vpop.permute.xlu1 %440  ;;  %v439_v36 = vpop.permute.xlu0 %438 }
  0xc3   :  { %v446_v63 = vsel %vm442_vm10, %v441_v49, %v435_v25  ;;  %v443_v31 = vsel %vm442_vm10, %v439_v36, %v441_v49  ;;  %v444_v47 = vsel %vm442_vm10, %v437_v3, %v439_v36  ;;  %v3164_v49 = vrot.slane %v2390_v6, %v3057_v2 }
  0xc4   :  { %v463_v13 = vmul.f32 %v3132_v51, %v446_v63  ;;  %v465_v53 = vmul.f32 %v3136_v18, %v444_v47  ;;  %v466_v32 = vmul.f32 %v3140_v62, %v443_v31  ;;  %v3169_v47 = vrot.slane %v2698_v10, %v3057_v2 }
  0xc5   :  { %4580 = vst [vmem:[#allocation95_spill] sm:$0xff] %v3164_v49 }
  0xc6   :  { %v470_v60 = vpop.permute.xlu1 %469  ;;  %v468_v52 = vpop.permute.xlu0 %467  ;;  %v1877_v25 = vpack.c.bf16 %v463_v13, %v430_v23  ;;  %v1927_v30 = vpack.c.bf16 %v466_v32, %v433_v8  ;;  %v1929_v33 = vpack.c.bf16 %v465_v53, %v432_v54  ;;  %4581 = vst [vmem:[#allocation96_spill] sm:$0xff] %v3169_v47  ;;  %v3179_v54 = vrot.slane %v2395_v7, %v3057_v2 }
  0xc7   :  { %v478_v31 = vsel %vm475_vm11, %v468_v52, %v470_v60  ;;  %v548_v8 = vsub.s32 4, %v2404_v12  ;;  %v3186_v13 = vrot.slane %v2416_v16, %v3057_v2 }
  0xc8   :  { %1878 = vmatpush1.bf16.msra.mxu0 %v1877_v25  ;;  %1928 = vmatprep.subr.bf16.mxu1 %v1927_v30  ;;  %v497_v32 = vmul.f32 %v3164_v49, %v478_v31  ;;  %4582 = vst [vmem:[#allocation97_spill] sm:$0xff] %v3179_v54  ;;  %v3190_v25 = vrot.slane %v2385_v5, %v3057_v2 }
  0xc9   :  { %1930 = vmatpush1.bf16.msra.mxu1 %v1929_v33  ;;  %4583 = vst [vmem:[#allocation98_spill] sm:$0xff] %v3186_v13 }
  0xca   :  { %v503_v3 = vpop.permute.xlu1 %502  ;;  %v501_v23 = vpop.permute.xlu0 %500 }
  0xcb   :  { %v511_v53 = vsel %vm508_vm12, %v501_v23, %v503_v3 }
  0xcc   :  { %v530_v36 = vmul.f32 %v3169_v47, %v511_v53  ;;  %v3196_v53 = vrot.slane %v2496_v44, %v3057_v2  ;;  %v3211_v44 = vrot.slane %v2390_v6, %v548_v8 }
  0xce   :  { %v474_v30 = vpop.permute.xlu1 %473  ;;  %v472_v10 = vpop.permute.xlu0 %471  ;;  %v1879_v63 = vpack.c.bf16 %v530_v36, %v497_v32  ;;  %v3200_v32 = vrot.slane %v2730_v56, %v3057_v2 }
  0xcf   :  { %v479_v33 = vsel %vm475_vm11, %v474_v30, %v468_v52  ;;  %v477_v31 = vsel %vm475_vm11, %v470_v60, %v472_v10  ;;  %v3204_v52 = vrot.slane %v2487_v41, %v3057_v2  ;;  %v476_v36 = vsel %vm475_vm11, %v472_v10, %v474_v30 }
  0xd0   :  { %1880 = vmatprep.subr.bf16.mxu0 %v1879_v63  ;;  %v496_v47 = vmul.f32 %v3179_v54, %v479_v33  ;;  %v498_v63 = vmul.f32 %v3186_v13, %v477_v31  ;;  %v499_v30 = vmul.f32 %v3190_v25, %v476_v36  ;;  %v3231_v36 = vrot.slane %v2416_v16, %v548_v8 }
  0xd2   :  { %v507_v49 = vpop.permute.xlu1 %506  ;;  %v505_v60 = vpop.permute.xlu0 %504 }
  0xd3   :  { %v512_v56 = vsel %vm508_vm12, %v507_v49, %v501_v23  ;;  %v509_v41 = vsel %vm508_vm12, %v505_v60, %v507_v49  ;;  %v510_v2 = vsel %vm508_vm12, %v503_v3, %v505_v60  ;;  %v3227_v49 = vrot.slane %v2395_v7, %v548_v8 }
  0xd4   :  { %v529_v10 = vmul.f32 %v3196_v53, %v512_v56  ;;  %v531_v33 = vmul.f32 %v3200_v32, %v510_v2  ;;  %v532_v54 = vmul.f32 %v3204_v52, %v509_v41  ;;  %v3234_v60 = vrot.slane %v2385_v5, %v548_v8 }
  0xd5   :  { %v581_v8 = vsub.s32 5, %v2404_v12 }
  0xd6   :  { %v536_v62 = vpop.permute.xlu1 %535  ;;  %v534_v51 = vpop.permute.xlu0 %533  ;;  %v1881_v31 = vpack.c.bf16 %v529_v10, %v496_v47  ;;  %v1931_v13 = vpack.c.bf16 %v532_v54, %v499_v30  ;;  %v1933_v18 = vpack.c.bf16 %v531_v33, %v498_v63  ;;  %v2156_v63 = vld [vmem:[%s4341_s0 + $0x8] sm:$0xff]  ;;  %v3250_v33 = vsub.s32 3, %v2404_v12 }
  0xd7   :  { %v544_v23 = vsel %vm541_vm13, %v534_v51, %v536_v62 }
  0xd8   :  { %v563_v3 = vmul.f32 %v3211_v44, %v544_v23  ;;  %1882 = vmatpush1.bf16.msra.mxu0 %v1881_v31  ;;  %1932 = vmatprep.subr.bf16.mxu1 %v1931_v13 }
  0xd9   :  { %1934 = vmatpush1.bf16.msra.mxu1 %v1933_v18 }
  0xda   :  { %v540_v47 = vpop.permute.xlu1 %539  ;;  %v538_v54 = vpop.permute.xlu0 %537  ;;  %v1883_v56 = vpack.c.bf16 %v2156_v63, %v563_v3  ;;  %v2158_v3 = vld [vmem:[%s4341_s0 + $0x18] sm:$0xff]  ;;  %v3263_v63 = vrot.slane %v2390_v6, %v581_v8 }
  0xdb   :  { %v545_v41 = vsel %vm541_vm13, %v540_v47, %v534_v51  ;;  %v542_v13 = vsel %vm541_vm13, %v538_v54, %v540_v47  ;;  %v543_v2 = vsel %vm541_vm13, %v536_v62, %v538_v54  ;;  %v2157_v62 = vld [vmem:[%s4341_s0] sm:$0xff]  ;;  %v2159_v54 = vld [vmem:[%s4341_s0 + $0x10] sm:$0xff] }
  0xdc   :  { %v562_v18 = vmul.f32 %v3227_v49, %v545_v41  ;;  %v564_v30 = vmul.f32 %v3231_v36, %v543_v2  ;;  %v565_v10 = vmul.f32 %v3234_v60, %v542_v13  ;;  %1884 = vmatprep.subr.bf16.mxu0 %v1883_v56  ;;  %4584 = vst [vmem:[#allocation99_spill] sm:$0xff] %v3263_v63 }
  0xdd   :  { %v3268_v56 = vrot.slane %v2445_v27, %v3250_v33 }
  0xde   :  { %v571_v31 = vpop.permute.xlu1 %570  ;;  %v569_v51 = vpop.permute.xlu0 %568  ;;  %v1885_v23 = vpack.c.bf16 %v2157_v62, %v562_v18  ;;  %v1935_v47 = vpack.c.bf16 %v2158_v3, %v565_v10  ;;  %v1937_v12 = vpack.c.bf16 %v2159_v54, %v564_v30  ;;  %v3282_v54 = vrot.slane %v2395_v7, %v581_v8 }
  0xdf   :  { %v576_v41 = vsel %vm4445_vm14, %v569_v51, %v571_v31 }
  0xe0   :  { %1886 = vmatpush1.bf16.msra.mxu0 %v1885_v23  ;;  %1936 = vmatprep.subr.bf16.mxu1 %v1935_v47  ;;  %v596_v30 = vmul.f32 %v3263_v63, %v576_v41  ;;  %v3277_v23 = vrot.slane %v2416_v16, %v581_v8  ;;  %4586 = vst [vmem:[#allocation101_spill] sm:$0xff] %v3282_v54 }
  0xe1   :  { %1938 = vmatpush1.bf16.msra.mxu1 %v1937_v12  ;;  %v3285_v12 = vrot.slane %v2385_v5, %v581_v8 }
  0xe2   :  { %v604_v13 = vpop.permute.xlu1 %603  ;;  %v602_v2 = vpop.permute.xlu0 %601  ;;  %4585 = vst [vmem:[#allocation100_spill] sm:$0xff] %v3277_v23 }
  0xe3   :  { %v609_v18 = vsel %vm4448_vm15, %v602_v2, %v604_v13  ;;  %4587 = vst [vmem:[#allocation102_spill] sm:$0xff] %v3285_v12 }
  0xe4   :  { %v629_v10 = vmul.f32 %v3268_v56, %v609_v18  ;;  %v3291_v18 = vrot.slane %v2483_v40, %v3250_v33 }
  0xe6   :  { %v573_v62 = vpop.permute.xlu1 %572  ;;  %v567_v3 = vpop.permute.xlu0 %566  ;;  %v1887_v27 = vpack.c.bf16 %v629_v10, %v596_v30  ;;  %4588 = vst [vmem:[#allocation103_spill] sm:$0xff] %v3291_v18  ;;  %v3295_v30 = vrot.slane %v2432_v20, %v3250_v33 }
  0xe7   :  { %v575_v47 = vsel %vm4445_vm14, %v571_v31, %v573_v62  ;;  %v577_v41 = vsel %vm4445_vm14, %v567_v3, %v569_v51  ;;  %v3299_v31 = vrot.slane %v2410_v14, %v3250_v33  ;;  %v578_v5 = vsel %vm4445_vm14, %v573_v62, %v567_v3 }
  0xe8   :  { %1888 = vmatprep.subr.bf16.mxu0 %v1887_v27  ;;  %4589 = vst [vmem:[#allocation104_spill] sm:$0xff] %v3295_v30  ;;  %v597_v7 = vmul.f32 %v3277_v23, %v575_v47  ;;  %v595_v10 = vmul.f32 %v3282_v54, %v577_v41  ;;  %v598_v14 = vmul.f32 %v3285_v12, %v578_v5  ;;  %vm4451_vm14 = vcmp.lt.s32.totalorder %v2434_v21, 120 }
  0xe9   :  { %4590 = vst [vmem:[#allocation105_spill] sm:$0xff] %v3299_v31  ;;  %v3323_v5 = vrot.slane %v2423_v17, %v3250_v33 }
  0xea   :  { %v606_v8 = vpop.permute.xlu1 %605  ;;  %v600_v51 = vpop.permute.xlu0 %599 }
  0xeb   :  { %v608_v40 = vsel %vm4448_vm15, %v604_v13, %v606_v8  ;;  %v610_v20 = vsel %vm4448_vm15, %v600_v51, %v602_v2  ;;  %v611_v27 = vsel %vm4448_vm15, %v606_v8, %v600_v51  ;;  %v3318_v2 = vrot.slane %v2390_v6, %v3250_v33  ;;  %4592 = vst [vmem:[#allocation107_spill] sm:$0xff] %v3323_v5 }
  0xec   :  { %v630_v63 = vmul.f32 %v3291_v18, %v608_v40  ;;  %v628_v62 = vmul.f32 %v3295_v30, %v610_v20  ;;  %v631_v3 = vmul.f32 %v3299_v31, %v611_v27  ;;  %vm4452_vm15 = vcmp.lt.s32.totalorder %v2434_v21, 119 }
  0xed   :  { %4591 = vst [vmem:[#allocation106_spill] sm:$0xff] %v3318_v2  ;;  %v3333_v40 = vrot.slane %v2416_v16, %v3250_v33 }
  0xee   :  { %v637_v47 = vpop.permute.xlu1 %636  ;;  %v635_v41 = vpop.permute.xlu0 %634  ;;  %v1889_v23 = vpack.c.bf16 %v628_v62, %v595_v10  ;;  %v1939_v13 = vpack.c.bf16 %v631_v3, %v598_v14  ;;  %v1941_v54 = vpack.c.bf16 %v630_v63, %v597_v7  ;;  %v2161_v62 = vld [vmem:[%s4346_s5 + $0x18] sm:$0x3f] }
  0xef   :  { %v642_v8 = vsel %vm4451_vm14, %v635_v41, %v637_v47  ;;  %4593 = vst [vmem:[#allocation108_spill] sm:$0xff] %v3333_v40  ;;  %v3347_v3 = vrot.slane %v2161_v62, %v3250_v33 }
  0xf0   :  { %1890 = vmatpush1.bf16.msra.mxu0 %v1889_v23  ;;  %1940 = vmatprep.subr.bf16.mxu1 %v1939_v13  ;;  %v662_v6 = vmul.f32 %v3318_v2, %v642_v8  ;;  %v3357_v13 = vrot.slane %v2474_v37, %v3250_v33  ;;  %v3361_v8 = vrot.slane %v2477_v38, %v3250_v33 }
  0xf1   :  { %1942 = vmatpush1.bf16.msra.mxu1 %v1941_v54  ;;  %v2160_v54 = vld [vmem:[%s4346_s5] sm:$0x3f]  ;;  %4595 = vst [vmem:[#allocation110_spill] sm:$0xff] %v3347_v3 }
  0xf2   :  { %v670_v51 = vpop.permute.xlu1 %669  ;;  %v668_v10 = vpop.permute.xlu0 %667  ;;  %v3341_v14 = vrot.slane %v2160_v54, %v3250_v33  ;;  %4597 = vst [vmem:[#allocation112_spill] sm:$0xff] %v3357_v13  ;;  %4598 = vst [vmem:[#allocation113_spill] sm:$0xff] %v3361_v8 }
  0xf3   :  { %v675_v63 = vsel %vm4452_vm15, %v668_v10, %v670_v51 }
  0xf4   :  { %v695_v23 = vmul.f32 %v3323_v5, %v675_v63  ;;  %4594 = vst [vmem:[#allocation109_spill] sm:$0xff] %v3341_v14 }
  0xf6   :  { %v639_v7 = vpop.permute.xlu1 %638  ;;  %v633_v17 = vpop.permute.xlu0 %632  ;;  %v1891_v20 = vpack.c.bf16 %v695_v23, %v662_v6 }
  0xf7   :  { %v641_v27 = vsel %vm4451_vm14, %v637_v47, %v639_v7  ;;  %v643_v16 = vsel %vm4451_vm14, %v633_v17, %v635_v41  ;;  %v3353_v47 = vrot.slane %v2522_v50, %v3250_v33  ;;  %v644_v63 = vsel %vm4451_vm14, %v639_v7, %v633_v17 }
  0xf8   :  { %1892 = vmatprep.subr.bf16.mxu0 %v1891_v20  ;;  %v663_v6 = vmul.f32 %v3333_v40, %v641_v27  ;;  %v661_v20 = vmul.f32 %v3341_v14, %v643_v16  ;;  %v664_v38 = vmul.f32 %v3347_v3, %v644_v63  ;;  %v4604_v63 = vld [vmem:[#allocation19_spill] sm:$0xff] }
  0xf9   :  { %4596 = vst [vmem:[#allocation111_spill] sm:$0xff] %v3353_v47 }
  0xfa   :  { %v672_v23 = vpop.permute.xlu1 %671  ;;  %v666_v41 = vpop.permute.xlu0 %665 }
  0xfb   :  { %v674_v50 = vsel %vm4452_vm15, %v670_v51, %v672_v23  ;;  %v676_v37 = vsel %vm4452_vm15, %v666_v41, %v668_v10  ;;  %v677_v54 = vsel %vm4452_vm15, %v672_v23, %v666_v41  ;;  %v4599_v51 = vld [vmem:[#allocation30_spill] sm:$0xff]  ;;  %v4601_v10 = vld [vmem:[#allocation32_spill] sm:$0xff]  ;;  %v4602_v23 = vld [vmem:[#allocation29_spill] sm:$0xff] }
  0xfc   :  { %v696_v33 = vmul.f32 %v3353_v47, %v674_v50  ;;  %v694_v7 = vmul.f32 %v3357_v13, %v676_v37  ;;  %v697_v17 = vmul.f32 %v3361_v8, %v677_v54  ;;  %v4600_v40 = vpack.c.bf16 %v2646_v34, %v4599_v51  ;;  %v4605_v50 = vld [vmem:[#allocation18_spill] sm:$0xff]  ;;  %v4609_v37 = vld [vmem:[#allocation31_spill] sm:$0xff]  ;;  %v4611_v34 = vld [vmem:[#allocation52_spill] sm:$0xff] }
  0xfd   :  { %v4603_v41 = vpack.c.bf16 %v4601_v10, %v4602_v23  ;;  %v4606_v47 = vpack.c.bf16 %v4604_v63, %v4605_v50  ;;  %v4625_v10 = vld [vmem:[#allocation15_spill] sm:$0xff]  ;;  %v4630_v23 = vld [vmem:[#allocation14_spill] sm:$0xff]  ;;  %v4632_v63 = vld [vmem:[#allocation20_spill] sm:$0xff] }
  0xfe   :  { %v1893_v27 = vpack.c.bf16 %v694_v7, %v661_v20  ;;  %v1943_v62 = vpack.c.bf16 %v697_v17, %v664_v38  ;;  %v1945_v16 = vpack.c.bf16 %v696_v33, %v663_v6  ;;  %v4607_v20 = vpack.c.bf16 %v2815_v55, %v2794_v15  ;;  %v4608_v6 = vld [vmem:[#allocation33_spill] sm:$0xff]  ;;  %v4613_v38 = vld [vmem:[#allocation39_spill] sm:$0xff]  ;;  %v4614_v33 = vld [vmem:[#allocation38_spill] sm:$0xff] }
  0xff   :  { %v4610_v54 = vpack.c.bf16 %v4608_v6, %v4609_v37  ;;  %v4615_v7 = vpack.c.bf16 %v4613_v38, %v4614_v33  ;;  %v4616_v17 = vpack.c.bf16 %v2948_v43, %v2942_v48  ;;  %v4620_v55 = vpack.c.bf16 %v2937_v46, %v2924_v45  ;;  %v4645_v8 = vld [vmem:[#allocation12_spill] sm:$0xff] }
 0x100   :  { %1894 = vmatpush1.bf16.msra.mxu0 %v1893_v27  ;;  %1944 = vmatprep.subr.bf16.mxu1 %v1943_v62  ;;  %v4618_v27 = vld [vmem:[#allocation53_spill] sm:$0xff]  ;;  %v4621_v62 = vld [vmem:[#allocation6_spill] sm:$0xff]  ;;  %v3416_v48 = vrot.slane %v4625_v10, %v2452_v28  ;;  %v4627_v43 = vpack.c.bf16 %v3079_v29, %v3073_v35  ;;  %v4628_v46 = vpack.c.bf16 %v2951_v0, %v2945_v22  ;;  %v4634_v35 = vld [vmem:[#allocation76_spill] sm:$0xff] }
 0x101   :  { %1896 = vmatprep.subr.bf16.mxu0 %v4600_v40  ;;  %1946 = vmatpush1.bf16.msra.mxu1 %v1945_v16  ;;  %v4612_v40 = vpack.c.bf16 %v2804_v11, %v4611_v34  ;;  %v3409_v11 = vrot.slane %v4621_v62, %v2452_v28  ;;  %v4623_v16 = vld [vmem:[#allocation59_spill] sm:$0xff]  ;;  %v4629_v45 = vpack.c.bf16 %v3068_v26, %v3053_v39 }
 0x102   :  { %1948 = vmatprep.subr.bf16.mxu1 %v4603_v41  ;;  %v4624_v51 = vpack.c.bf16 %v2863_v1, %v4623_v16  ;;  %4626 = vst [vmem:[#allocation32_spill] sm:$0xff] %v3416_v48  ;;  %v3429_v1 = vrot.slane %v4630_v23, %v2452_v28  ;;  %v3435_v50 = vrot.slane %v4632_v63, %v2452_v28  ;;  %v878_v28 = vld [vmem:[%s4342_s1] sm:$0xff] }
 0x103   :  { %4622 = vst [vmem:[#allocation30_spill] sm:$0xff] %v3409_v11  ;;  %v875_v41 = vmul.f32 %v3409_v11, %v3128_v9  ;;  %v4635_v29 = vpack.c.bf16 %v2996_v58, %v4634_v35  ;;  %v877_v22 = vmul.f32 %v3416_v48, %v3118_v61  ;;  %v4636_v0 = vpack.c.bf16 %v3082_v59, %v3076_v4 }
 0x104   :  { %1898 = vmatpush1.bf16.msra.mxu0 %v4606_v47  ;;  %v4617_v47 = vld [vmem:[#allocation54_spill] sm:$0xff]  ;;  %4631 = vst [vmem:[#allocation29_spill] sm:$0xff] %v3429_v1  ;;  %4633 = vst [vmem:[#allocation19_spill] sm:$0xff] %v3435_v50  ;;  %v874_v26 = vmul.f32 %v3429_v1, %v3100_v42  ;;  %v876_v58 = vmul.f32 %v3435_v50, %v3144_v19  ;;  %v4642_v50 = vld [vmem:[#allocation11_spill] sm:$0xff] }
 0x105   :  { %1900 = vmatprep.subr.bf16.mxu0 %v4607_v20  ;;  %1950 = vmatpush1.bf16.msra.mxu1 %v4610_v54  ;;  %v4619_v15 = vpack.c.bf16 %v4617_v47, %v4618_v27  ;;  %v4644_v1 = vld [vmem:[#allocation10_spill] sm:$0xff] }
 0x106   :  { %1952 = vmatprep.subr.bf16.mxu1 %v4612_v40 }
 0x108   :  { %1902 = vmatpush1.bf16.msra.mxu0 %v4615_v7 }
 0x109   :  { %1904 = vmatprep.subr.bf16.mxu0 %v4616_v17  ;;  %1954 = vmatpush1.bf16.msra.mxu1 %v4619_v15 }
 0x10a   :  { %1956 = vmatprep.subr.bf16.mxu1 %v4620_v55 }
 0x10c   :  { %1906 = vmatpush1.bf16.msra.mxu0 %v4624_v51 }
 0x10d   :  { %1908 = vmatprep.subr.bf16.mxu0 %v4627_v43  ;;  %1958 = vmatpush1.bf16.msra.mxu1 %v4628_v46  ;;  %v1354_v43 = vld [vmem:[%s4345_s4] sm:$0xff] }
 0x10e   :  { %1960 = vmatprep.subr.bf16.mxu1 %v4629_v45 }
 0x110   :  { %1910 = vmatpush1.bf16.msra.mxu0 %v4635_v29 }
 0x111   :  { %942 = vmatprep.subr.mxu0 %v875_v41  ;;  %1962 = vmatpush1.bf16.msra.mxu1 %v4636_v0  ;;  %v1353_v0 = vld [vmem:[%s4344_s3 + $0x8] sm:$0xff] }
 0x112   :  { %1013 = vmatprep.subr.mxu1 %v877_v22 }
 0x114   :  { %943 = vmatpush1.msra.mxu0 %v874_v26 }
 0x115   :  { %955 = vmatmul.mubr.f32.vlgmr.msra.gmra.mrb[0].mxu0 %v878_v28  ;;  %1014 = vmatpush1.msra.mxu1 %v876_v58 }
 0x116   :  { %1026 = vmatmul.mubr.f32.vlgmr.msra.gmra.mrb[0].mxu1 %v878_v28  ;;  %1787 = vmatprep.mubr.msk.f32.mxu0 %vm886_vm5, %v1353_v0 }
 0x117   :  { %1788 = vmatprep.mubr.msk.f32.mxu1 %vm886_vm5, %v1353_v0  ;;  %vm4717_vm5 = vcmp.lt.s32.totalorder %v2434_v21, 120 }
 0x11a   :  { %v884_v9 = vpop.permute.xlu0 %883 }
 0x1e8   :  { %v956_v39 = vpop.f32.mrb[0].mxu0 }
 0x1e9   :  { %v957_v61 = vadd.f32 %v956_v39, %v884_v9  ;;  %v958_v4 = vpop.f32.mrb[1].mxu0  ;;  %v1027_v59 = vpop.f32.mrb[0].mxu1 }
 0x1ea   :  { %v1028_v20 = vadd.f32 %v1027_v59, %v884_v9  ;;  %v1029_v6 = vpop.f32.mrb[1].mxu1  ;;  %v959_v34 = vadd.f32 %v958_v4, %v884_v9 }
 0x1eb   :  { %vm1032_vm14 = vcmp.ge.f32.partialorder %v957_v61, 0.0  ;;  %v1036_v42 = vmul.f32 0.2, %v957_v61  ;;  %v1030_v33 = vadd.f32 %v1029_v6, %v884_v9 }
 0x1ec   :  { %v1038_v54 = vmul.f32 0.2, %v1028_v20  ;;  %vm1034_vm15 = vcmp.ge.f32.partialorder %v1028_v20, 0.0  ;;  %v1037_v40 = vmul.f32 0.2, %v959_v34 }
 0x1ed   :  { %v3452_v37 = vsel %vm1032_vm14, %v957_v61, %v1036_v42  ;;  %vm1033_vm14 = vcmp.ge.f32.partialorder %v959_v34, 0.0  ;;  %v1039_v7 = vmul.f32 0.2, %v1030_v33 }
 0x1ee   :  { %4637 = vst [vmem:[#allocation18_spill] sm:$0xff] %v3452_v37  ;;  %1060 = vrot.lane.b32.xlu0 %v3452_v37, %s2186_s13  ;;  %1044 = vrot.lane.b32.xlu1 %v3452_v37, %s2187_s14  ;;  %v3458_v19 = vsel %vm1034_vm15, %v1028_v20, %v1038_v54  ;;  %v3508_v38 = vsel %vm1033_vm14, %v959_v34, %v1037_v40  ;;  %vm1035_vm15 = vcmp.ge.f32.partialorder %v1030_v33, 0.0 }
 0x1ef   :  { %4638 = vst [vmem:[#allocation33_spill] sm:$0xff] %v3458_v19  ;;  %4639 = vst [vmem:[#allocation31_spill] sm:$0xff] %v3508_v38  ;;  %v3518_v17 = vsel %vm1035_vm15, %v1030_v33, %v1039_v7 }
 0x1f2   :  { %1048 = vrot.lane.b32.xlu0 %v3458_v19, %s2187_s14  ;;  %1064 = vrot.lane.b32.xlu1 %v3458_v19, %s2186_s13 }
 0x1f6   :  { %1076 = vrot.lane.b32.xlu0 %v3452_v37, %s2188_s20  ;;  %1096 = vrot.lane.b32.xlu1 %v3458_v19, %s2189_s21 }
 0x1fa   :  { %1092 = vrot.lane.b32.xlu0 %v3452_v37, %s2189_s21  ;;  %1128 = vrot.lane.b32.xlu1 %v3458_v19, %s2191_s23 }
 0x1fe   :  { %1080 = vrot.lane.b32.xlu0 %v3458_v19, %s2188_s20  ;;  %1160 = vrot.lane.b32.xlu1 %v3458_v19, %s2193_s25 }
 0x202   :  { %1108 = vrot.lane.b32.xlu0 %v3452_v37, %s2190_s22  ;;  %1192 = vrot.lane.b32.xlu1 %v3458_v19, %s2195_s27 }
 0x206   :  { %1124 = vrot.lane.b32.xlu0 %v3452_v37, %s2191_s23  ;;  %1224 = vrot.lane.b32.xlu1 %v3458_v19, %s2197_s29 }
 0x20a   :  { %1112 = vrot.lane.b32.xlu0 %v3458_v19, %s2190_s22  ;;  %1240 = vrot.lane.b32.xlu1 %v3458_v19, %s2198_s30 }
 0x20e   :  { %1140 = vrot.lane.b32.xlu0 %v3452_v37, %s2192_s24  ;;  %1256 = vrot.lane.b32.xlu1 %v3458_v19, %s2199_s17 }
 0x212   :  { %1156 = vrot.lane.b32.xlu0 %v3452_v37, %s2193_s25  ;;  %1272 = vrot.lane.b32.xlu1 %v3458_v19, %s2200_s10 }
 0x216   :  { %1144 = vrot.lane.b32.xlu0 %v3458_v19, %s2192_s24  ;;  %1268 = vrot.lane.b32.xlu1 %v3452_v37, %s2200_s10 }
 0x21a   :  { %1172 = vrot.lane.b32.xlu0 %v3452_v37, %s2194_s26  ;;  %1288 = vrot.lane.b32.xlu1 %v3458_v19, %s2201_s11 }
 0x21e   :  { %1188 = vrot.lane.b32.xlu0 %v3452_v37, %s2195_s27  ;;  %1304 = vrot.lane.b32.xlu1 %v3458_v19, %s2202_s12 }
 0x222   :  { %1176 = vrot.lane.b32.xlu0 %v3458_v19, %s2194_s26  ;;  %1046 = vrot.lane.b32.xlu1 %v3508_v38, %s2187_s14 }
 0x226   :  { %1204 = vrot.lane.b32.xlu0 %v3452_v37, %s2196_s28  ;;  %1062 = vrot.lane.b32.xlu1 %v3508_v38, %s2186_s13 }
 0x22a   :  { %1220 = vrot.lane.b32.xlu0 %v3452_v37, %s2197_s29  ;;  %1066 = vrot.lane.b32.xlu1 %v3518_v17, %s2186_s13 }
 0x22e   :  { %1208 = vrot.lane.b32.xlu0 %v3458_v19, %s2196_s28  ;;  %1078 = vrot.lane.b32.xlu1 %v3508_v38, %s2188_s20 }
 0x232   :  { %1236 = vrot.lane.b32.xlu0 %v3452_v37, %s2198_s30  ;;  %1094 = vrot.lane.b32.xlu1 %v3508_v38, %s2189_s21 }
 0x236   :  { %1252 = vrot.lane.b32.xlu0 %v3452_v37, %s2199_s17  ;;  %1098 = vrot.lane.b32.xlu1 %v3518_v17, %s2189_s21 }
 0x23a   :  { %1284 = vrot.lane.b32.xlu0 %v3452_v37, %s2201_s11  ;;  %1110 = vrot.lane.b32.xlu1 %v3508_v38, %s2190_s22 }
 0x23e   :  { %1050 = vrot.lane.b32.xlu0 %v3518_v17, %s2187_s14  ;;  %1126 = vrot.lane.b32.xlu1 %v3508_v38, %s2191_s23 }
 0x242   :  { %1082 = vrot.lane.b32.xlu0 %v3518_v17, %s2188_s20  ;;  %1130 = vrot.lane.b32.xlu1 %v3518_v17, %s2191_s23 }
 0x246   :  { %1114 = vrot.lane.b32.xlu0 %v3518_v17, %s2190_s22  ;;  %1142 = vrot.lane.b32.xlu1 %v3508_v38, %s2192_s24 }
 0x24a   :  { %1146 = vrot.lane.b32.xlu0 %v3518_v17, %s2192_s24  ;;  %1158 = vrot.lane.b32.xlu1 %v3508_v38, %s2193_s25 }
 0x24e   :  { %1178 = vrot.lane.b32.xlu0 %v3518_v17, %s2194_s26  ;;  %1162 = vrot.lane.b32.xlu1 %v3518_v17, %s2193_s25 }
 0x252   :  { %1210 = vrot.lane.b32.xlu0 %v3518_v17, %s2196_s28  ;;  %1174 = vrot.lane.b32.xlu1 %v3508_v38, %s2194_s26 }
 0x256   :  { %1242 = vrot.lane.b32.xlu0 %v3518_v17, %s2198_s30  ;;  %1190 = vrot.lane.b32.xlu1 %v3508_v38, %s2195_s27 }
 0x25a   :  { %1254 = vrot.lane.b32.xlu0 %v3508_v38, %s2199_s17  ;;  %1194 = vrot.lane.b32.xlu1 %v3518_v17, %s2195_s27 }
 0x25e   :  { %1270 = vrot.lane.b32.xlu0 %v3508_v38, %s2200_s10  ;;  %1206 = vrot.lane.b32.xlu1 %v3508_v38, %s2196_s28 }
 0x260   :  { %v3576_v47 = vpop.permute.xlu0 %1060  ;;  %v3578_v27 = vpop.permute.xlu1 %1044 }
 0x262   :  { %1258 = vrot.lane.b32.xlu0 %v3518_v17, %s2199_s17  ;;  %1222 = vrot.lane.b32.xlu1 %v3508_v38, %s2197_s29 }
 0x264   :  { %v3584_v15 = vpop.permute.xlu0 %1048  ;;  %v1065_v55 = vpop.permute.xlu1 %1064 }
 0x266   :  { %1286 = vrot.lane.b32.xlu0 %v3508_v38, %s2201_s11  ;;  %1226 = vrot.lane.b32.xlu1 %v3518_v17, %s2197_s29 }
 0x268   :  { %v3590_v62 = vpop.permute.xlu0 %1076  ;;  %v3592_v16 = vpop.permute.xlu1 %1096 }
 0x26a   :  { %1302 = vrot.lane.b32.xlu0 %v3508_v38, %s2202_s12  ;;  %1238 = vrot.lane.b32.xlu1 %v3508_v38, %s2198_s30  ;;  %v4657_v38 = vld [vmem:[#allocation25_spill] sm:$0xff] }
 0x26c   :  { %v3598_v51 = vpop.permute.xlu0 %1092  ;;  %v3600_v10 = vpop.permute.xlu1 %1128 }
 0x26e   :  { %1290 = vrot.lane.b32.xlu0 %v3518_v17, %s2201_s11  ;;  %1300 = vrot.lane.b32.xlu1 %v3452_v37, %s2202_s12 }
 0x270   :  { %v3609_v46 = vpop.permute.xlu0 %1080  ;;  %v3611_v45 = vpop.permute.xlu1 %1160 }
 0x272   :  { %1357 = vperm.xlu0 %2150, %v1354_v43   ;;  %1274 = vrot.lane.b32.xlu1 %v3518_v17, %s2200_s10  ;;  %v4641_v43 = vld [vmem:[#allocation9_spill] sm:$0xff] }
 0x274   :  { %v3615_v23 = vpop.permute.xlu0 %1108  ;;  %v3617_v41 = vpop.permute.xlu1 %1192 }
 0x276   :  { %1306 = vrot.lane.b32.xlu1 %v3518_v17, %s2202_s12 }
 0x278   :  { %v3621_v63 = vpop.permute.xlu0 %1124  ;;  %v3623_v35 = vpop.permute.xlu1 %1224 }
 0x27c   :  { %v3625_v29 = vpop.permute.xlu0 %1112  ;;  %v3627_v22 = vpop.permute.xlu1 %1240 }
 0x280   :  { %v3632_v26 = vpop.permute.xlu0 %1140  ;;  %v3634_v28 = vpop.permute.xlu1 %1256 }
 0x284   :  { %v3638_v58 = vpop.permute.xlu0 %1156  ;;  %v3640_v9 = vpop.permute.xlu1 %1272 }
 0x288   :  { %v3642_v39 = vpop.permute.xlu0 %1144  ;;  %v3644_v61 = vpop.permute.xlu1 %1268 }
 0x28c   :  { %v3646_v4 = vpop.permute.xlu0 %1172  ;;  %v3648_v59 = vpop.permute.xlu1 %1288 }
 0x28d   :  { %4640 = vst [vmem:[#allocation52_spill] sm:$0xff] %v3648_v59 }
 0x290   :  { %v3650_v20 = vpop.permute.xlu0 %1188  ;;  %v3652_v6 = vpop.permute.xlu1 %1304 }
 0x294   :  { %v3654_v42 = vpop.permute.xlu0 %1176  ;;  %v1047_v54 = vpop.permute.xlu1 %1046 }
 0x295   :  { %v1054_v34 = vsel %vm145_vm0, %v3578_v27, %v1047_v54 }
 0x296   :  { %v1057_v0 = vmul.f32 %v1054_v34, %v4641_v43  ;;  %v3666_v48 = vmul.f32 %v1054_v34, %v4642_v50 }
 0x298   :  { %v3659_v40 = vpop.permute.xlu0 %1204  ;;  %v1063_v33 = vpop.permute.xlu1 %1062  ;;  %4643 = vst [vmem:[#allocation39_spill] sm:$0xff] %v3666_v48  ;;  %v4654_v48 = vld [vmem:[#allocation28_spill] sm:$0xff] }
 0x299   :  { %v1070_v7 = vsel %vm178_vm1, %v3576_v47, %v1063_v33 }
 0x29a   :  { %v1073_v11 = vmul.f32 %v1070_v7, %v4644_v1  ;;  %v3670_v3 = vmul.f32 %v1070_v7, %v4645_v8  ;;  %v3686_v7 = vsel %vm178_vm1, %v1063_v33, %v1065_v55  ;;  %v3710_v33 = vsel %vm145_vm0, %v1047_v54, %v3584_v15  ;;  %v4660_v54 = vld [vmem:[#allocation35_spill] sm:$0xff] }
 0x29b   :  { %4648 = vst [vmem:[#allocation53_spill] sm:$0xff] %v3686_v7  ;;  %4653 = vst [vmem:[#allocation20_spill] sm:$0xff] %v3710_v33 }
 0x29c   :  { %4646 = vst [vmem:[#allocation38_spill] sm:$0xff] %v3670_v3  ;;  %v3674_v31 = vpop.permute.xlu0 %1220  ;;  %v1067_v18 = vpop.permute.xlu1 %1066  ;;  %v1963_v12 = vpack.c.bf16 %v1073_v11, %v1057_v0  ;;  %v1074_v3 = vmul.f32 %v3686_v7, %v4654_v48 }
 0x29d   :  { %v3695_v11 = vsel %vm178_vm1, %v1065_v55, %v1067_v18  ;;  %v3700_v0 = vsel %vm178_vm1, %v1067_v18, %v3576_v47  ;;  %v4655_v55 = vld [vmem:[#allocation36_spill] sm:$0xff]  ;;  %vm4706_vm1 = vcmp.lt.s32.totalorder %v2434_v21, 127 }
 0x29e   :  { %1964 = vmatprep.subr.bf16.mxu0 %v1963_v12  ;;  %4650 = vst [vmem:[#allocation59_spill] sm:$0xff] %v3695_v11  ;;  %4651 = vst [vmem:[#allocation15_spill] sm:$0xff] %v3700_v0  ;;  %v4656_v18 = vld [vmem:[#allocation24_spill] sm:$0xff]  ;;  %v1075_v19 = vmul.f32 %v3695_v11, %v4657_v38 }
 0x29f   :  { %v1072_v47 = vmul.f32 %v3700_v0, %v4656_v18  ;;  %v4662_v18 = vld [vmem:[#allocation22_spill] sm:$0xff] }
 0x2a0   :  { %v3676_v13 = vpop.permute.xlu0 %1208  ;;  %v1079_v2 = vpop.permute.xlu1 %1078 }
 0x2a1   :  { %v3705_v14 = vsel %vm211_vm2, %v3590_v62, %v1079_v2 }
 0x2a2   :  { %4652 = vst [vmem:[#allocation14_spill] sm:$0xff] %v3705_v14 }
 0x2a4   :  { %v3678_v43 = vpop.permute.xlu0 %1236  ;;  %v1095_v50 = vpop.permute.xlu1 %1094 }
 0x2a5   :  { %v3691_v12 = vsel %vm244_vm3, %v3598_v51, %v1095_v50 }
 0x2a6   :  { %4649 = vst [vmem:[#allocation6_spill] sm:$0xff] %v3691_v12 }
 0x2a8   :  { %v3680_v34 = vpop.permute.xlu0 %1252  ;;  %v1099_v1 = vpop.permute.xlu1 %1098 }
 0x2ac   :  { %v3682_v5 = vpop.permute.xlu0 %1284  ;;  %v1111_v8 = vpop.permute.xlu1 %1110 }
 0x2ad   :  { %4647 = vst [vmem:[#allocation54_spill] sm:$0xff] %v3682_v5  ;;  %v1105_v5 = vmul.f32 %v3691_v12, %v4655_v55  ;;  %v1089_v55 = vmul.f32 %v3705_v14, %v4660_v54  ;;  %v4661_v12 = vld [vmem:[#allocation21_spill] sm:$0xff] }
 0x2b0   :  { %v1051_v59 = vpop.permute.xlu0 %1050  ;;  %v1127_v37 = vpop.permute.xlu1 %1126 }
 0x2b1   :  { %v3723_v30 = vsel %vm145_vm0, %v3584_v15, %v1051_v59  ;;  %v3728_v48 = vsel %vm145_vm0, %v1051_v59, %v3578_v27  ;;  %v3739_v38 = vsel %vm310_vm6, %v3621_v63, %v1127_v37  ;;  %v4664_v15 = vld [vmem:[#allocation27_spill] sm:$0xff]  ;;  %v3746_v27 = vsel %vm244_vm3, %v1095_v50, %v3592_v16 }
 0x2b2   :  { %4658 = vst [vmem:[#allocation76_spill] sm:$0xff] %v3723_v30  ;;  %4659 = vst [vmem:[#allocation9_spill] sm:$0xff] %v3728_v48  ;;  %v1056_v7 = vmul.f32 %v3728_v48, %v4661_v12  ;;  %v1059_v0 = vmul.f32 %v3723_v30, %v4662_v18  ;;  %v1058_v11 = vmul.f32 %v3710_v33, %v4664_v15  ;;  %v4667_v48 = vld [vmem:[#allocation57_spill] sm:$0xff]  ;;  %vm4704_vm0 = vcmp.lt.s32.totalorder %v2434_v21, 121 }
 0x2b3   :  { %4663 = vst [vmem:[#allocation11_spill] sm:$0xff] %v3739_v38  ;;  %v3751_v59 = vsel %vm244_vm3, %v1099_v1, %v3598_v51  ;;  %v3756_v12 = vsel %vm277_vm4, %v3615_v23, %v1111_v8  ;;  %v1967_v15 = vpack.c.bf16 %v1105_v5, %v1089_v55  ;;  %v3761_v50 = vsel %vm244_vm3, %v3592_v16, %v1099_v1  ;;  %v4668_v16 = vld [vmem:[#allocation45_spill] sm:$0xff]  ;;  %vm4708_vm3 = vmmov %vm4704_vm0 }
 0x2b4   :  { %4665 = vst [vmem:[#allocation10_spill] sm:$0xff] %v3756_v12  ;;  %v1965_v54 = vpack.c.bf16 %v1072_v47, %v1056_v7  ;;  %v1083_v18 = vpop.permute.xlu0 %1082  ;;  %v1131_v14 = vpop.permute.xlu1 %1130  ;;  %v2015_v30 = vpack.c.bf16 %v1075_v19, %v1059_v0  ;;  %4666 = vst [vmem:[#allocation12_spill] sm:$0xff] %v3761_v50  ;;  %v1137_v33 = vmul.f32 %v3739_v38, %v4667_v48  ;;  %v4669_v0 = vld [vmem:[#allocation40_spill] sm:$0xff]  ;;  %v4670_v48 = vld [vmem:[#allocation55_spill] sm:$0xff] }
 0x2b5   :  { %v3768_v51 = vsel %vm211_vm2, %v3609_v46, %v1083_v18  ;;  %v3773_v7 = vsel %vm211_vm2, %v1083_v18, %v3590_v62  ;;  %v2017_v19 = vpack.c.bf16 %v1074_v3, %v1058_v11  ;;  %v3778_v5 = vsel %vm211_vm2, %v1079_v2, %v3609_v46  ;;  %v4671_v38 = vld [vmem:[#allocation43_spill] sm:$0xff]  ;;  %v4674_v11 = vld [vmem:[#allocation48_spill] sm:$0xff]  ;;  %vm4707_vm2 = vmmov %vm4706_vm1 }
 0x2b6   :  { %v1104_v1 = vmul.f32 %v3751_v59, %v4668_v16  ;;  %v1088_v47 = vmul.f32 %v3773_v7, %v4669_v0  ;;  %1966 = vmatpush1.bf16.msra.mxu0 %v1965_v54  ;;  %v1121_v55 = vmul.f32 %v3756_v12, %v4670_v48  ;;  %v1091_v62 = vmul.f32 %v3768_v51, %v4671_v38  ;;  %v4673_v2 = vld [vmem:[#allocation47_spill] sm:$0xff] }
 0x2b7   :  { %v3791_v3 = vsel %vm310_vm6, %v1131_v14, %v3621_v63  ;;  %2016 = vmatprep.subr.bf16.mxu1 %v2015_v30  ;;  %1968 = vmatprep.subr.bf16.mxu0 %v1967_v15  ;;  %v1106_v46 = vmul.f32 %v3746_v27, %v4673_v2  ;;  %v1107_v18 = vmul.f32 %v3761_v50, %v4674_v11  ;;  %v4677_v2 = vld [vmem:[#allocation60_spill] sm:$0xff]  ;;  %v4680_v50 = vld [vmem:[#allocation69_spill] sm:$0xff] }
 0x2b8   :  { %4672 = vst [vmem:[#allocation28_spill] sm:$0xff] %v3791_v3  ;;  %v1969_v54 = vpack.c.bf16 %v1104_v1, %v1088_v47  ;;  %2018 = vmatpush1.bf16.msra.mxu1 %v2017_v19  ;;  %v1115_v16 = vpop.permute.xlu0 %1114  ;;  %v1143_v0 = vpop.permute.xlu1 %1142  ;;  %v3800_v38 = vsel %vm310_vm6, %v1127_v37, %v3600_v10  ;;  %v1971_v15 = vpack.c.bf16 %v1137_v33, %v1121_v55  ;;  %v4675_v1 = vld [vmem:[#allocation42_spill] sm:$0xff]  ;;  %v4678_v33 = vld [vmem:[#allocation63_spill] sm:$0xff] }
 0x2b9   :  { %v3805_v30 = vsel %vm277_vm4, %v3625_v29, %v1115_v16  ;;  %v3810_v63 = vsel %vm277_vm4, %v1115_v16, %v3615_v23  ;;  %v1090_v19 = vmul.f32 %v3778_v5, %v4675_v1  ;;  %v3817_v47 = vsel %vm310_vm6, %v3600_v10, %v1131_v14  ;;  %v4676_v37 = vld [vmem:[#allocation66_spill] sm:$0xff]  ;;  %v4679_v14 = vld [vmem:[#allocation68_spill] sm:$0xff]  ;;  %vm4718_vm6 = vmmov %vm4706_vm1 }
 0x2ba   :  { %v1136_v48 = vmul.f32 %v3791_v3, %v4676_v37  ;;  %v1120_v11 = vmul.f32 %v3810_v63, %v4677_v2  ;;  %1970 = vmatpush1.bf16.msra.mxu0 %v1969_v54  ;;  %v3826_v23 = vsel %vm277_vm4, %v1111_v8, %v3625_v29  ;;  %v1123_v55 = vmul.f32 %v3805_v30, %v4678_v33  ;;  %v4681_v2 = vld [vmem:[#allocation62_spill] sm:$0xff] }
 0x2bb   :  { %v2019_v16 = vpack.c.bf16 %v1107_v18, %v1091_v62  ;;  %1972 = vmatprep.subr.bf16.mxu0 %v1971_v15  ;;  %v2021_v1 = vpack.c.bf16 %v1106_v46, %v1090_v19  ;;  %v1138_v10 = vmul.f32 %v3800_v38, %v4679_v14  ;;  %v1139_v54 = vmul.f32 %v3817_v47, %v4680_v50  ;;  %v4683_v15 = vld [vmem:[#allocation74_spill] sm:$0xff]  ;;  %v4687_v14 = vld [vmem:[#allocation77_spill] sm:$0xff] }
 0x2bc   :  { %v1973_v12 = vpack.c.bf16 %v1136_v48, %v1120_v11  ;;  %v1147_v37 = vpop.permute.xlu0 %1146  ;;  %v1159_v3 = vpop.permute.xlu1 %1158  ;;  %v1122_v29 = vmul.f32 %v3826_v23, %v4681_v2  ;;  %v3839_v8 = vsel %vm343_vm7, %v3632_v26, %v1143_v0  ;;  %v3882_v2 = vsel %vm343_vm7, %v1143_v0, %v3642_v39 }
 0x2bd   :  { %2020 = vmatprep.subr.bf16.mxu1 %v2019_v16  ;;  %v3844_v62 = vsel %vm376_vm8, %v3638_v58, %v1159_v3  ;;  %v2023_v46 = vpack.c.bf16 %v1139_v54, %v1123_v55  ;;  %v3849_v50 = vsel %vm343_vm7, %v1147_v37, %v3632_v26  ;;  %v4685_v55 = vld [vmem:[#allocation72_spill] sm:$0xff]  ;;  %v3868_v16 = vsel %vm376_vm8, %v1159_v3, %v3611_v45  ;;  %v4688_v54 = vld [vmem:[#allocation83_spill] sm:$0xff] }
 0x2be   :  { %2022 = vmatpush1.bf16.msra.mxu1 %v2021_v1  ;;  %1974 = vmatpush1.bf16.msra.mxu0 %v1973_v12  ;;  %v2025_v18 = vpack.c.bf16 %v1138_v10, %v1122_v29  ;;  %4682 = vst [vmem:[#allocation36_spill] sm:$0xff] %v3849_v50  ;;  %v1169_v19 = vmul.f32 %v3844_v62, %v4683_v15  ;;  %vm4709_vm4 = vcmp.lt.s32.totalorder %v2434_v21, 119 }
 0x2bf   :  { %2024 = vmatprep.subr.bf16.mxu1 %v2023_v46  ;;  %v1153_v26 = vmul.f32 %v3839_v8, %v4685_v55  ;;  %v3873_v1 = vsel %vm343_vm7, %v3642_v39, %v1147_v37  ;;  %v1152_v10 = vmul.f32 %v3849_v50, %v4687_v14  ;;  %v4691_v14 = vld [vmem:[#allocation79_spill] sm:$0xff]  ;;  %vm4720_vm7 = vmmov %vm4709_vm4 }
 0x2c0   :  { %v1179_v48 = vpop.permute.xlu0 %1178  ;;  %v1163_v11 = vpop.permute.xlu1 %1162  ;;  %4686 = vst [vmem:[#allocation25_spill] sm:$0xff] %v3873_v1  ;;  %vm4742_vm14 = vmmov %vm4709_vm4 }
 0x2c1   :  { %v3856_v33 = vsel %vm376_vm8, %v3611_v45, %v1163_v11  ;;  %v3861_v12 = vsel %vm376_vm8, %v1163_v11, %v3638_v58  ;;  %v1975_v3 = vpack.c.bf16 %v1169_v19, %v1153_v26  ;;  %v4690_v11 = vld [vmem:[#allocation80_spill] sm:$0xff]  ;;  %vm4723_vm8 = vmmov %vm4706_vm1 }
 0x2c2   :  { %4684 = vst [vmem:[#allocation24_spill] sm:$0xff] %v3856_v33  ;;  %2026 = vmatpush1.bf16.msra.mxu1 %v2025_v18  ;;  %v1168_v58 = vmul.f32 %v3861_v12, %v4688_v54  ;;  %v1171_v45 = vmul.f32 %v3856_v33, %v3038_v57  ;;  %v4689_v18 = vld [vmem:[#allocation85_spill] sm:$0xff]  ;;  %v1155_v55 = vmul.f32 %v3873_v1, %v4690_v11  ;;  %vm4743_vm15 = vmmov %vm4709_vm4 }
 0x2c3   :  { %v1170_v37 = vmul.f32 %v3868_v16, %v4689_v18  ;;  %1976 = vmatprep.subr.bf16.mxu0 %v1975_v3  ;;  %v1154_v54 = vmul.f32 %v3882_v2, %v4691_v14  ;;  %v4694_v3 = vld [vmem:[#allocation88_spill] sm:$0xff]  ;;  %v4695_v11 = vld [vmem:[#allocation89_spill] sm:$0xff] }
 0x2c4   :  { %v1211_v29 = vpop.permute.xlu0 %1210  ;;  %v1175_v46 = vpop.permute.xlu1 %1174  ;;  %v1977_v15 = vpack.c.bf16 %v1168_v58, %v1152_v10  ;;  %v2027_v57 = vpack.c.bf16 %v1171_v45, %v1155_v55  ;;  %v3903_v58 = vsel %vm409_vm9, %v1179_v48, %v3646_v4  ;;  %v3911_v45 = vsel %vm409_vm9, %v3654_v42, %v1179_v48 }
 0x2c5   :  { %v3895_v39 = vsel %vm409_vm9, %v3646_v4, %v1175_v46  ;;  %v2029_v26 = vpack.c.bf16 %v1170_v37, %v1154_v54  ;;  %4693 = vst [vmem:[#allocation21_spill] sm:$0xff] %v3903_v58  ;;  %v4696_v54 = vld [vmem:[#allocation90_spill] sm:$0xff] }
 0x2c6   :  { %4692 = vst [vmem:[#allocation35_spill] sm:$0xff] %v3895_v39  ;;  %1978 = vmatpush1.bf16.msra.mxu0 %v1977_v15  ;;  %v1185_v18 = vmul.f32 %v3895_v39, %v4694_v3  ;;  %2028 = vmatprep.subr.bf16.mxu1 %v2027_v57  ;;  %v1184_v1 = vmul.f32 %v3903_v58, %v4696_v54 }
 0x2c7   :  { %2030 = vmatpush1.bf16.msra.mxu1 %v2029_v26  ;;  %v3921_v57 = vsel %vm409_vm9, %v1175_v46, %v3654_v42  ;;  %v4700_v42 = vld [vmem:[#allocation91_spill] sm:$0xff]  ;;  %vm4727_vm9 = vmmov %vm4717_vm5 }
 0x2c8   :  { %v1243_v0 = vpop.permute.xlu0 %1242  ;;  %v1191_v19 = vpop.permute.xlu1 %1190  ;;  %v1186_v46 = vmul.f32 %v3921_v57, %v4700_v42 }
 0x2c9   :  { %v1198_v10 = vsel %vm442_vm10, %v3650_v20, %v1191_v19  ;;  %v1197_v37 = vsel %vm442_vm10, %v1191_v19, %v3617_v41  ;;  %v1187_v19 = vmul.f32 %v3911_v45, %v3124_v24 }
 0x2ca   :  { %v1201_v14 = vmul.f32 %v1198_v10, %v4695_v11  ;;  %v4697_v10 = vld [vmem:[#allocation93_spill] sm:$0xff] }
 0x2cb   :  { %v1202_v3 = vmul.f32 %v1197_v37, %v4697_v10 }
 0x2cc   :  { %v1255_v15 = vpop.permute.xlu0 %1254  ;;  %v1195_v55 = vpop.permute.xlu1 %1194  ;;  %v1979_v4 = vpack.c.bf16 %v1201_v14, %v1185_v18  ;;  %v4698_v18 = vld [vmem:[#allocation92_spill] sm:$0xff]  ;;  %v4699_v14 = vld [vmem:[#allocation94_spill] sm:$0xff] }
 0x2cd   :  { %v1196_v48 = vsel %vm442_vm10, %v3617_v41, %v1195_v55  ;;  %v1199_v26 = vsel %vm442_vm10, %v1195_v55, %v3650_v20  ;;  %v2033_v50 = vpack.c.bf16 %v1202_v3, %v1186_v46  ;;  %v1244_v20 = vsel %vm541_vm13, %v3627_v22, %v1243_v0  ;;  %vm4731_vm10 = vmmov %vm4704_vm0 }
 0x2ce   :  { %v1200_v11 = vmul.f32 %v1199_v26, %v4698_v18  ;;  %v1203_v54 = vmul.f32 %v1196_v48, %v4699_v14  ;;  %1980 = vmatprep.subr.bf16.mxu0 %v1979_v4  ;;  %v4701_v4 = vld [vmem:[#allocation95_spill] sm:$0xff]  ;;  %v4702_v26 = vld [vmem:[#allocation96_spill] sm:$0xff]  ;;  %v1251_v10 = vmul.f32 %v1244_v20, %v3234_v60  ;;  %v1247_v3 = vsel %vm541_vm13, %v1243_v0, %v3678_v43 }
 0x2d0   :  { %v1981_v58 = vpack.c.bf16 %v1200_v11, %v1184_v1  ;;  %v1271_v39 = vpop.permute.xlu0 %1270  ;;  %v1207_v41 = vpop.permute.xlu1 %1206  ;;  %v2031_v33 = vpack.c.bf16 %v1203_v54, %v1187_v19 }
 0x2d1   :  { %v1214_v24 = vsel %vm475_vm11, %v3659_v40, %v1207_v41  ;;  %v1213_v18 = vsel %vm475_vm11, %v1207_v41, %v3676_v13  ;;  %v1248_v41 = vmul.f32 %v1247_v3, %v3227_v49  ;;  %v4712_v3 = vld [vmem:[#allocation33_spill] sm:$0xff] }
 0x2d2   :  { %1982 = vmatpush1.bf16.msra.mxu0 %v1981_v58  ;;  %2032 = vmatprep.subr.bf16.mxu1 %v2031_v33  ;;  %v1217_v48 = vmul.f32 %v1214_v24, %v4701_v4  ;;  %v1212_v33 = vsel %vm475_vm11, %v3676_v13, %v1211_v29  ;;  %v1278_v4 = vsel %vm4708_vm3, %v3644_v61, %v1271_v39 }
 0x2d3   :  { %2034 = vmatpush1.bf16.msra.mxu1 %v2033_v50  ;;  %v1215_v50 = vsel %vm475_vm11, %v1211_v29, %v3659_v40  ;;  %v4703_v40 = vld [vmem:[#allocation97_spill] sm:$0xff]  ;;  %v1219_v0 = vmul.f32 %v1212_v33, %v3190_v25  ;;  %v1262_v25 = vsel %vm4707_vm2, %v3680_v34, %v1255_v15  ;;  %v4710_v33 = vld [vmem:[#allocation99_spill] sm:$0xff]  ;;  %vm4732_vm11 = vmmov %vm4704_vm0 }
 0x2d4   :  { %v1259_v37 = vpop.permute.xlu0 %1258  ;;  %v1223_v55 = vpop.permute.xlu1 %1222  ;;  %v1216_v29 = vmul.f32 %v1215_v50, %v4703_v40 }
 0x2d5   :  { %v1230_v1 = vsel %vm508_vm12, %v3674_v31, %v1223_v55  ;;  %v1229_v58 = vsel %vm508_vm12, %v1223_v55, %v3623_v35  ;;  %v2039_v55 = vpack.c.bf16 %v3518_v17, %v1251_v10  ;;  %v1260_v40 = vsel %vm4718_vm6, %v3634_v28, %v1259_v37 }
 0x2d6   :  { %v1233_v19 = vmul.f32 %v1230_v1, %v4702_v26  ;;  %v1234_v42 = vmul.f32 %v1229_v58, %v3200_v32  ;;  %v1277_v32 = vsel %vm4704_vm0, %v1271_v39, %v3640_v9 }
 0x2d7   :  { %v1281_v26 = vmul.f32 %v1277_v32, %v3268_v56  ;;  %v4713_v56 = vld [vmem:[#allocation31_spill] sm:$0xff]  ;;  %v4721_v32 = vld [vmem:[#allocation16_spill] sm:$0xff] }
 0x2d8   :  { %v1287_v11 = vpop.permute.xlu0 %1286  ;;  %v1227_v14 = vpop.permute.xlu1 %1226  ;;  %v1983_v54 = vpack.c.bf16 %v1233_v19, %v1217_v48 }
 0x2d9   :  { %v1228_v46 = vsel %vm508_vm12, %v3623_v35, %v1227_v14  ;;  %v1231_v60 = vsel %vm508_vm12, %v1227_v14, %v3674_v31  ;;  %v4705_v35 = vld [vmem:[#allocation98_spill] sm:$0xff]  ;;  %v1261_v31 = vsel %vm4706_vm1, %v1255_v15, %v3634_v28  ;;  %vm4737_vm12 = vmmov %vm4717_vm5 }
 0x2da   :  { %v1232_v24 = vmul.f32 %v1231_v60, %v3196_v53  ;;  %v1235_v13 = vmul.f32 %v1228_v46, %v3204_v52  ;;  %1984 = vmatprep.subr.bf16.mxu0 %v1983_v54  ;;  %v1218_v20 = vmul.f32 %v1213_v18, %v4705_v35  ;;  %v1265_v50 = vmul.f32 %v1261_v31, %v4710_v33  ;;  %v4716_v46 = vld [vmem:[#allocation52_spill] sm:$0xff]  ;;  %v4725_v31 = vld [vmem:[#allocation53_spill] sm:$0xff] }
 0x2db   :  { %v1293_v60 = vsel %vm4717_vm5, %v1287_v11, %v4716_v46  ;;  %v4722_v35 = vld [vmem:[#allocation20_spill] sm:$0xff] }
 0x2dc   :  { %v1985_v53 = vpack.c.bf16 %v1232_v24, %v1216_v29  ;;  %v1303_v52 = vpop.permute.xlu0 %1302  ;;  %v1239_v1 = vpop.permute.xlu1 %1238  ;;  %v2035_v49 = vpack.c.bf16 %v1235_v13, %v1219_v0  ;;  %v2037_v48 = vpack.c.bf16 %v1234_v42, %v1218_v20  ;;  %v4719_v29 = vld [vmem:[#allocation107_spill] sm:$0xff]  ;;  %v1991_v13 = vpack.c.bf16 %v1281_v26, %v1265_v50  ;;  %v4730_v26 = vld [vmem:[#allocation112_spill] sm:$0xff]  ;;  %v4735_v50 = vld [vmem:[#allocation105_spill] sm:$0xff] }
 0x2dd   :  { %v1245_v17 = vsel %vm541_vm13, %v1239_v1, %v3627_v22  ;;  %v1246_v58 = vsel %vm541_vm13, %v3678_v43, %v1239_v1  ;;  %v1309_v39 = vsel %vm4709_vm4, %v1303_v52, %v3652_v6  ;;  %v4711_v22 = vld [vmem:[#allocation104_spill] sm:$0xff]  ;;  %v1263_v20 = vsel %vm4723_vm8, %v1259_v37, %v3680_v34  ;;  %vm4738_vm13 = vmmov %vm4717_vm5 }
 0x2de   :  { %v1249_v15 = vmul.f32 %v1246_v58, %v3211_v44  ;;  %v1250_v19 = vmul.f32 %v1245_v17, %v3231_v36  ;;  %1986 = vmatpush1.bf16.msra.mxu0 %v1985_v53  ;;  %2036 = vmatprep.subr.bf16.mxu1 %v2035_v49  ;;  %v1280_v10 = vmul.f32 %v1278_v4, %v4711_v22  ;;  %v4714_v44 = vld [vmem:[#allocation18_spill] sm:$0xff]  ;;  %v4715_v36 = vld [vmem:[#allocation101_spill] sm:$0xff]  ;;  %v4729_v17 = vld [vmem:[#allocation100_spill] sm:$0xff]  ;;  %vm1769_vm4 = vcmask 8192  }
 0x2df   :  { %2038 = vmatpush1.bf16.msra.mxu1 %v2037_v48  ;;  %v1989_v54 = vpack.c.bf16 %v4714_v44, %v1248_v41  ;;  %v1264_v42 = vmul.f32 %v1262_v25, %v4715_v36  ;;  %v1313_v0 = vmul.f32 %v1309_v39, %v4719_v29  ;;  %v1317_v41 = vmul.f32 %v4722_v35, %v4721_v32  ;;  %v4726_v53 = vld [vmem:[#allocation54_spill] sm:$0xff] }
 0x2e0   :  { %v2041_v18 = vpack.c.bf16 %v4712_v3, %v1250_v19  ;;  %2040 = vmatprep.subr.bf16.mxu1 %v2039_v55  ;;  %v1301_v43 = vpop.permute.xlu1 %1300  ;;  %v1987_v14 = vpack.c.bf16 %v4713_v56, %v1249_v15  ;;  %v4724_v55 = vld [vmem:[#allocation17_spill] sm:$0xff]  ;;  %v1294_v1 = vsel %vm4727_vm9, %v4726_v53, %v1287_v11  ;;  %v1291_v4 = vpop.permute.xlu0 %1290  ;;  %v1266_v58 = vmul.f32 %v1260_v40, %v4729_v17  ;;  %v4733_v19 = vld [vmem:[#allocation102_spill] sm:$0xff]  ;;  %v4734_v11 = vld [vmem:[#allocation103_spill] sm:$0xff] }
 0x2e1   :  { %v1310_v24 = vsel %vm4720_vm7, %v1301_v43, %v1303_v52  ;;  %v1321_v25 = vmul.f32 %v4725_v31, %v4724_v55  ;;  %v1993_v28 = vpack.c.bf16 %v1280_v10, %v1264_v42  ;;  %v4728_v52 = vld [vmem:[#allocation106_spill] sm:$0xff]  ;;  %v1267_v39 = vmul.f32 %v1263_v20, %v4733_v19  ;;  %v4736_v3 = vld [vmem:[#allocation109_spill] sm:$0xff]  ;;  %v4746_v20 = vld [vmem:[#allocation111_spill] sm:$0xff] }
 0x2e2   :  { %1988 = vmatprep.subr.bf16.mxu0 %v1987_v14  ;;  %v1297_v49 = vmul.f32 %v1293_v60, %v4728_v52  ;;  %v1312_v15 = vmul.f32 %v1310_v24, %v4730_v26  ;;  %v1292_v56 = vsel %vm4737_vm12, %v4716_v46, %v1291_v4  ;;  %v4739_v14 = vld [vmem:[#allocation50_spill] sm:$0xff]  ;;  %v4740_v60 = vld [vmem:[#allocation8_spill] sm:$0xff]  ;;  %v4741_v40 = vld [vmem:[#allocation9_spill] sm:$0xff] }
 0x2e3   :  { %1990 = vmatpush1.bf16.msra.mxu0 %v1989_v54  ;;  %2042 = vmatpush1.bf16.msra.mxu1 %v2041_v18  ;;  %v1296_v18 = vmul.f32 %v1294_v1, %v4736_v3  ;;  %v1999_v42 = vpack.c.bf16 %v1321_v25, %v1317_v41  ;;  %v1319_v29 = vmul.f32 %v4741_v40, %v4740_v60  ;;  %v4745_v35 = vld [vmem:[#allocation110_spill] sm:$0xff]  ;;  %v4747_v31 = vld [vmem:[#allocation113_spill] sm:$0xff]  ;;  %v4749_v25 = vld [vmem:[#allocation15_spill] sm:$0xff] }
 0x2e4   :  { %1992 = vmatprep.subr.bf16.mxu0 %v1991_v13  ;;  %v1275_v48 = vpop.permute.xlu1 %1274  ;;  %v1995_v10 = vpack.c.bf16 %v1313_v0, %v1297_v49  ;;  %v4744_v13 = vld [vmem:[#allocation108_spill] sm:$0xff]  ;;  %v4748_v41 = vld [vmem:[#allocation13_spill] sm:$0xff]  ;;  %v4752_v49 = vld [vmem:[#allocation6_spill] sm:$0xff] }
 0x2e5   :  { %v1276_v34 = vsel %vm4731_vm10, %v3640_v9, %v1275_v48  ;;  %v1279_v37 = vsel %vm4732_vm11, %v1275_v48, %v3644_v61  ;;  %v1295_v9 = vsel %vm4738_vm13, %v1291_v4, %v4726_v53  ;;  %v1329_v61 = vmul.f32 %v3746_v27, %v4739_v14  ;;  %v4750_v1 = vld [vmem:[#allocation44_spill] sm:$0xff]  ;;  %v4753_v48 = vld [vmem:[#allocation23_spill] sm:$0xff]  ;;  %v4755_v26 = vld [vmem:[#allocation70_spill] sm:$0xff] }
 0x2e6   :  { %v1282_v33 = vmul.f32 %v1276_v34, %v4734_v11  ;;  %v1283_v22 = vmul.f32 %v1279_v37, %v4735_v50  ;;  %v1997_v0 = vpack.c.bf16 %v1312_v15, %v1296_v18  ;;  %v1298_v32 = vmul.f32 %v1292_v56, %v4744_v13  ;;  %v4754_v17 = vld [vmem:[#allocation76_spill] sm:$0xff]  ;;  %v4756_v34 = vld [vmem:[#allocation41_spill] sm:$0xff]  ;;  %v4757_v11 = vld [vmem:[#allocation26_spill] sm:$0xff] }
 0x2e7   :  { %1994 = vmatpush1.bf16.msra.mxu0 %v1993_v28  ;;  %v1299_v27 = vmul.f32 %v1295_v9, %v4745_v35  ;;  %v1323_v53 = vmul.f32 %v4749_v25, %v4748_v41  ;;  %v1337_v15 = vmul.f32 %v3800_v38, %v4755_v26  ;;  %v1327_v37 = vmul.f32 %v3773_v7, %v4756_v34  ;;  %v4759_v50 = vld [vmem:[#allocation34_spill] sm:$0xff]  ;;  %v4762_v18 = vld [vmem:[#allocation39_spill] sm:$0xff]  ;;  %v4765_v14 = vld [vmem:[#allocation64_spill] sm:$0xff] }
 0x2e8   :  { %v2045_v44 = vpack.c.bf16 %v1282_v33, %v1266_v58  ;;  %1996 = vmatprep.subr.bf16.mxu0 %v1995_v10  ;;  %v1307_v54 = vpop.permute.xlu1 %1306  ;;  %v2043_v36 = vpack.c.bf16 %v1283_v22, %v1267_v39  ;;  %v1318_v58 = vmul.f32 %v4754_v17, %v4753_v48  ;;  %v4760_v22 = vld [vmem:[#allocation14_spill] sm:$0xff]  ;;  %v1333_v7 = vmul.f32 %v3826_v23, %v4765_v14  ;;  %v4768_v60 = vld [vmem:[#allocation49_spill] sm:$0xff]  ;;  %v4772_v23 = vld [vmem:[#allocation12_spill] sm:$0xff] }
 0x2e9   :  { %v1308_v46 = vsel %vm4742_vm14, %v3652_v6, %v1307_v54  ;;  %v1311_v24 = vsel %vm4743_vm15, %v1307_v54, %v1301_v43  ;;  %v1325_v6 = vmul.f32 %v3778_v5, %v4750_v1  ;;  %v4751_v43 = vld [vmem:[#allocation37_spill] sm:$0xff]  ;;  %v2051_v39 = vpack.c.bf16 %v1323_v53, %v1319_v29  ;;  %v4758_v5 = vld [vmem:[#allocation59_spill] sm:$0xff]  ;;  %v4761_v3 = vld [vmem:[#allocation38_spill] sm:$0xff] }
 0x2ea   :  { %v1314_v55 = vmul.f32 %v1308_v46, %v4746_v20  ;;  %v1315_v28 = vmul.f32 %v1311_v24, %v4747_v31  ;;  %2044 = vmatprep.subr.bf16.mxu1 %v2043_v36  ;;  %v1328_v4 = vmul.f32 %v4752_v49, %v4751_v43  ;;  %v1322_v33 = vmul.f32 %v4758_v5, %v4757_v11  ;;  %v4764_v9 = vld [vmem:[#allocation46_spill] sm:$0xff]  ;;  %v4767_v36 = vld [vmem:[#allocation11_spill] sm:$0xff]  ;;  %v4769_v29 = vld [vmem:[#allocation61_spill] sm:$0xff] }
 0x2eb   :  { %1998 = vmatpush1.bf16.msra.mxu0 %v1997_v0  ;;  %2046 = vmatpush1.bf16.msra.mxu1 %v2045_v44  ;;  %v2003_v19 = vpack.c.bf16 %v1329_v61, %v1325_v6  ;;  %v1324_v10 = vmul.f32 %v4760_v22, %v4759_v50  ;;  %v4763_v56 = vpack.c.bf16 %v4761_v3, %v4762_v18  ;;  %v4766_v54 = vld [vmem:[#allocation58_spill] sm:$0xff]  ;;  %v4775_v31 = vld [vmem:[#allocation67_spill] sm:$0xff]  ;;  %v4778_v53 = vld [vmem:[#allocation65_spill] sm:$0xff] }
 0x2ec   :  { %v2049_v52 = vpack.c.bf16 %v1314_v55, %v1298_v32  ;;  %2000 = vmatprep.subr.bf16.mxu0 %v1999_v42  ;;  %v2047_v21 = vpack.c.bf16 %v1315_v28, %v1299_v27  ;;  %v1331_v38 = vmul.f32 %v3751_v59, %v4764_v9  ;;  %v2053_v44 = vpack.c.bf16 %v1322_v33, %v1318_v58  ;;  %v4770_v46 = vld [vmem:[#allocation86_spill] sm:$0xff]  ;;  %v4771_v32 = vld [vmem:[#allocation51_spill] sm:$0xff]  ;;  %v4773_v27 = vld [vmem:[#allocation56_spill] sm:$0xff] }
 0x2ed   :  { %v2005_v61 = vpack.c.bf16 %v1328_v4, %v1324_v10  ;;  %v1336_v42 = vmul.f32 %v4767_v36, %v4766_v54  ;;  %v1326_v40 = vmul.f32 %v3768_v51, %v4768_v60  ;;  %v1335_v0 = vmul.f32 %v3810_v63, %v4769_v29  ;;  %v4774_v20 = vld [vmem:[#allocation10_spill] sm:$0xff]  ;;  %v4776_v28 = vld [vmem:[#allocation28_spill] sm:$0xff]  ;;  %v4777_v51 = vld [vmem:[#allocation81_spill] sm:$0xff] }
 0x2ee   :  { %2048 = vmatprep.subr.bf16.mxu1 %v2047_v21  ;;  %v1345_v24 = vmul.f32 %v3868_v16, %v4770_v46  ;;  %v2007_v59 = vpack.c.bf16 %v1337_v15, %v1333_v7  ;;  %v2055_v13 = vpack.c.bf16 %v1331_v38, %v1327_v37  ;;  %v1330_v35 = vmul.f32 %v4772_v23, %v4771_v32  ;;  %v4779_v6 = vld [vmem:[#allocation75_spill] sm:$0xff]  ;;  %v4780_v21 = vld [vmem:[#allocation84_spill] sm:$0xff]  ;;  %v4782_v58 = vld [vmem:[#allocation73_spill] sm:$0xff] }
 0x2ef   :  { %2002 = vmatpush1.bf16.msra.mxu0 %v4763_v56  ;;  %2050 = vmatpush1.bf16.msra.mxu1 %v2049_v52  ;;  %v1332_v55 = vmul.f32 %v4774_v20, %v4773_v27  ;;  %v1339_v41 = vmul.f32 %v4776_v28, %v4775_v31  ;;  %v1341_v25 = vmul.f32 %v3882_v2, %v4777_v51  ;;  %v4781_v48 = vld [vmem:[#allocation71_spill] sm:$0xff]  ;;  %v4783_v26 = vld [vmem:[#allocation78_spill] sm:$0xff]  ;;  %v4784_v15 = vld [vmem:[#allocation36_spill] sm:$0xff] }
 0x2f0   :  { %2004 = vmatprep.subr.bf16.mxu0 %v2003_v19  ;;  %2052 = vmatprep.subr.bf16.mxu1 %v2051_v39  ;;  %v2057_v16 = vpack.c.bf16 %v1330_v35, %v1326_v40  ;;  %v1334_v1 = vmul.f32 %v3805_v30, %v4778_v53  ;;  %v1344_v52 = vmul.f32 %v3844_v62, %v4779_v6  ;;  %v4785_v37 = vld [vmem:[#allocation87_spill] sm:$0xff]  ;;  %v4786_v19 = vld [vmem:[#allocation24_spill] sm:$0xff]  ;;  %v4787_v39 = vld [vmem:[#allocation30_spill] sm:$0xff] }
 0x2f1   :  { %v2009_v63 = vpack.c.bf16 %v1336_v42, %v1332_v55  ;;  %v1347_v43 = vmul.f32 %v3861_v12, %v4780_v21  ;;  %v2011_v49 = vpack.c.bf16 %v1345_v24, %v1341_v25  ;;  %v2059_v4 = vpack.c.bf16 %v1339_v41, %v1335_v0  ;;  %v4788_v33 = vld [vmem:[#allocation82_spill] sm:$0xff]  ;;  %v4789_v50 = vld [vmem:[#allocation25_spill] sm:$0xff]  ;;  %v1567_v3 = vld [vmem:[%s4348_s7 + $0x90] sm:$0xff] }
 0x2f2   :  { %v1338_v17 = vmul.f32 %v3817_v47, %v4781_v48  ;;  %v1340_v2 = vmul.f32 %v3839_v8, %v4782_v58  ;;  %v1343_v34 = vmul.f32 %v4784_v15, %v4783_v26  ;;  %v1346_v12 = vmul.f32 %v4786_v19, %v4785_v37  ;;  %v1565_v47 = vld [vmem:[%s4348_s7 + $0x80] sm:$0xff]  ;;  %v1566_v8 = vld [vmem:[%s4348_s7 + $0x88] sm:$0xff]  ;;  %v1568_v18 = vld [vmem:[%s4348_s7 + $0x98] sm:$0xff] }
 0x2f3   :  { %2006 = vmatpush1.bf16.msra.mxu0 %v2005_v61  ;;  %2054 = vmatpush1.bf16.msra.mxu1 %v2053_v44  ;;  %v1349_v11 = vmul.f32 %v3921_v57, %v4787_v39  ;;  %v1342_v22 = vmul.f32 %v4789_v50, %v4788_v33  ;;  %v1549_v10 = vld [vmem:[%s4348_s7] sm:$0xff]  ;;  %v1550_v57 = vld [vmem:[%s4348_s7 + $0x8] sm:$0xff]  ;;  %v2067_v61 = vpack.c.bf16 %v1566_v8, %v1565_v47  ;;  %v4792_v36 = vld [vmem:[#allocation32_spill] sm:$0xff] }
 0x2f4   :  { %2008 = vmatprep.subr.bf16.mxu0 %v2007_v59  ;;  %2056 = vmatprep.subr.bf16.mxu1 %v2055_v13  ;;  %v2061_v30 = vpack.c.bf16 %v1338_v17, %v1334_v1  ;;  %v2013_v62 = vpack.c.bf16 %v1344_v52, %v1340_v2  ;;  %v2063_v5 = vpack.c.bf16 %v1347_v43, %v1343_v34  ;;  %v4790_v9 = vld [vmem:[#allocation29_spill] sm:$0xff]  ;;  %v4791_v38 = vld [vmem:[#allocation35_spill] sm:$0xff] }
 0x2f5   :  { %v2065_v56 = vpack.c.bf16 %v1346_v12, %v1342_v22  ;;  %v1348_v14 = vmul.f32 %v4791_v38, %v4790_v9  ;;  %v1352_v7 = vld [vmem:[%s4344_s3] sm:$0xff]  ;;  %v1598_v54 = vld [vmem:[%s4348_s7 + $0x188] sm:$0xff]  ;;  %v2069_v40 = vpack.c.bf16 %v1550_v57, %v1549_v10  ;;  %v1551_v29 = vld [vmem:[%s4348_s7 + $0x10] sm:$0xff]  ;;  %v2071_v24 = vpack.c.bf16 %v1568_v18, %v1567_v3 }
 0x2f6   :  { %v1597_v44 = vld [vmem:[%s4348_s7 + $0x180] sm:$0xff]  ;;  %v1582_v46 = vld [vmem:[%s4348_s7 + $0x108] sm:$0xff]  ;;  %v1552_v59 = vld [vmem:[%s4348_s7 + $0x18] sm:$0xff] }
 0x2f7   :  { %2010 = vmatpush1.bf16.msra.mxu0 %v2009_v63  ;;  %2058 = vmatpush1.bf16.msra.mxu1 %v2057_v16  ;;  %v4793_v42 = vld [vmem:[#allocation21_spill] sm:$0xff]  ;;  %v1599_v13 = vld [vmem:[%s4348_s7 + $0x190] sm:$0xff]  ;;  %v2099_v23 = vpack.c.bf16 %v1598_v54, %v1597_v44  ;;  %v1570_v27 = vld [vmem:[%s4348_s7 + $0xa8] sm:$0xff]  ;;  %v2073_v28 = vpack.c.bf16 %v1552_v59, %v1551_v29 }
 0x2f8   :  { %2012 = vmatprep.subr.bf16.mxu0 %v2011_v49  ;;  %2060 = vmatprep.subr.bf16.mxu1 %v2059_v4  ;;  %v1351_v60 = vmul.f32 %v4793_v42, %v4792_v36  ;;  %v1581_v0 = vld [vmem:[%s4348_s7 + $0x100] sm:$0xff]  ;;  %v1600_v32 = vld [vmem:[%s4348_s7 + $0x198] sm:$0xff]  ;;  %v4794_v20 = vld [vmem:[#allocation19_spill] sm:$0xff] }
 0x2f9   :  { %v1569_v35 = vld [vmem:[%s4348_s7 + $0xa0] sm:$0xff]  ;;  %v1350_v55 = vmul.f32 %v3911_v45, %v4794_v20  ;;  %v2101_v31 = vpack.c.bf16 %v1582_v46, %v1581_v0  ;;  %v2103_v41 = vpack.c.bf16 %v1600_v32, %v1599_v13  ;;  %v1583_v51 = vld [vmem:[%s4348_s7 + $0x110] sm:$0xff]  ;;  %v1584_v25 = vld [vmem:[%s4348_s7 + $0x118] sm:$0xff] }
 0x2fa   :  { %v2075_v63 = vpack.c.bf16 %v1570_v27, %v1569_v35  ;;  %v1553_v45 = vld [vmem:[%s4348_s7 + $0x20] sm:$0xff]  ;;  %v1554_v16 = vld [vmem:[%s4348_s7 + $0x28] sm:$0xff]  ;;  %v2105_v53 = vpack.c.bf16 %v1584_v25, %v1583_v51  ;;  %v1571_v6 = vld [vmem:[%s4348_s7 + $0xb0] sm:$0xff] }
 0x2fb   :  { %2014 = vmatpush1.bf16.msra.mxu0 %v2013_v62  ;;  %2062 = vmatpush1.bf16.msra.mxu1 %v2061_v30  ;;  %v2077_v1 = vpack.c.bf16 %v1554_v16, %v1553_v45  ;;  %v1572_v52 = vld [vmem:[%s4348_s7 + $0xb8] sm:$0xff]  ;;  %v1601_v21 = vld [vmem:[%s4348_s7 + $0x1a0] sm:$0xff]  ;;  %v1602_v49 = vld [vmem:[%s4348_s7 + $0x1a8] sm:$0xff] }
 0x2fc   :  { %1415 = vmatprep.subr.mxu0 %v1349_v11  ;;  %2064 = vmatprep.subr.bf16.mxu1 %v2063_v5  ;;  %v2079_v43 = vpack.c.bf16 %v1572_v52, %v1571_v6  ;;  %v1555_v4 = vld [vmem:[%s4348_s7 + $0x30] sm:$0xff]  ;;  %v2107_v48 = vpack.c.bf16 %v1602_v49, %v1601_v21  ;;  %v1556_v17 = vld [vmem:[%s4348_s7 + $0x38] sm:$0xff]  ;;  %v1585_v58 = vld [vmem:[%s4348_s7 + $0x120] sm:$0xff] }
 0x2fd   :  { %v1586_v2 = vld [vmem:[%s4348_s7 + $0x128] sm:$0xff]  ;;  %v2081_v26 = vpack.c.bf16 %v1556_v17, %v1555_v4  ;;  %v1573_v34 = vld [vmem:[%s4348_s7 + $0xc0] sm:$0xff]  ;;  %v1603_v62 = vld [vmem:[%s4348_s7 + $0x1b0] sm:$0xff] }
 0x2fe   :  { %v2109_v15 = vpack.c.bf16 %v1586_v2, %v1585_v58  ;;  %v1574_v30 = vld [vmem:[%s4348_s7 + $0xc8] sm:$0xff]  ;;  %v1604_v19 = vld [vmem:[%s4348_s7 + $0x1b8] sm:$0xff]  ;;  %v1557_v12 = vld [vmem:[%s4348_s7 + $0x40] sm:$0xff] }
 0x2ff   :  { %1416 = vmatpush1.msra.mxu0 %v1348_v14  ;;  %2066 = vmatpush1.bf16.msra.mxu1 %v2065_v56  ;;  %v2083_v37 = vpack.c.bf16 %v1574_v30, %v1573_v34  ;;  %v2111_v39 = vpack.c.bf16 %v1604_v19, %v1603_v62  ;;  %v1558_v11 = vld [vmem:[%s4348_s7 + $0x48] sm:$0xff]  ;;  %v1587_v5 = vld [vmem:[%s4348_s7 + $0x130] sm:$0xff]  ;;  %v1588_v47 = vld [vmem:[%s4348_s7 + $0x138] sm:$0xff] }
 0x300   :  { %1428 = vmatmul.mubr.f32.vlgmr.msra.gmra.mrb[2].mxu0 %v1352_v7  ;;  %1486 = vmatprep.subr.mxu1 %v1351_v60  ;;  %v2085_v8 = vpack.c.bf16 %v1558_v11, %v1557_v12  ;;  %v2113_v33 = vpack.c.bf16 %v1588_v47, %v1587_v5  ;;  %v1575_v50 = vld [vmem:[%s4348_s7 + $0xd0] sm:$0xff]  ;;  %v1576_v22 = vld [vmem:[%s4348_s7 + $0xd8] sm:$0xff]  ;;  %v1605_v10 = vld [vmem:[%s4348_s7 + $0x1c0] sm:$0xff] }
 0x301   :  { %2068 = vmatprep.subr.bf16.mxu0 %v2067_v61  ;;  %v2087_v57 = vpack.c.bf16 %v1576_v22, %v1575_v50  ;;  %v1606_v3 = vld [vmem:[%s4348_s7 + $0x1c8] sm:$0xff]  ;;  %v1559_v18 = vld [vmem:[%s4348_s7 + $0x50] sm:$0xff]  ;;  %v1560_v56 = vld [vmem:[%s4348_s7 + $0x58] sm:$0xff] }
 0x302   :  { %2070 = vmatpush3.bf16.msra.mxu0 %v2069_v40  ;;  %v2115_v9 = vpack.c.bf16 %v1606_v3, %v1605_v10  ;;  %v2089_v38 = vpack.c.bf16 %v1560_v56, %v1559_v18  ;;  %v1589_v14 = vld [vmem:[%s4348_s7 + $0x140] sm:$0xff]  ;;  %v1578_v54 = vld [vmem:[%s4348_s7 + $0xe8] sm:$0xff]  ;;  %v1607_v36 = vld [vmem:[%s4348_s7 + $0x1d0] sm:$0xff] }
 0x303   :  { %1487 = vmatpush1.msra.mxu1 %v1350_v55  ;;  %2072 = vmatprep.subr.bf16.mxu0 %v2071_v24  ;;  %v1577_v61 = vld [vmem:[%s4348_s7 + $0xe0] sm:$0xff]  ;;  %v1608_v42 = vld [vmem:[%s4348_s7 + $0x1d8] sm:$0xff]  ;;  %v1562_v0 = vld [vmem:[%s4348_s7 + $0x68] sm:$0xff] }
 0x304   :  { %1499 = vmatmul.mubr.f32.vlgmr.msra.gmra.mrb[2].mxu1 %v1352_v7  ;;  %2100 = vmatprep.subr.bf16.mxu1 %v2099_v23  ;;  %v1590_v7 = vld [vmem:[%s4348_s7 + $0x148] sm:$0xff]  ;;  %v2091_v60 = vpack.c.bf16 %v1578_v54, %v1577_v61  ;;  %v2119_v40 = vpack.c.bf16 %v1608_v42, %v1607_v36  ;;  %v1561_v29 = vld [vmem:[%s4348_s7 + $0x60] sm:$0xff]  ;;  %v1591_v46 = vld [vmem:[%s4348_s7 + $0x150] sm:$0xff] }
 0x305   :  { %2102 = vmatpush3.bf16.msra.mxu1 %v2101_v31  ;;  %v2117_v44 = vpack.c.bf16 %v1590_v7, %v1589_v14  ;;  %v1592_v24 = vld [vmem:[%s4348_s7 + $0x158] sm:$0xff]  ;;  %v1579_v59 = vld [vmem:[%s4348_s7 + $0xf0] sm:$0xff]  ;;  %v2093_v32 = vpack.c.bf16 %v1562_v0, %v1561_v29  ;;  %v1609_v35 = vld [vmem:[%s4348_s7 + $0x1e0] sm:$0xff] }
 0x306   :  { %2074 = vmatpush3.bf16.msra.mxu0 %v2073_v28  ;;  %2104 = vmatprep.subr.bf16.mxu1 %v2103_v41  ;;  %v1580_v13 = vld [vmem:[%s4348_s7 + $0xf8] sm:$0xff]  ;;  %v2121_v23 = vpack.c.bf16 %v1592_v24, %v1591_v46  ;;  %v1610_v27 = vld [vmem:[%s4348_s7 + $0x1e8] sm:$0xff]  ;;  %v1563_v20 = vld [vmem:[%s4348_s7 + $0x70] sm:$0xff] }
 0x307   :  { %2076 = vmatprep.subr.bf16.mxu0 %v2075_v63  ;;  %v2095_v55 = vpack.c.bf16 %v1580_v13, %v1579_v59  ;;  %v2123_v31 = vpack.c.bf16 %v1610_v27, %v1609_v35  ;;  %v1564_v28 = vld [vmem:[%s4348_s7 + $0x78] sm:$0xff]  ;;  %v1593_v41 = vld [vmem:[%s4348_s7 + $0x160] sm:$0xff]  ;;  %v1594_v51 = vld [vmem:[%s4348_s7 + $0x168] sm:$0xff] }
 0x308   :  { %v1611_v25 = vld [vmem:[%s4348_s7 + $0x1f0] sm:$0xff]  ;;  %v1612_v63 = vld [vmem:[%s4348_s7 + $0x1f8] sm:$0xff]  ;;  %v1613_v45 = vld [vmem:[#allocation2] sm:$0x1]  ;;  %v2097_v16 = vpack.c.bf16 %v1564_v28, %v1563_v20 }
 0x309   :  { %2106 = vmatpush3.bf16.msra.mxu1 %v2105_v53  ;;  %v2125_v53 = vpack.c.bf16 %v1594_v51, %v1593_v41  ;;  %v1595_v6 = vld [vmem:[%s4348_s7 + $0x170] sm:$0xff]  ;;  %v1596_v52 = vld [vmem:[%s4348_s7 + $0x178] sm:$0xff]  ;;  %1616 = vperm.xlu1 %2151, %v1613_v45   ;;  %v1517_v2 = vld [vmem:[%s4347_s6] sm:$0xff] }
 0x30a   :  { %2078 = vmatpush3.bf16.msra.mxu0 %v2077_v1  ;;  %2108 = vmatprep.subr.bf16.mxu1 %v2107_v48  ;;  %v2127_v1 = vpack.c.bf16 %v1612_v63, %v1611_v25  ;;  %v2129_v21 = vpack.c.bf16 %v1596_v52, %v1595_v6  ;;  %v1519_v47 = vld [vmem:[%s4347_s6 + $0x10] sm:$0xff]  ;;  %v1520_v50 = vld [vmem:[%s4347_s6 + $0x18] sm:$0xff] }
 0x30b   :  { %2080 = vmatprep.subr.bf16.mxu0 %v2079_v43  ;;  %v1358_v43 = vpop.permute.xlu0 %1357  ;;  %v4795_v41 = vld [vmem:[#allocation7_spill] sm:$0xff] }
 0x30d   :  { %2110 = vmatpush3.bf16.msra.mxu1 %v2109_v15  ;;  %v1518_v15 = vld [vmem:[%s4347_s6 + $0x8] sm:$0xff]  ;;  %s2204_s6 = smov [#allocation3]  }
 0x30e   :  { %2082 = vmatpush3.bf16.msra.mxu0 %v2081_v26  ;;  %2112 = vmatprep.subr.bf16.mxu1 %v2111_v39  ;;  %s1777_s13 = sshll.u32 %s2204_s6, 4  ;;  %s1778_s13 = int_to_ptr.vmem [resolvable:$true] %s1777_s13 }
 0x30f   :  { %2084 = vmatprep.subr.bf16.mxu0 %v2083_v37  ;;  %s2162_s4 = scalar_lea.vmem %s1778_s13, 16  ;;  %s2166_s14 = scalar_lea.vmem %s1778_s13, 32 }
 0x310   :  { %p2163_p0 = scmp.ne.s32.totalorder %s1778_s13, %s2162_s4  ;;  %p2167_p1 = scmp.lt.s32.totalorder %s1778_s13, %s1778_s13 }
 0x311   :  { %2114 = vmatpush3.bf16.msra.mxu1 %v2113_v33  ;;  %p2168_p2 = scmp.lt.s32.totalorder %s2166_s14, %s2162_s4 }
 0x312   :  { %2086 = vmatpush3.bf16.msra.mxu0 %v2085_v8  ;;  %2116 = vmatprep.subr.bf16.mxu1 %v2115_v9 }
 0x313   :  { %2088 = vmatprep.subr.bf16.mxu0 %v2087_v57  ;;  %p2169_p3 = por %p2168_p2, %p2167_p1 }
 0x315   :  { %2118 = vmatpush3.bf16.msra.mxu1 %v2117_v44  ;;  %p2170_p4 = pnand %p2169_p3, %p2163_p0 }
 0x316   :  { %2090 = vmatpush3.bf16.msra.mxu0 %v2089_v38  ;;  %2120 = vmatprep.subr.bf16.mxu1 %v2119_v40 }
 0x317   :  { %2092 = vmatprep.subr.bf16.mxu0 %v2091_v60 }
 0x319   :  { %2122 = vmatpush3.bf16.msra.mxu1 %v2121_v23 }
 0x31a   :  { %2094 = vmatpush3.bf16.msra.mxu0 %v2093_v32  ;;  %2124 = vmatprep.subr.bf16.mxu1 %v2123_v31 }
 0x31b   :  { %2096 = vmatprep.subr.bf16.mxu0 %v2095_v55 }
 0x31d   :  { %2126 = vmatpush3.bf16.msra.mxu1 %v2125_v53 }
 0x31e   :  { %2098 = vmatpush3.bf16.msra.mxu0 %v2097_v16  ;;  %2128 = vmatprep.subr.bf16.mxu1 %v2127_v1 }
 0x321   :  { %2130 = vmatpush3.bf16.msra.mxu1 %v2129_v21 }
 0x388   :  { %v1617_v20 = vpop.permute.xlu1 %1616 }
 0x389   :  { %v1622_v51 = vrot.slane %v1617_v20, %v4795_v41 }
 0x3d3   :  { %v1429_v49 = vpop.f32.mrb[2].mxu0 }
 0x3d4   :  { %v1430_v4 = vadd.f32 %v1429_v49, %v1358_v43  ;;  %v1431_v48 = vpop.f32.mrb[3].mxu0 }
 0x3d5   :  { %v1432_v17 = vadd.f32 %v1431_v48, %v1358_v43 }
 0x3d6   :  { %vm1505_vm0 = vcmp.ge.f32.partialorder %v1430_v4, 0.0  ;;  %v1509_v58 = vmul.f32 0.2, %v1430_v4 }
 0x3d7   :  { %vm1506_vm1 = vcmp.ge.f32.partialorder %v1432_v17, 0.0  ;;  %v1510_v26 = vmul.f32 0.2, %v1432_v17  ;;  %v1500_v34 = vpop.f32.mrb[2].mxu1 }
 0x3d8   :  { %v1513_v30 = vsel %vm1505_vm0, %v1430_v4, %v1509_v58  ;;  %v1501_v62 = vadd.f32 %v1500_v34, %v1358_v43  ;;  %v1502_v37 = vpop.f32.mrb[3].mxu1 }
 0x3d9   :  { %v1521_v19 = vmul.f32 %v1517_v2, %v1513_v30  ;;  %v1514_v12 = vsel %vm1506_vm1, %v1432_v17, %v1510_v26  ;;  %v1503_v39 = vadd.f32 %v1502_v37, %v1358_v43 }
 0x3da   :  { %v1522_v11 = vmul.f32 %v1518_v15, %v1514_v12  ;;  %vm1507_vm2 = vcmp.ge.f32.partialorder %v1501_v62, 0.0  ;;  %v1511_v5 = vmul.f32 0.2, %v1501_v62 }
 0x3db   :  { %v1525_v8 = vrot.slane %v1521_v19, 4  ;;  %vm1508_vm3 = vcmp.ge.f32.partialorder %v1503_v39, 0.0  ;;  %v1512_v33 = vmul.f32 0.2, %v1503_v39 }
 0x3dc   :  { %v1531_v22 = vrot.slane %v1522_v11, 4  ;;  %v1515_v10 = vsel %vm1507_vm2, %v1501_v62, %v1511_v5 }
 0x3dd   :  { %v1526_v57 = vadd.f32 %v1525_v8, %v1521_v19  ;;  %v1523_v3 = vmul.f32 %v1519_v47, %v1515_v10  ;;  %v1516_v18 = vsel %vm1508_vm3, %v1503_v39, %v1512_v33 }
 0x3de   :  { %v1524_v56 = vmul.f32 %v1520_v50, %v1516_v18  ;;  %v1532_v9 = vadd.f32 %v1531_v22, %v1522_v11 }
 0x3df   :  { %v1527_v38 = vrot.slane %v1526_v57, 2  ;;  %v1537_v14 = vrot.slane %v1523_v3, 4 }
 0x3e0   :  { %v1543_v7 = vrot.slane %v1524_v56, 4  ;;  %v1533_v61 = vrot.slane %v1532_v9, 2 }
 0x3e1   :  { %v1538_v44 = vadd.f32 %v1537_v14, %v1523_v3  ;;  %v1528_v54 = vadd.f32 %v1527_v38, %v1526_v57 }
 0x3e2   :  { %v1534_v36 = vadd.f32 %v1533_v61, %v1532_v9  ;;  %v1544_v42 = vadd.f32 %v1543_v7, %v1524_v56 }
 0x3e3   :  { %v1539_v60 = vrot.slane %v1538_v44, 2  ;;  %v1529_v40 = vrot.slane %v1528_v54, 1 }
 0x3e4   :  { %v1535_v29 = vrot.slane %v1534_v36, 1  ;;  %v1545_v0 = vrot.slane %v1544_v42, 2 }
 0x3e5   :  { %v1540_v46 = vadd.f32 %v1539_v60, %v1538_v44  ;;  %v1530_v13 = vadd.f32 %v1529_v40, %v1528_v54 }
 0x3e6   :  { %v1536_v24 = vadd.f32 %v1535_v29, %v1534_v36  ;;  %v1546_v59 = vadd.f32 %v1545_v0, %v1544_v42 }
 0x3e7   :  { %v1541_v32 = vrot.slane %v1540_v46, 1 }
 0x3e8   :  { %1687 = vmatprep.mubr.f32.mxu0 %v1536_v24  ;;  %v1547_v23 = vrot.slane %v1546_v59, 1 }
 0x3e9   :  { %1688 = vmatmul.mubr.f32.vlgmr.msra.gmra.mrb[4].mxu0 %v1530_v13  ;;  %v1542_v27 = vadd.f32 %v1541_v32, %v1540_v46 }
 0x3ea   :  { %v1548_v35 = vadd.f32 %v1547_v23, %v1546_v59 }
 0x3ec   :  { %1757 = vmatprep.mubr.f32.mxu1 %v1548_v35 }
 0x3ed   :  { %1758 = vmatmul.mubr.f32.vlgmr.msra.gmra.mrb[4].mxu1 %v1542_v27 }
 0x4bc   :  { %v1821_v55 = vpop.f32.mrb[4].mxu0 }
 0x4bd   :  { %v1822_v31 = vpop.f32.mrb[5].mxu0 }
 0x4be   :  { %v1823_v28 = vadd.f32 %v1822_v31, %v1821_v55 }
 0x4c0   :  { %v1856_v25 = vpop.f32.mrb[4].mxu1  ;;  %v1690_v45 = vadd.f32 %v1823_v28, %v1622_v51 }
 0x4c1   :  { %v1857_v63 = vpop.f32.mrb[5].mxu1 }
 0x4c2   :  { %v1858_v16 = vadd.f32 %v1857_v63, %v1856_v25 }
 0x4c4   :  { %v1760_v53 = vadd.f32 %v1858_v16, %v1690_v45 }
 0x4c6   :  { %v1763_v1 = vsub.f32 0.0, %v1760_v53 }
 0x4c8   :  { %v1764_v6 = vmul.f32 1.442695, %v1763_v1 }
 0x4ca   :  { %2152 = vpow2.f32 %v1764_v6 }
 0x4d4   :  { %v2153_v52 = vpop.eup %2152 }
 0x4d5   :  { %v1766_v21 = vadd.f32 1.0, %v2153_v52 }
 0x4d7   :  { %2154 = vrcp.f32 %v1766_v21 }
 0x4e1   :  { %v2155_v43 = vpop.eup %2154 }
 0x4e2   :  { %1770 = vst.msk [vmem:[#allocation3] sm:$0x1] %vm1769_vm4, %v2155_v43 }
 0x4e3   :  { %2173 = shalt.err (!%p2170_p4)
}
 0x4e4   :  { %s2174_s22 = scalar_lea.hbm %s4350_s9, 16 }
 0x4e5   :  { %p2175_p5 = scmp.ne.s32.totalorder %s4350_s9, %s2174_s22  ;;  %p2178_p6 = scmp.lt.u32.totalorder %s2174_s22, %s4350_s9 }
 0x4e7   :  { %p2180_p7 = pnand %p2178_p6, %p2175_p5 }
 0x4e9   :  { %2183 = shalt.err (!%p2180_p7)
}
 0x4ea   :  { %1780 = dma.vmem_to_hbm [thread:$0]  %s1778_s13, 16, %s4350_s9, [#allocation4]  }
 0x4eb   :  { %2184 = dma.done.wait [#allocation4], 16  }
 0x4ec   :  { %2185 = vsyncadd [#allocation4], 4294967280 }
 0x4ed   :  { %1784 = vsyncpa [#allocation4], 1 }

</bundles_post_ra>
